<compile_context>
chip_gen: v5e
topology: v5e:2x2
jax: 0.10.0
libtpu: 0.0.40
codegen_flags: <defaults>
</compile_context>

<pallas_src>
import functools

import jax
import jax.numpy as jnp
from jax.experimental import pallas as pl
from jax.experimental.pallas import tpu as pltpu


def _round_up(a, b):
    return -(-a // b) * b


def _conv_bn_act_kernel(*refs, slab_h, th, kh, kw, s, dil, w_dense_p, act):
    x_refs = refs[:slab_h]                      # slab_h refs, each [W_pad_arr, C1] bf16
    w_ref, b_ref, o_ref, acc_ref = refs[slab_h:]
    # w_ref  : [kh*kw, C1, tile_n]      bf16  (BN scale folded)
    # b_ref  : [1, tile_n]              f32   (conv bias + BN shift folded)
    # o_ref  : [th*w_dense_p, tile_n]   bf16
    # acc_ref: [th*w_dense_p, tile_n]   f32

    m = th * w_dense_p
    # Initialize the accumulator with the folded bias (added exactly once per output).
    acc_ref[...] = jnp.broadcast_to(b_ref[...], (m, acc_ref.shape[-1]))

    # One MXU matmul per (kh, kw) tap, with all `th` output rows stacked into M.
    for dy in range(kh):
        for dx in range(kw):
            lhs = jnp.concatenate(
                [x_refs[r * s + dy * dil][pl.ds(dx * dil, w_dense_p), :]
                 for r in range(th)],
                axis=0)                                          # [th*w_dense_p, C1] bf16
            acc_ref[...] += jnp.dot(lhs, w_ref[dy * kw + dx],
                                    preferred_element_type=jnp.float32)

    y = acc_ref[...]
    if act:
        y = jnp.where(y >= 0, y, 0.1 * y)       # LeakyReLU(0.1)
    o_ref[...] = y.astype(o_ref.dtype)          # bf16 lane-dense writeback


def conv_bn_leaky(x, weight, bias, gamma, beta, running_mean, running_var,
                  *, stride=1, padding=0, dilation=1, groups=1, act=True,
                  eps=1e-5, rows_per_step=None, tile_n=None, target_m=256):
    """Pallas TPU version of nn.Conv2d -> nn.BatchNorm2d(eval) -> LeakyReLU(0.1).

    x: [N, C1, H, W] (NCHW), weight: [C2, C1, kh, kw], bias: [C2].
    Returns [N, C2, H_out, W_out] (NCHW, float32).
    """
    assert groups == 1  # TODO(synk): grouped convolution (groups > 1) not implemented
    N, C1, H, W = x.shape
    C2, _, kh, kw = weight.shape
    s, p, d = stride, padding, dilation

    H_out = (H + 2 * p - d * (kh - 1) - 1) // s + 1
    W_out = (W + 2 * p - d * (kw - 1) - 1) // s + 1

    # Dense (stride-1) output columns are computed in-kernel and subsampled in the wrapper.
    # TODO(synk): read strided columns in-kernel (strided pl.ds) to avoid the s-fold column
    # waste on stride>1 layers, and space-to-depth pack the C1=3 first layer.
    W_dense = W + 2 * p - d * (kw - 1)
    W_dense_p = _round_up(W_dense, 8)            # sublane-aligned row stacking
    W_pad_arr = W_dense_p + d * (kw - 1)         # padded row width presented to the kernel

    LANE = 128
    C2p = _round_up(C2, LANE)
    if tile_n is None:
        tile_n = LANE
        for cand in (512, 256):
            # keep the double-buffered weight block comfortably inside the VMEM cap
            if C2p % cand == 0 and 2 * kh * kw * C1 * cand * 2 <= (12 << 20):
                tile_n = cand
                break

    # Output rows per grid step: target a full MXU pass (M ~= target_m stacked rows).
    if rows_per_step is None:
        th = max(1, -(-target_m // W_dense_p))
    else:
        th = rows_per_step
    th = max(1, min(th, H_out))
    while th > 1 and th * W_dense_p > 2 * target_m:
        th -= 1
    n_row_tiles = -(-H_out // th)
    H_out_p = n_row_tiles * th
    M = th * W_dense_p

    # Input rows needed per grid step (kh reduction fully in-kernel -> single fetch per row).
    slab_h = (th - 1) * s + d * (kh - 1) + 1

    # NHWC, zero padded (extra bottom rows so the last row tile stays in bounds), bf16 for MXU.
    x_nhwc = jnp.transpose(x, (0, 2, 3, 1))
    h_need = (H_out_p - 1) * s + d * (kh - 1) + 1
    pad_h_hi = p + max(0, h_need - (H + 2 * p))
    pad_w_hi = W_pad_arr - W - p
    x_p = jnp.pad(x_nhwc, ((0, 0), (p, pad_h_hi), (p, pad_w_hi), (0, 0))).astype(jnp.bfloat16)

    # Fold conv bias + eval-mode BatchNorm into the matmul weight / bias.
    scale = gamma / jnp.sqrt(running_var + eps)                        # [C2]
    w_f = weight.astype(jnp.float32) * scale[:, None, None, None]      # OIHW, BN-scaled
    w_f = jnp.transpose(w_f, (2, 3, 1, 0)).reshape(kh * kw, C1, C2)    # [kh*kw, C1, C2]
    w_f = jnp.pad(w_f, ((0, 0), (0, 0), (0, C2p - C2))).astype(jnp.bfloat16)
    b_f = (bias - running_mean) * scale + beta
    b_f = jnp.pad(b_f, (0, C2p - C2)).reshape(1, C2p).astype(jnp.float32)

    grid = (N, n_row_tiles, C2p // tile_n)        # no reduction axis: all parallel

    x_specs = [
        pl.BlockSpec((None, None, W_pad_arr, C1),
                     (lambda n, i, j, r=r: (n, i * th * s + r, 0, 0)))
        for r in range(slab_h)
    ]
    w_spec = pl.BlockSpec((kh * kw, C1, tile_n), lambda n, i, j: (0, 0, j))
    b_spec = pl.BlockSpec((1, tile_n), lambda n, i, j: (0, j))
    o_spec = pl.BlockSpec((None, M, tile_n), lambda n, i, j: (n, i, j))

    # Tight VMEM budget: 2x (double-buffered) blocks + f32 accumulator + headroom, <= 32 MiB (v7x).
    blk_bytes = (slab_h * W_pad_arr * C1 * 2 + kh * kw * C1 * tile_n * 2
                 + tile_n * 4 + M * tile_n * 2)
    vmem_limit = int(min(max(2 * blk_bytes + M * tile_n * 4 + (2 << 20), 16 << 20), 32 << 20))

    out = pl.pallas_call(
        functools.partial(_conv_bn_act_kernel, slab_h=slab_h, th=th, kh=kh, kw=kw,
                          s=s, dil=d, w_dense_p=W_dense_p, act=act),
        out_shape=jax.ShapeDtypeStruct((N, H_out_p * W_dense_p, C2p), jnp.bfloat16),
        grid_spec=pltpu.PrefetchScalarGridSpec(
            num_scalar_prefetch=0,
            grid=grid,
            in_specs=x_specs + [w_spec, b_spec],
            out_specs=o_spec,
            scratch_shapes=[pltpu.VMEM((M, tile_n), jnp.float32)]),
        compiler_params=pltpu.CompilerParams(
            dimension_semantics=("parallel", "parallel", "parallel"),
            vmem_limit_bytes=vmem_limit),
    )(*([x_p] * slab_h), w_f, b_f)

    # Crop padded rows, subsample strided / padded columns, drop padded channels, back to NCHW.
    # TODO(synk): when chaining Conv layers, keep activations NHWC/bf16 (C padded to 128) and
    # skip this crop + transpose HBM round trip.
    out = out.reshape(N, H_out_p, W_dense_p, C2p)
    out = out[:, :H_out, :(W_out - 1) * s + 1:s, :C2]
    return jnp.transpose(out, (0, 3, 1, 2)).astype(jnp.float32)


def _reference_f32(x, weight, bias, gamma, beta, mean, var, *, s, p, d, eps, act):
    y = jax.lax.conv_general_dilated(
        x, weight, window_strides=(s, s), padding=((p, p), (p, p)),
        rhs_dilation=(d, d), dimension_numbers=("NCHW", "OIHW", "NCHW"),
        precision=jax.lax.Precision.HIGHEST)
    y = y + bias[None, :, None, None]
    y = (y - mean[None, :, None, None]) * (gamma / jnp.sqrt(var + eps))[None, :, None, None] \
        + beta[None, :, None, None]
    if act:
        y = jnp.where(y >= 0, y, 0.1 * y)
    return y


def _reference_bf16_folded(x, weight, bias, gamma, beta, mean, var, *, s, p, d, eps, act):
    # Matches kernel numerics: bf16 operands, BN folded into weights, f32 accumulation, bf16 store.
    scale = gamma / jnp.sqrt(var + eps)
    w_f = (weight.astype(jnp.float32) * scale[:, None, None, None]).astype(jnp.bfloat16)
    b_f = (bias - mean) * scale + beta
    y = jax.lax.conv_general_dilated(
        x.astype(jnp.bfloat16).astype(jnp.float32), w_f.astype(jnp.float32),
        window_strides=(s, s), padding=((p, p), (p, p)),
        rhs_dilation=(d, d), dimension_numbers=("NCHW", "OIHW", "NCHW"),
        precision=jax.lax.Precision.HIGHEST)
    y = y + b_f[None, :, None, None]
    if act:
        y = jnp.where(y >= 0, y, 0.1 * y)
    return y.astype(jnp.bfloat16).astype(jnp.float32)


if __name__ == "__main__":
    key = jax.random.PRNGKey(0)

    # (N, C1, H, W, C2, k, s, p, d): base Conv(4, 8, 3, s=1, p=1) plus a stride-2 variant.
    cases = [
        (2, 4, 16, 16, 8, 3, 1, 1, 1),
        (2, 8, 16, 16, 16, 3, 2, 1, 1),
    ]
    for (N, C1, H, W, C2, k, s, p, d) in cases:
        key, kx, kw_, kb, kg, kbt, km, kv = jax.random.split(key, 8)
        x = jax.random.normal(kx, (N, C1, H, W), jnp.float32)
        weight = 0.1 * jax.random.normal(kw_, (C2, C1, k, k), jnp.float32)
        bias = 0.1 * jax.random.normal(kb, (C2,), jnp.float32)
        gamma = 1.0 + 0.1 * jax.random.normal(kg, (C2,), jnp.float32)
        beta = 0.1 * jax.random.normal(kbt, (C2,), jnp.float32)
        running_mean = 0.1 * jax.random.normal(km, (C2,), jnp.float32)
        running_var = jnp.abs(jax.random.normal(kv, (C2,), jnp.float32)) + 0.5

        out = conv_bn_leaky(x, weight, bias, gamma, beta, running_mean, running_var,
                            stride=s, padding=p, dilation=d, groups=1, act=True)
        out = jax.block_until_ready(out)

        H_out = (H + 2 * p - d * (k - 1) - 1) // s + 1
        W_out = (W + 2 * p - d * (k - 1) - 1) // s + 1
        assert out.shape == (N, C2, H_out, W_out), out.shape

        # Matched-precision check (bf16 operands, f32 accumulation, bf16 store) — tight tolerance.
        ref_bf16 = _reference_bf16_folded(x, weight, bias, gamma, beta, running_mean,
                                          running_var, s=s, p=p, d=d, eps=1e-5, act=True)
        assert jnp.allclose(out, ref_bf16, atol=2e-2, rtol=2e-2), \
            float(jnp.max(jnp.abs(out - ref_bf16)))

        # Sanity check against the full-f32 reference — loose tolerance for bf16 MXU operands.
        ref_f32 = _reference_f32(x, weight, bias, gamma, beta, running_mean, running_var,
                                 s=s, p=p, d=d, eps=1e-5, act=True)
        assert jnp.allclose(out, ref_f32, atol=1e-1, rtol=1e-1), \
            float(jnp.max(jnp.abs(out - ref_f32)))

    print("KERNEL_OK")
</pallas_src>

<mosaic_0001>
module attributes {stable_mosaic.version = 11 : i64} {
  func.func @_conv_bn_act_kernel(%arg0: i32, %arg1: i32, %arg2: i32, %arg3: memref<1x1x18x4xbf16, #tpu.memory_space<vmem>>, %arg4: memref<1x1x18x4xbf16, #tpu.memory_space<vmem>>, %arg5: memref<1x1x18x4xbf16, #tpu.memory_space<vmem>>, %arg6: memref<1x1x18x4xbf16, #tpu.memory_space<vmem>>, %arg7: memref<1x1x18x4xbf16, #tpu.memory_space<vmem>>, %arg8: memref<1x1x18x4xbf16, #tpu.memory_space<vmem>>, %arg9: memref<1x1x18x4xbf16, #tpu.memory_space<vmem>>, %arg10: memref<1x1x18x4xbf16, #tpu.memory_space<vmem>>, %arg11: memref<1x1x18x4xbf16, #tpu.memory_space<vmem>>, %arg12: memref<1x1x18x4xbf16, #tpu.memory_space<vmem>>, %arg13: memref<1x1x18x4xbf16, #tpu.memory_space<vmem>>, %arg14: memref<1x1x18x4xbf16, #tpu.memory_space<vmem>>, %arg15: memref<1x1x18x4xbf16, #tpu.memory_space<vmem>>, %arg16: memref<1x1x18x4xbf16, #tpu.memory_space<vmem>>, %arg17: memref<1x1x18x4xbf16, #tpu.memory_space<vmem>>, %arg18: memref<1x1x18x4xbf16, #tpu.memory_space<vmem>>, %arg19: memref<1x1x18x4xbf16, #tpu.memory_space<vmem>>, %arg20: memref<1x1x18x4xbf16, #tpu.memory_space<vmem>>, %arg21: memref<9x4x128xbf16, #tpu.memory_space<vmem>>, %arg22: memref<1x128xf32, #tpu.memory_space<vmem>>, %arg23: memref<1x256x128xbf16, #tpu.memory_space<vmem>>, %arg24: memref<256x128xf32, #tpu.memory_space<vmem>>) attributes {dimension_semantics = [#tpu.dimension_semantics<parallel>, #tpu.dimension_semantics<parallel>, #tpu.dimension_semantics<parallel>], iteration_bounds = array<i64: 2, 1, 1>, scalar_prefetch = 0 : i64, scratch_operands = 1 : i64, tpu.core_type = #tpu.core_type<tc>, window_params = [{transform_indices = @transform_0, window_bounds = array<i64: 1, 1, 18, 4>}, {transform_indices = @transform_1, window_bounds = array<i64: 1, 1, 18, 4>}, {transform_indices = @transform_2, window_bounds = array<i64: 1, 1, 18, 4>}, {transform_indices = @transform_3, window_bounds = array<i64: 1, 1, 18, 4>}, {transform_indices = @transform_4, window_bounds = array<i64: 1, 1, 18, 4>}, {transform_indices = @transform_5, window_bounds = array<i64: 1, 1, 18, 4>}, {transform_indices = @transform_6, window_bounds = array<i64: 1, 1, 18, 4>}, {transform_indices = @transform_7, window_bounds = array<i64: 1, 1, 18, 4>}, {transform_indices = @transform_8, window_bounds = array<i64: 1, 1, 18, 4>}, {transform_indices = @transform_9, window_bounds = array<i64: 1, 1, 18, 4>}, {transform_indices = @transform_10, window_bounds = array<i64: 1, 1, 18, 4>}, {transform_indices = @transform_11, window_bounds = array<i64: 1, 1, 18, 4>}, {transform_indices = @transform_12, window_bounds = array<i64: 1, 1, 18, 4>}, {transform_indices = @transform_13, window_bounds = array<i64: 1, 1, 18, 4>}, {transform_indices = @transform_14, window_bounds = array<i64: 1, 1, 18, 4>}, {transform_indices = @transform_15, window_bounds = array<i64: 1, 1, 18, 4>}, {transform_indices = @transform_16, window_bounds = array<i64: 1, 1, 18, 4>}, {transform_indices = @transform_17, window_bounds = array<i64: 1, 1, 18, 4>}, {transform_indices = @transform_18, window_bounds = array<i64: 9, 4, 128>}, {transform_indices = @transform_19, window_bounds = array<i64: 1, 128>}, {transform_indices = @transform_20, window_bounds = array<i64: 1, 256, 128>}]} {
    %c0 = arith.constant 0 : index
    %c0_0 = arith.constant 0 : index
    %0 = vector.load %arg22[%c0, %c0_0] : memref<1x128xf32, #tpu.memory_space<vmem>>, vector<1x128xf32>
    %1 = vector.shape_cast %0 : vector<1x128xf32> to vector<1x128xf32>
    %2 = vector.broadcast %1 : vector<1x128xf32> to vector<256x128xf32>
    %c0_1 = arith.constant 0 : index
    %c0_2 = arith.constant 0 : index
    %3 = vector.load %arg24[%c0_1, %c0_2] : memref<256x128xf32, #tpu.memory_space<vmem>>, vector<256x128xf32>
    tpu.vector_store %arg24[%c0_1, %c0_2], %2 {strides = array<i32>} : memref<256x128xf32, #tpu.memory_space<vmem>>, vector<256x128xf32>,
    %c0_3 = arith.constant 0 : index
    %c0_4 = arith.constant 0 : index
    %c0_5 = arith.constant 0 : index
    %c0_6 = arith.constant 0 : index
    %4 = vector.load %arg3[%c0_3, %c0_4, %c0_5, %c0_6] : memref<1x1x18x4xbf16, #tpu.memory_space<vmem>>, vector<1x1x16x4xbf16>
    %5 = vector.shape_cast %4 : vector<1x1x16x4xbf16> to vector<16x4xbf16>
    %c0_7 = arith.constant 0 : index
    %c0_8 = arith.constant 0 : index
    %c0_9 = arith.constant 0 : index
    %c0_10 = arith.constant 0 : index
    %6 = vector.load %arg4[%c0_7, %c0_8, %c0_9, %c0_10] : memref<1x1x18x4xbf16, #tpu.memory_space<vmem>>, vector<1x1x16x4xbf16>
    %7 = vector.shape_cast %6 : vector<1x1x16x4xbf16> to vector<16x4xbf16>
    %c0_11 = arith.constant 0 : index
    %c0_12 = arith.constant 0 : index
    %c0_13 = arith.constant 0 : index
    %c0_14 = arith.constant 0 : index
    %8 = vector.load %arg5[%c0_11, %c0_12, %c0_13, %c0_14] : memref<1x1x18x4xbf16, #tpu.memory_space<vmem>>, vector<1x1x16x4xbf16>
    %9 = vector.shape_cast %8 : vector<1x1x16x4xbf16> to vector<16x4xbf16>
    %c0_15 = arith.constant 0 : index
    %c0_16 = arith.constant 0 : index
    %c0_17 = arith.constant 0 : index
    %c0_18 = arith.constant 0 : index
    %10 = vector.load %arg6[%c0_15, %c0_16, %c0_17, %c0_18] : memref<1x1x18x4xbf16, #tpu.memory_space<vmem>>, vector<1x1x16x4xbf16>
    %11 = vector.shape_cast %10 : vector<1x1x16x4xbf16> to vector<16x4xbf16>
    %c0_19 = arith.constant 0 : index
    %c0_20 = arith.constant 0 : index
    %c0_21 = arith.constant 0 : index
    %c0_22 = arith.constant 0 : index
    %12 = vector.load %arg7[%c0_19, %c0_20, %c0_21, %c0_22] : memref<1x1x18x4xbf16, #tpu.memory_space<vmem>>, vector<1x1x16x4xbf16>
    %13 = vector.shape_cast %12 : vector<1x1x16x4xbf16> to vector<16x4xbf16>
    %c0_23 = arith.constant 0 : index
    %c0_24 = arith.constant 0 : index
    %c0_25 = arith.constant 0 : index
    %c0_26 = arith.constant 0 : index
    %14 = vector.load %arg8[%c0_23, %c0_24, %c0_25, %c0_26] : memref<1x1x18x4xbf16, #tpu.memory_space<vmem>>, vector<1x1x16x4xbf16>
    %15 = vector.shape_cast %14 : vector<1x1x16x4xbf16> to vector<16x4xbf16>
    %c0_27 = arith.constant 0 : index
    %c0_28 = arith.constant 0 : index
    %c0_29 = arith.constant 0 : index
    %c0_30 = arith.constant 0 : index
    %16 = vector.load %arg9[%c0_27, %c0_28, %c0_29, %c0_30] : memref<1x1x18x4xbf16, #tpu.memory_space<vmem>>, vector<1x1x16x4xbf16>
    %17 = vector.shape_cast %16 : vector<1x1x16x4xbf16> to vector<16x4xbf16>
    %c0_31 = arith.constant 0 : index
    %c0_32 = arith.constant 0 : index
    %c0_33 = arith.constant 0 : index
    %c0_34 = arith.constant 0 : index
    %18 = vector.load %arg10[%c0_31, %c0_32, %c0_33, %c0_34] : memref<1x1x18x4xbf16, #tpu.memory_space<vmem>>, vector<1x1x16x4xbf16>
    %19 = vector.shape_cast %18 : vector<1x1x16x4xbf16> to vector<16x4xbf16>
    %c0_35 = arith.constant 0 : index
    %c0_36 = arith.constant 0 : index
    %c0_37 = arith.constant 0 : index
    %c0_38 = arith.constant 0 : index
    %20 = vector.load %arg11[%c0_35, %c0_36, %c0_37, %c0_38] : memref<1x1x18x4xbf16, #tpu.memory_space<vmem>>, vector<1x1x16x4xbf16>
    %21 = vector.shape_cast %20 : vector<1x1x16x4xbf16> to vector<16x4xbf16>
    %c0_39 = arith.constant 0 : index
    %c0_40 = arith.constant 0 : index
    %c0_41 = arith.constant 0 : index
    %c0_42 = arith.constant 0 : index
    %22 = vector.load %arg12[%c0_39, %c0_40, %c0_41, %c0_42] : memref<1x1x18x4xbf16, #tpu.memory_space<vmem>>, vector<1x1x16x4xbf16>
    %23 = vector.shape_cast %22 : vector<1x1x16x4xbf16> to vector<16x4xbf16>
    %c0_43 = arith.constant 0 : index
    %c0_44 = arith.constant 0 : index
    %c0_45 = arith.constant 0 : index
    %c0_46 = arith.constant 0 : index
    %24 = vector.load %arg13[%c0_43, %c0_44, %c0_45, %c0_46] : memref<1x1x18x4xbf16, #tpu.memory_space<vmem>>, vector<1x1x16x4xbf16>
    %25 = vector.shape_cast %24 : vector<1x1x16x4xbf16> to vector<16x4xbf16>
    %c0_47 = arith.constant 0 : index
    %c0_48 = arith.constant 0 : index
    %c0_49 = arith.constant 0 : index
    %c0_50 = arith.constant 0 : index
    %26 = vector.load %arg14[%c0_47, %c0_48, %c0_49, %c0_50] : memref<1x1x18x4xbf16, #tpu.memory_space<vmem>>, vector<1x1x16x4xbf16>
    %27 = vector.shape_cast %26 : vector<1x1x16x4xbf16> to vector<16x4xbf16>
    %c0_51 = arith.constant 0 : index
    %c0_52 = arith.constant 0 : index
    %c0_53 = arith.constant 0 : index
    %c0_54 = arith.constant 0 : index
    %28 = vector.load %arg15[%c0_51, %c0_52, %c0_53, %c0_54] : memref<1x1x18x4xbf16, #tpu.memory_space<vmem>>, vector<1x1x16x4xbf16>
    %29 = vector.shape_cast %28 : vector<1x1x16x4xbf16> to vector<16x4xbf16>
    %c0_55 = arith.constant 0 : index
    %c0_56 = arith.constant 0 : index
    %c0_57 = arith.constant 0 : index
    %c0_58 = arith.constant 0 : index
    %30 = vector.load %arg16[%c0_55, %c0_56, %c0_57, %c0_58] : memref<1x1x18x4xbf16, #tpu.memory_space<vmem>>, vector<1x1x16x4xbf16>
    %31 = vector.shape_cast %30 : vector<1x1x16x4xbf16> to vector<16x4xbf16>
    %c0_59 = arith.constant 0 : index
    %c0_60 = arith.constant 0 : index
    %c0_61 = arith.constant 0 : index
    %c0_62 = arith.constant 0 : index
    %32 = vector.load %arg17[%c0_59, %c0_60, %c0_61, %c0_62] : memref<1x1x18x4xbf16, #tpu.memory_space<vmem>>, vector<1x1x16x4xbf16>
    %33 = vector.shape_cast %32 : vector<1x1x16x4xbf16> to vector<16x4xbf16>
    %c0_63 = arith.constant 0 : index
    %c0_64 = arith.constant 0 : index
    %c0_65 = arith.constant 0 : index
    %c0_66 = arith.constant 0 : index
    %34 = vector.load %arg18[%c0_63, %c0_64, %c0_65, %c0_66] : memref<1x1x18x4xbf16, #tpu.memory_space<vmem>>, vector<1x1x16x4xbf16>
    %35 = vector.shape_cast %34 : vector<1x1x16x4xbf16> to vector<16x4xbf16>
    %36 = tpu.concatenate %5, %7, %9, %11, %13, %15, %17, %19, %21, %23, %25, %27, %29, %31, %33, %35 in 0 : vector<16x4xbf16>, vector<16x4xbf16>, vector<16x4xbf16>, vector<16x4xbf16>, vector<16x4xbf16>, vector<16x4xbf16>, vector<16x4xbf16>, vector<16x4xbf16>, vector<16x4xbf16>, vector<16x4xbf16>, vector<16x4xbf16>, vector<16x4xbf16>, vector<16x4xbf16>, vector<16x4xbf16>, vector<16x4xbf16>, vector<16x4xbf16> -> vector<256x4xbf16>
    %c0_67 = arith.constant 0 : index
    %c0_68 = arith.constant 0 : index
    %37 = vector.load %arg24[%c0_67, %c0_68] : memref<256x128xf32, #tpu.memory_space<vmem>>, vector<256x128xf32>
    %c0_69 = arith.constant 0 : index
    %c0_70 = arith.constant 0 : index
    %c0_71 = arith.constant 0 : index
    %38 = vector.load %arg21[%c0_69, %c0_70, %c0_71] : memref<9x4x128xbf16, #tpu.memory_space<vmem>>, vector<1x4x128xbf16>
    %39 = vector.shape_cast %38 : vector<1x4x128xbf16> to vector<4x128xbf16>
    %cst = arith.constant dense<0.000000e+00> : vector<256x128xf32>
    %40 = tpu.matmul %36, %39, %cst {dimension_numbers = #tpu.dot_dimension_numbers<[1], [0], [0], [1], [0, 0, 1, 1], [], []>} : vector<256x4xbf16>, vector<4x128xbf16>, vector<256x128xf32> -> vector<256x128xf32>
    %41 = arith.addf %37, %40 : vector<256x128xf32>
    %c0_72 = arith.constant 0 : index
    %c0_73 = arith.constant 0 : index
    %42 = vector.load %arg24[%c0_72, %c0_73] : memref<256x128xf32, #tpu.memory_space<vmem>>, vector<256x128xf32>
    tpu.vector_store %arg24[%c0_72, %c0_73], %41 {strides = array<i32>} : memref<256x128xf32, #tpu.memory_space<vmem>>, vector<256x128xf32>,
    %c0_74 = arith.constant 0 : index
    %c0_75 = arith.constant 0 : index
    %c1 = arith.constant 1 : index
    %c0_76 = arith.constant 0 : index
    %43 = vector.load %arg3[%c0_74, %c0_75, %c1, %c0_76] : memref<1x1x18x4xbf16, #tpu.memory_space<vmem>>, vector<1x1x16x4xbf16>
    %44 = vector.shape_cast %43 : vector<1x1x16x4xbf16> to vector<16x4xbf16>
    %c0_77 = arith.constant 0 : index
    %c0_78 = arith.constant 0 : index
    %c1_79 = arith.constant 1 : index
    %c0_80 = arith.constant 0 : index
    %45 = vector.load %arg4[%c0_77, %c0_78, %c1_79, %c0_80] : memref<1x1x18x4xbf16, #tpu.memory_space<vmem>>, vector<1x1x16x4xbf16>
    %46 = vector.shape_cast %45 : vector<1x1x16x4xbf16> to vector<16x4xbf16>
    %c0_81 = arith.constant 0 : index
    %c0_82 = arith.constant 0 : index
    %c1_83 = arith.constant 1 : index
    %c0_84 = arith.constant 0 : index
    %47 = vector.load %arg5[%c0_81, %c0_82, %c1_83, %c0_84] : memref<1x1x18x4xbf16, #tpu.memory_space<vmem>>, vector<1x1x16x4xbf16>
    %48 = vector.shape_cast %47 : vector<1x1x16x4xbf16> to vector<16x4xbf16>
    %c0_85 = arith.constant 0 : index
    %c0_86 = arith.constant 0 : index
    %c1_87 = arith.constant 1 : index
    %c0_88 = arith.constant 0 : index
    %49 = vector.load %arg6[%c0_85, %c0_86, %c1_87, %c0_88] : memref<1x1x18x4xbf16, #tpu.memory_space<vmem>>, vector<1x1x16x4xbf16>
    %50 = vector.shape_cast %49 : vector<1x1x16x4xbf16> to vector<16x4xbf16>
    %c0_89 = arith.constant 0 : index
    %c0_90 = arith.constant 0 : index
    %c1_91 = arith.constant 1 : index
    %c0_92 = arith.constant 0 : index
    %51 = vector.load %arg7[%c0_89, %c0_90, %c1_91, %c0_92] : memref<1x1x18x4xbf16, #tpu.memory_space<vmem>>, vector<1x1x16x4xbf16>
    %52 = vector.shape_cast %51 : vector<1x1x16x4xbf16> to vector<16x4xbf16>
    %c0_93 = arith.constant 0 : index
    %c0_94 = arith.constant 0 : index
    %c1_95 = arith.constant 1 : index
    %c0_96 = arith.constant 0 : index
    %53 = vector.load %arg8[%c0_93, %c0_94, %c1_95, %c0_96] : memref<1x1x18x4xbf16, #tpu.memory_space<vmem>>, vector<1x1x16x4xbf16>
    %54 = vector.shape_cast %53 : vector<1x1x16x4xbf16> to vector<16x4xbf16>
    %c0_97 = arith.constant 0 : index
    %c0_98 = arith.constant 0 : index
    %c1_99 = arith.constant 1 : index
    %c0_100 = arith.constant 0 : index
    %55 = vector.load %arg9[%c0_97, %c0_98, %c1_99, %c0_100] : memref<1x1x18x4xbf16, #tpu.memory_space<vmem>>, vector<1x1x16x4xbf16>
    %56 = vector.shape_cast %55 : vector<1x1x16x4xbf16> to vector<16x4xbf16>
    %c0_101 = arith.constant 0 : index
    %c0_102 = arith.constant 0 : index
    %c1_103 = arith.constant 1 : index
    %c0_104 = arith.constant 0 : index
    %57 = vector.load %arg10[%c0_101, %c0_102, %c1_103, %c0_104] : memref<1x1x18x4xbf16, #tpu.memory_space<vmem>>, vector<1x1x16x4xbf16>
    %58 = vector.shape_cast %57 : vector<1x1x16x4xbf16> to vector<16x4xbf16>
    %c0_105 = arith.constant 0 : index
    %c0_106 = arith.constant 0 : index
    %c1_107 = arith.constant 1 : index
    %c0_108 = arith.constant 0 : index
    %59 = vector.load %arg11[%c0_105, %c0_106, %c1_107, %c0_108] : memref<1x1x18x4xbf16, #tpu.memory_space<vmem>>, vector<1x1x16x4xbf16>
    %60 = vector.shape_cast %59 : vector<1x1x16x4xbf16> to vector<16x4xbf16>
    %c0_109 = arith.constant 0 : index
    %c0_110 = arith.constant 0 : index
    %c1_111 = arith.constant 1 : index
    %c0_112 = arith.constant 0 : index
    %61 = vector.load %arg12[%c0_109, %c0_110, %c1_111, %c0_112] : memref<1x1x18x4xbf16, #tpu.memory_space<vmem>>, vector<1x1x16x4xbf16>
    %62 = vector.shape_cast %61 : vector<1x1x16x4xbf16> to vector<16x4xbf16>
    %c0_113 = arith.constant 0 : index
    %c0_114 = arith.constant 0 : index
    %c1_115 = arith.constant 1 : index
    %c0_116 = arith.constant 0 : index
    %63 = vector.load %arg13[%c0_113, %c0_114, %c1_115, %c0_116] : memref<1x1x18x4xbf16, #tpu.memory_space<vmem>>, vector<1x1x16x4xbf16>
    %64 = vector.shape_cast %63 : vector<1x1x16x4xbf16> to vector<16x4xbf16>
    %c0_117 = arith.constant 0 : index
    %c0_118 = arith.constant 0 : index
    %c1_119 = arith.constant 1 : index
    %c0_120 = arith.constant 0 : index
    %65 = vector.load %arg14[%c0_117, %c0_118, %c1_119, %c0_120] : memref<1x1x18x4xbf16, #tpu.memory_space<vmem>>, vector<1x1x16x4xbf16>
    %66 = vector.shape_cast %65 : vector<1x1x16x4xbf16> to vector<16x4xbf16>
    %c0_121 = arith.constant 0 : index
    %c0_122 = arith.constant 0 : index
    %c1_123 = arith.constant 1 : index
    %c0_124 = arith.constant 0 : index
    %67 = vector.load %arg15[%c0_121, %c0_122, %c1_123, %c0_124] : memref<1x1x18x4xbf16, #tpu.memory_space<vmem>>, vector<1x1x16x4xbf16>
    %68 = vector.shape_cast %67 : vector<1x1x16x4xbf16> to vector<16x4xbf16>
    %c0_125 = arith.constant 0 : index
    %c0_126 = arith.constant 0 : index
    %c1_127 = arith.constant 1 : index
    %c0_128 = arith.constant 0 : index
    %69 = vector.load %arg16[%c0_125, %c0_126, %c1_127, %c0_128] : memref<1x1x18x4xbf16, #tpu.memory_space<vmem>>, vector<1x1x16x4xbf16>
    %70 = vector.shape_cast %69 : vector<1x1x16x4xbf16> to vector<16x4xbf16>
    %c0_129 = arith.constant 0 : index
    %c0_130 = arith.constant 0 : index
    %c1_131 = arith.constant 1 : index
    %c0_132 = arith.constant 0 : index
    %71 = vector.load %arg17[%c0_129, %c0_130, %c1_131, %c0_132] : memref<1x1x18x4xbf16, #tpu.memory_space<vmem>>, vector<1x1x16x4xbf16>
    %72 = vector.shape_cast %71 : vector<1x1x16x4xbf16> to vector<16x4xbf16>
    %c0_133 = arith.constant 0 : index
    %c0_134 = arith.constant 0 : index
    %c1_135 = arith.constant 1 : index
    %c0_136 = arith.constant 0 : index
    %73 = vector.load %arg18[%c0_133, %c0_134, %c1_135, %c0_136] : memref<1x1x18x4xbf16, #tpu.memory_space<vmem>>, vector<1x1x16x4xbf16>
    %74 = vector.shape_cast %73 : vector<1x1x16x4xbf16> to vector<16x4xbf16>
    %75 = tpu.concatenate %44, %46, %48, %50, %52, %54, %56, %58, %60, %62, %64, %66, %68, %70, %72, %74 in 0 : vector<16x4xbf16>, vector<16x4xbf16>, vector<16x4xbf16>, vector<16x4xbf16>, vector<16x4xbf16>, vector<16x4xbf16>, vector<16x4xbf16>, vector<16x4xbf16>, vector<16x4xbf16>, vector<16x4xbf16>, vector<16x4xbf16>, vector<16x4xbf16>, vector<16x4xbf16>, vector<16x4xbf16>, vector<16x4xbf16>, vector<16x4xbf16> -> vector<256x4xbf16>
    %c0_137 = arith.constant 0 : index
    %c0_138 = arith.constant 0 : index
    %76 = vector.load %arg24[%c0_137, %c0_138] : memref<256x128xf32, #tpu.memory_space<vmem>>, vector<256x128xf32>
    %c1_139 = arith.constant 1 : index
    %c0_140 = arith.constant 0 : index
    %c0_141 = arith.constant 0 : index
    %77 = vector.load %arg21[%c1_139, %c0_140, %c0_141] : memref<9x4x128xbf16, #tpu.memory_space<vmem>>, vector<1x4x128xbf16>
    %78 = vector.shape_cast %77 : vector<1x4x128xbf16> to vector<4x128xbf16>
    %cst_142 = arith.constant dense<0.000000e+00> : vector<256x128xf32>
    %79 = tpu.matmul %75, %78, %cst_142 {dimension_numbers = #tpu.dot_dimension_numbers<[1], [0], [0], [1], [0, 0, 1, 1], [], []>} : vector<256x4xbf16>, vector<4x128xbf16>, vector<256x128xf32> -> vector<256x128xf32>
    %80 = arith.addf %76, %79 : vector<256x128xf32>
    %c0_143 = arith.constant 0 : index
    %c0_144 = arith.constant 0 : index
    %81 = vector.load %arg24[%c0_143, %c0_144] : memref<256x128xf32, #tpu.memory_space<vmem>>, vector<256x128xf32>
    tpu.vector_store %arg24[%c0_143, %c0_144], %80 {strides = array<i32>} : memref<256x128xf32, #tpu.memory_space<vmem>>, vector<256x128xf32>,
    %c0_145 = arith.constant 0 : index
    %c0_146 = arith.constant 0 : index
    %c2 = arith.constant 2 : index
    %c0_147 = arith.constant 0 : index
    %82 = vector.load %arg3[%c0_145, %c0_146, %c2, %c0_147] : memref<1x1x18x4xbf16, #tpu.memory_space<vmem>>, vector<1x1x16x4xbf16>
    %83 = vector.shape_cast %82 : vector<1x1x16x4xbf16> to vector<16x4xbf16>
    %c0_148 = arith.constant 0 : index
    %c0_149 = arith.constant 0 : index
    %c2_150 = arith.constant 2 : index
    %c0_151 = arith.constant 0 : index
    %84 = vector.load %arg4[%c0_148, %c0_149, %c2_150, %c0_151] : memref<1x1x18x4xbf16, #tpu.memory_space<vmem>>, vector<1x1x16x4xbf16>
    %85 = vector.shape_cast %84 : vector<1x1x16x4xbf16> to vector<16x4xbf16>
    %c0_152 = arith.constant 0 : index
    %c0_153 = arith.constant 0 : index
    %c2_154 = arith.constant 2 : index
    %c0_155 = arith.constant 0 : index
    %86 = vector.load %arg5[%c0_152, %c0_153, %c2_154, %c0_155] : memref<1x1x18x4xbf16, #tpu.memory_space<vmem>>, vector<1x1x16x4xbf16>
    %87 = vector.shape_cast %86 : vector<1x1x16x4xbf16> to vector<16x4xbf16>
    %c0_156 = arith.constant 0 : index
    %c0_157 = arith.constant 0 : index
    %c2_158 = arith.constant 2 : index
    %c0_159 = arith.constant 0 : index
    %88 = vector.load %arg6[%c0_156, %c0_157, %c2_158, %c0_159] : memref<1x1x18x4xbf16, #tpu.memory_space<vmem>>, vector<1x1x16x4xbf16>
    %89 = vector.shape_cast %88 : vector<1x1x16x4xbf16> to vector<16x4xbf16>
    %c0_160 = arith.constant 0 : index
    %c0_161 = arith.constant 0 : index
    %c2_162 = arith.constant 2 : index
    %c0_163 = arith.constant 0 : index
    %90 = vector.load %arg7[%c0_160, %c0_161, %c2_162, %c0_163] : memref<1x1x18x4xbf16, #tpu.memory_space<vmem>>, vector<1x1x16x4xbf16>
    %91 = vector.shape_cast %90 : vector<1x1x16x4xbf16> to vector<16x4xbf16>
    %c0_164 = arith.constant 0 : index
    %c0_165 = arith.constant 0 : index
    %c2_166 = arith.constant 2 : index
    %c0_167 = arith.constant 0 : index
    %92 = vector.load %arg8[%c0_164, %c0_165, %c2_166, %c0_167] : memref<1x1x18x4xbf16, #tpu.memory_space<vmem>>, vector<1x1x16x4xbf16>
    %93 = vector.shape_cast %92 : vector<1x1x16x4xbf16> to vector<16x4xbf16>
    %c0_168 = arith.constant 0 : index
    %c0_169 = arith.constant 0 : index
    %c2_170 = arith.constant 2 : index
    %c0_171 = arith.constant 0 : index
    %94 = vector.load %arg9[%c0_168, %c0_169, %c2_170, %c0_171] : memref<1x1x18x4xbf16, #tpu.memory_space<vmem>>, vector<1x1x16x4xbf16>
    %95 = vector.shape_cast %94 : vector<1x1x16x4xbf16> to vector<16x4xbf16>
    %c0_172 = arith.constant 0 : index
    %c0_173 = arith.constant 0 : index
    %c2_174 = arith.constant 2 : index
    %c0_175 = arith.constant 0 : index
    %96 = vector.load %arg10[%c0_172, %c0_173, %c2_174, %c0_175] : memref<1x1x18x4xbf16, #tpu.memory_space<vmem>>, vector<1x1x16x4xbf16>
    %97 = vector.shape_cast %96 : vector<1x1x16x4xbf16> to vector<16x4xbf16>
    %c0_176 = arith.constant 0 : index
    %c0_177 = arith.constant 0 : index
    %c2_178 = arith.constant 2 : index
    %c0_179 = arith.constant 0 : index
    %98 = vector.load %arg11[%c0_176, %c0_177, %c2_178, %c0_179] : memref<1x1x18x4xbf16, #tpu.memory_space<vmem>>, vector<1x1x16x4xbf16>
    %99 = vector.shape_cast %98 : vector<1x1x16x4xbf16> to vector<16x4xbf16>
    %c0_180 = arith.constant 0 : index
    %c0_181 = arith.constant 0 : index
    %c2_182 = arith.constant 2 : index
    %c0_183 = arith.constant 0 : index
    %100 = vector.load %arg12[%c0_180, %c0_181, %c2_182, %c0_183] : memref<1x1x18x4xbf16, #tpu.memory_space<vmem>>, vector<1x1x16x4xbf16>
    %101 = vector.shape_cast %100 : vector<1x1x16x4xbf16> to vector<16x4xbf16>
    %c0_184 = arith.constant 0 : index
    %c0_185 = arith.constant 0 : index
    %c2_186 = arith.constant 2 : index
    %c0_187 = arith.constant 0 : index
    %102 = vector.load %arg13[%c0_184, %c0_185, %c2_186, %c0_187] : memref<1x1x18x4xbf16, #tpu.memory_space<vmem>>, vector<1x1x16x4xbf16>
    %103 = vector.shape_cast %102 : vector<1x1x16x4xbf16> to vector<16x4xbf16>
    %c0_188 = arith.constant 0 : index
    %c0_189 = arith.constant 0 : index
    %c2_190 = arith.constant 2 : index
    %c0_191 = arith.constant 0 : index
    %104 = vector.load %arg14[%c0_188, %c0_189, %c2_190, %c0_191] : memref<1x1x18x4xbf16, #tpu.memory_space<vmem>>, vector<1x1x16x4xbf16>
    %105 = vector.shape_cast %104 : vector<1x1x16x4xbf16> to vector<16x4xbf16>
    %c0_192 = arith.constant 0 : index
    %c0_193 = arith.constant 0 : index
    %c2_194 = arith.constant 2 : index
    %c0_195 = arith.constant 0 : index
    %106 = vector.load %arg15[%c0_192, %c0_193, %c2_194, %c0_195] : memref<1x1x18x4xbf16, #tpu.memory_space<vmem>>, vector<1x1x16x4xbf16>
    %107 = vector.shape_cast %106 : vector<1x1x16x4xbf16> to vector<16x4xbf16>
    %c0_196 = arith.constant 0 : index
    %c0_197 = arith.constant 0 : index
    %c2_198 = arith.constant 2 : index
    %c0_199 = arith.constant 0 : index
    %108 = vector.load %arg16[%c0_196, %c0_197, %c2_198, %c0_199] : memref<1x1x18x4xbf16, #tpu.memory_space<vmem>>, vector<1x1x16x4xbf16>
    %109 = vector.shape_cast %108 : vector<1x1x16x4xbf16> to vector<16x4xbf16>
    %c0_200 = arith.constant 0 : index
    %c0_201 = arith.constant 0 : index
    %c2_202 = arith.constant 2 : index
    %c0_203 = arith.constant 0 : index
    %110 = vector.load %arg17[%c0_200, %c0_201, %c2_202, %c0_203] : memref<1x1x18x4xbf16, #tpu.memory_space<vmem>>, vector<1x1x16x4xbf16>
    %111 = vector.shape_cast %110 : vector<1x1x16x4xbf16> to vector<16x4xbf16>
    %c0_204 = arith.constant 0 : index
    %c0_205 = arith.constant 0 : index
    %c2_206 = arith.constant 2 : index
    %c0_207 = arith.constant 0 : index
    %112 = vector.load %arg18[%c0_204, %c0_205, %c2_206, %c0_207] : memref<1x1x18x4xbf16, #tpu.memory_space<vmem>>, vector<1x1x16x4xbf16>
    %113 = vector.shape_cast %112 : vector<1x1x16x4xbf16> to vector<16x4xbf16>
    %114 = tpu.concatenate %83, %85, %87, %89, %91, %93, %95, %97, %99, %101, %103, %105, %107, %109, %111, %113 in 0 : vector<16x4xbf16>, vector<16x4xbf16>, vector<16x4xbf16>, vector<16x4xbf16>, vector<16x4xbf16>, vector<16x4xbf16>, vector<16x4xbf16>, vector<16x4xbf16>, vector<16x4xbf16>, vector<16x4xbf16>, vector<16x4xbf16>, vector<16x4xbf16>, vector<16x4xbf16>, vector<16x4xbf16>, vector<16x4xbf16>, vector<16x4xbf16> -> vector<256x4xbf16>
    %c0_208 = arith.constant 0 : index
    %c0_209 = arith.constant 0 : index
    %115 = vector.load %arg24[%c0_208, %c0_209] : memref<256x128xf32, #tpu.memory_space<vmem>>, vector<256x128xf32>
    %c2_210 = arith.constant 2 : index
    %c0_211 = arith.constant 0 : index
    %c0_212 = arith.constant 0 : index
    %116 = vector.load %arg21[%c2_210, %c0_211, %c0_212] : memref<9x4x128xbf16, #tpu.memory_space<vmem>>, vector<1x4x128xbf16>
    %117 = vector.shape_cast %116 : vector<1x4x128xbf16> to vector<4x128xbf16>
    %cst_213 = arith.constant dense<0.000000e+00> : vector<256x128xf32>
    %118 = tpu.matmul %114, %117, %cst_213 {dimension_numbers = #tpu.dot_dimension_numbers<[1], [0], [0], [1], [0, 0, 1, 1], [], []>} : vector<256x4xbf16>, vector<4x128xbf16>, vector<256x128xf32> -> vector<256x128xf32>
    %119 = arith.addf %115, %118 : vector<256x128xf32>
    %c0_214 = arith.constant 0 : index
    %c0_215 = arith.constant 0 : index
    %120 = vector.load %arg24[%c0_214, %c0_215] : memref<256x128xf32, #tpu.memory_space<vmem>>, vector<256x128xf32>
    tpu.vector_store %arg24[%c0_214, %c0_215], %119 {strides = array<i32>} : memref<256x128xf32, #tpu.memory_space<vmem>>, vector<256x128xf32>,
    %c0_216 = arith.constant 0 : index
    %c0_217 = arith.constant 0 : index
    %c0_218 = arith.constant 0 : index
    %c0_219 = arith.constant 0 : index
    %121 = vector.load %arg4[%c0_216, %c0_217, %c0_218, %c0_219] : memref<1x1x18x4xbf16, #tpu.memory_space<vmem>>, vector<1x1x16x4xbf16>
    %122 = vector.shape_cast %121 : vector<1x1x16x4xbf16> to vector<16x4xbf16>
    %c0_220 = arith.constant 0 : index
    %c0_221 = arith.constant 0 : index
    %c0_222 = arith.constant 0 : index
    %c0_223 = arith.constant 0 : index
    %123 = vector.load %arg5[%c0_220, %c0_221, %c0_222, %c0_223] : memref<1x1x18x4xbf16, #tpu.memory_space<vmem>>, vector<1x1x16x4xbf16>
    %124 = vector.shape_cast %123 : vector<1x1x16x4xbf16> to vector<16x4xbf16>
    %c0_224 = arith.constant 0 : index
    %c0_225 = arith.constant 0 : index
    %c0_226 = arith.constant 0 : index
    %c0_227 = arith.constant 0 : index
    %125 = vector.load %arg6[%c0_224, %c0_225, %c0_226, %c0_227] : memref<1x1x18x4xbf16, #tpu.memory_space<vmem>>, vector<1x1x16x4xbf16>
    %126 = vector.shape_cast %125 : vector<1x1x16x4xbf16> to vector<16x4xbf16>
    %c0_228 = arith.constant 0 : index
    %c0_229 = arith.constant 0 : index
    %c0_230 = arith.constant 0 : index
    %c0_231 = arith.constant 0 : index
    %127 = vector.load %arg7[%c0_228, %c0_229, %c0_230, %c0_231] : memref<1x1x18x4xbf16, #tpu.memory_space<vmem>>, vector<1x1x16x4xbf16>
    %128 = vector.shape_cast %127 : vector<1x1x16x4xbf16> to vector<16x4xbf16>
    %c0_232 = arith.constant 0 : index
    %c0_233 = arith.constant 0 : index
    %c0_234 = arith.constant 0 : index
    %c0_235 = arith.constant 0 : index
    %129 = vector.load %arg8[%c0_232, %c0_233, %c0_234, %c0_235] : memref<1x1x18x4xbf16, #tpu.memory_space<vmem>>, vector<1x1x16x4xbf16>
    %130 = vector.shape_cast %129 : vector<1x1x16x4xbf16> to vector<16x4xbf16>
    %c0_236 = arith.constant 0 : index
    %c0_237 = arith.constant 0 : index
    %c0_238 = arith.constant 0 : index
    %c0_239 = arith.constant 0 : index
    %131 = vector.load %arg9[%c0_236, %c0_237, %c0_238, %c0_239] : memref<1x1x18x4xbf16, #tpu.memory_space<vmem>>, vector<1x1x16x4xbf16>
    %132 = vector.shape_cast %131 : vector<1x1x16x4xbf16> to vector<16x4xbf16>
    %c0_240 = arith.constant 0 : index
    %c0_241 = arith.constant 0 : index
    %c0_242 = arith.constant 0 : index
    %c0_243 = arith.constant 0 : index
    %133 = vector.load %arg10[%c0_240, %c0_241, %c0_242, %c0_243] : memref<1x1x18x4xbf16, #tpu.memory_space<vmem>>, vector<1x1x16x4xbf16>
    %134 = vector.shape_cast %133 : vector<1x1x16x4xbf16> to vector<16x4xbf16>
    %c0_244 = arith.constant 0 : index
    %c0_245 = arith.constant 0 : index
    %c0_246 = arith.constant 0 : index
    %c0_247 = arith.constant 0 : index
    %135 = vector.load %arg11[%c0_244, %c0_245, %c0_246, %c0_247] : memref<1x1x18x4xbf16, #tpu.memory_space<vmem>>, vector<1x1x16x4xbf16>
    %136 = vector.shape_cast %135 : vector<1x1x16x4xbf16> to vector<16x4xbf16>
    %c0_248 = arith.constant 0 : index
    %c0_249 = arith.constant 0 : index
    %c0_250 = arith.constant 0 : index
    %c0_251 = arith.constant 0 : index
    %137 = vector.load %arg12[%c0_248, %c0_249, %c0_250, %c0_251] : memref<1x1x18x4xbf16, #tpu.memory_space<vmem>>, vector<1x1x16x4xbf16>
    %138 = vector.shape_cast %137 : vector<1x1x16x4xbf16> to vector<16x4xbf16>
    %c0_252 = arith.constant 0 : index
    %c0_253 = arith.constant 0 : index
    %c0_254 = arith.constant 0 : index
    %c0_255 = arith.constant 0 : index
    %139 = vector.load %arg13[%c0_252, %c0_253, %c0_254, %c0_255] : memref<1x1x18x4xbf16, #tpu.memory_space<vmem>>, vector<1x1x16x4xbf16>
    %140 = vector.shape_cast %139 : vector<1x1x16x4xbf16> to vector<16x4xbf16>
    %c0_256 = arith.constant 0 : index
    %c0_257 = arith.constant 0 : index
    %c0_258 = arith.constant 0 : index
    %c0_259 = arith.constant 0 : index
    %141 = vector.load %arg14[%c0_256, %c0_257, %c0_258, %c0_259] : memref<1x1x18x4xbf16, #tpu.memory_space<vmem>>, vector<1x1x16x4xbf16>
    %142 = vector.shape_cast %141 : vector<1x1x16x4xbf16> to vector<16x4xbf16>
    %c0_260 = arith.constant 0 : index
    %c0_261 = arith.constant 0 : index
    %c0_262 = arith.constant 0 : index
    %c0_263 = arith.constant 0 : index
    %143 = vector.load %arg15[%c0_260, %c0_261, %c0_262, %c0_263] : memref<1x1x18x4xbf16, #tpu.memory_space<vmem>>, vector<1x1x16x4xbf16>
    %144 = vector.shape_cast %143 : vector<1x1x16x4xbf16> to vector<16x4xbf16>
    %c0_264 = arith.constant 0 : index
    %c0_265 = arith.constant 0 : index
    %c0_266 = arith.constant 0 : index
    %c0_267 = arith.constant 0 : index
    %145 = vector.load %arg16[%c0_264, %c0_265, %c0_266, %c0_267] : memref<1x1x18x4xbf16, #tpu.memory_space<vmem>>, vector<1x1x16x4xbf16>
    %146 = vector.shape_cast %145 : vector<1x1x16x4xbf16> to vector<16x4xbf16>
    %c0_268 = arith.constant 0 : index
    %c0_269 = arith.constant 0 : index
    %c0_270 = arith.constant 0 : index
    %c0_271 = arith.constant 0 : index
    %147 = vector.load %arg17[%c0_268, %c0_269, %c0_270, %c0_271] : memref<1x1x18x4xbf16, #tpu.memory_space<vmem>>, vector<1x1x16x4xbf16>
    %148 = vector.shape_cast %147 : vector<1x1x16x4xbf16> to vector<16x4xbf16>
    %c0_272 = arith.constant 0 : index
    %c0_273 = arith.constant 0 : index
    %c0_274 = arith.constant 0 : index
    %c0_275 = arith.constant 0 : index
    %149 = vector.load %arg18[%c0_272, %c0_273, %c0_274, %c0_275] : memref<1x1x18x4xbf16, #tpu.memory_space<vmem>>, vector<1x1x16x4xbf16>
    %150 = vector.shape_cast %149 : vector<1x1x16x4xbf16> to vector<16x4xbf16>
    %c0_276 = arith.constant 0 : index
    %c0_277 = arith.constant 0 : index
    %c0_278 = arith.constant 0 : index
    %c0_279 = arith.constant 0 : index
    %151 = vector.load %arg19[%c0_276, %c0_277, %c0_278, %c0_279] : memref<1x1x18x4xbf16, #tpu.memory_space<vmem>>, vector<1x1x16x4xbf16>
    %152 = vector.shape_cast %151 : vector<1x1x16x4xbf16> to vector<16x4xbf16>
    %153 = tpu.concatenate %122, %124, %126, %128, %130, %132, %134, %136, %138, %140, %142, %144, %146, %148, %150, %152 in 0 : vector<16x4xbf16>, vector<16x4xbf16>, vector<16x4xbf16>, vector<16x4xbf16>, vector<16x4xbf16>, vector<16x4xbf16>, vector<16x4xbf16>, vector<16x4xbf16>, vector<16x4xbf16>, vector<16x4xbf16>, vector<16x4xbf16>, vector<16x4xbf16>, vector<16x4xbf16>, vector<16x4xbf16>, vector<16x4xbf16>, vector<16x4xbf16> -> vector<256x4xbf16>
    %c0_280 = arith.constant 0 : index
    %c0_281 = arith.constant 0 : index
    %154 = vector.load %arg24[%c0_280, %c0_281] : memref<256x128xf32, #tpu.memory_space<vmem>>, vector<256x128xf32>
    %c3 = arith.constant 3 : index
    %c0_282 = arith.constant 0 : index
    %c0_283 = arith.constant 0 : index
    %155 = vector.load %arg21[%c3, %c0_282, %c0_283] : memref<9x4x128xbf16, #tpu.memory_space<vmem>>, vector<1x4x128xbf16>
    %156 = vector.shape_cast %155 : vector<1x4x128xbf16> to vector<4x128xbf16>
    %cst_284 = arith.constant dense<0.000000e+00> : vector<256x128xf32>
    %157 = tpu.matmul %153, %156, %cst_284 {dimension_numbers = #tpu.dot_dimension_numbers<[1], [0], [0], [1], [0, 0, 1, 1], [], []>} : vector<256x4xbf16>, vector<4x128xbf16>, vector<256x128xf32> -> vector<256x128xf32>
    %158 = arith.addf %154, %157 : vector<256x128xf32>
    %c0_285 = arith.constant 0 : index
    %c0_286 = arith.constant 0 : index
    %159 = vector.load %arg24[%c0_285, %c0_286] : memref<256x128xf32, #tpu.memory_space<vmem>>, vector<256x128xf32>
    tpu.vector_store %arg24[%c0_285, %c0_286], %158 {strides = array<i32>} : memref<256x128xf32, #tpu.memory_space<vmem>>, vector<256x128xf32>,
    %c0_287 = arith.constant 0 : index
    %c0_288 = arith.constant 0 : index
    %c1_289 = arith.constant 1 : index
    %c0_290 = arith.constant 0 : index
    %160 = vector.load %arg4[%c0_287, %c0_288, %c1_289, %c0_290] : memref<1x1x18x4xbf16, #tpu.memory_space<vmem>>, vector<1x1x16x4xbf16>
    %161 = vector.shape_cast %160 : vector<1x1x16x4xbf16> to vector<16x4xbf16>
    %c0_291 = arith.constant 0 : index
    %c0_292 = arith.constant 0 : index
    %c1_293 = arith.constant 1 : index
    %c0_294 = arith.constant 0 : index
    %162 = vector.load %arg5[%c0_291, %c0_292, %c1_293, %c0_294] : memref<1x1x18x4xbf16, #tpu.memory_space<vmem>>, vector<1x1x16x4xbf16>
    %163 = vector.shape_cast %162 : vector<1x1x16x4xbf16> to vector<16x4xbf16>
    %c0_295 = arith.constant 0 : index
    %c0_296 = arith.constant 0 : index
    %c1_297 = arith.constant 1 : index
    %c0_298 = arith.constant 0 : index
    %164 = vector.load %arg6[%c0_295, %c0_296, %c1_297, %c0_298] : memref<1x1x18x4xbf16, #tpu.memory_space<vmem>>, vector<1x1x16x4xbf16>
    %165 = vector.shape_cast %164 : vector<1x1x16x4xbf16> to vector<16x4xbf16>
    %c0_299 = arith.constant 0 : index
    %c0_300 = arith.constant 0 : index
    %c1_301 = arith.constant 1 : index
    %c0_302 = arith.constant 0 : index
    %166 = vector.load %arg7[%c0_299, %c0_300, %c1_301, %c0_302] : memref<1x1x18x4xbf16, #tpu.memory_space<vmem>>, vector<1x1x16x4xbf16>
    %167 = vector.shape_cast %166 : vector<1x1x16x4xbf16> to vector<16x4xbf16>
    %c0_303 = arith.constant 0 : index
    %c0_304 = arith.constant 0 : index
    %c1_305 = arith.constant 1 : index
    %c0_306 = arith.constant 0 : index
    %168 = vector.load %arg8[%c0_303, %c0_304, %c1_305, %c0_306] : memref<1x1x18x4xbf16, #tpu.memory_space<vmem>>, vector<1x1x16x4xbf16>
    %169 = vector.shape_cast %168 : vector<1x1x16x4xbf16> to vector<16x4xbf16>
    %c0_307 = arith.constant 0 : index
    %c0_308 = arith.constant 0 : index
    %c1_309 = arith.constant 1 : index
    %c0_310 = arith.constant 0 : index
    %170 = vector.load %arg9[%c0_307, %c0_308, %c1_309, %c0_310] : memref<1x1x18x4xbf16, #tpu.memory_space<vmem>>, vector<1x1x16x4xbf16>
    %171 = vector.shape_cast %170 : vector<1x1x16x4xbf16> to vector<16x4xbf16>
    %c0_311 = arith.constant 0 : index
    %c0_312 = arith.constant 0 : index
    %c1_313 = arith.constant 1 : index
    %c0_314 = arith.constant 0 : index
    %172 = vector.load %arg10[%c0_311, %c0_312, %c1_313, %c0_314] : memref<1x1x18x4xbf16, #tpu.memory_space<vmem>>, vector<1x1x16x4xbf16>
    %173 = vector.shape_cast %172 : vector<1x1x16x4xbf16> to vector<16x4xbf16>
    %c0_315 = arith.constant 0 : index
    %c0_316 = arith.constant 0 : index
    %c1_317 = arith.constant 1 : index
    %c0_318 = arith.constant 0 : index
    %174 = vector.load %arg11[%c0_315, %c0_316, %c1_317, %c0_318] : memref<1x1x18x4xbf16, #tpu.memory_space<vmem>>, vector<1x1x16x4xbf16>
    %175 = vector.shape_cast %174 : vector<1x1x16x4xbf16> to vector<16x4xbf16>
    %c0_319 = arith.constant 0 : index
    %c0_320 = arith.constant 0 : index
    %c1_321 = arith.constant 1 : index
    %c0_322 = arith.constant 0 : index
    %176 = vector.load %arg12[%c0_319, %c0_320, %c1_321, %c0_322] : memref<1x1x18x4xbf16, #tpu.memory_space<vmem>>, vector<1x1x16x4xbf16>
    %177 = vector.shape_cast %176 : vector<1x1x16x4xbf16> to vector<16x4xbf16>
    %c0_323 = arith.constant 0 : index
    %c0_324 = arith.constant 0 : index
    %c1_325 = arith.constant 1 : index
    %c0_326 = arith.constant 0 : index
    %178 = vector.load %arg13[%c0_323, %c0_324, %c1_325, %c0_326] : memref<1x1x18x4xbf16, #tpu.memory_space<vmem>>, vector<1x1x16x4xbf16>
    %179 = vector.shape_cast %178 : vector<1x1x16x4xbf16> to vector<16x4xbf16>
    %c0_327 = arith.constant 0 : index
    %c0_328 = arith.constant 0 : index
    %c1_329 = arith.constant 1 : index
    %c0_330 = arith.constant 0 : index
    %180 = vector.load %arg14[%c0_327, %c0_328, %c1_329, %c0_330] : memref<1x1x18x4xbf16, #tpu.memory_space<vmem>>, vector<1x1x16x4xbf16>
    %181 = vector.shape_cast %180 : vector<1x1x16x4xbf16> to vector<16x4xbf16>
    %c0_331 = arith.constant 0 : index
    %c0_332 = arith.constant 0 : index
    %c1_333 = arith.constant 1 : index
    %c0_334 = arith.constant 0 : index
    %182 = vector.load %arg15[%c0_331, %c0_332, %c1_333, %c0_334] : memref<1x1x18x4xbf16, #tpu.memory_space<vmem>>, vector<1x1x16x4xbf16>
    %183 = vector.shape_cast %182 : vector<1x1x16x4xbf16> to vector<16x4xbf16>
    %c0_335 = arith.constant 0 : index
    %c0_336 = arith.constant 0 : index
    %c1_337 = arith.constant 1 : index
    %c0_338 = arith.constant 0 : index
    %184 = vector.load %arg16[%c0_335, %c0_336, %c1_337, %c0_338] : memref<1x1x18x4xbf16, #tpu.memory_space<vmem>>, vector<1x1x16x4xbf16>
    %185 = vector.shape_cast %184 : vector<1x1x16x4xbf16> to vector<16x4xbf16>
    %c0_339 = arith.constant 0 : index
    %c0_340 = arith.constant 0 : index
    %c1_341 = arith.constant 1 : index
    %c0_342 = arith.constant 0 : index
    %186 = vector.load %arg17[%c0_339, %c0_340, %c1_341, %c0_342] : memref<1x1x18x4xbf16, #tpu.memory_space<vmem>>, vector<1x1x16x4xbf16>
    %187 = vector.shape_cast %186 : vector<1x1x16x4xbf16> to vector<16x4xbf16>
    %c0_343 = arith.constant 0 : index
    %c0_344 = arith.constant 0 : index
    %c1_345 = arith.constant 1 : index
    %c0_346 = arith.constant 0 : index
    %188 = vector.load %arg18[%c0_343, %c0_344, %c1_345, %c0_346] : memref<1x1x18x4xbf16, #tpu.memory_space<vmem>>, vector<1x1x16x4xbf16>
    %189 = vector.shape_cast %188 : vector<1x1x16x4xbf16> to vector<16x4xbf16>
    %c0_347 = arith.constant 0 : index
    %c0_348 = arith.constant 0 : index
    %c1_349 = arith.constant 1 : index
    %c0_350 = arith.constant 0 : index
    %190 = vector.load %arg19[%c0_347, %c0_348, %c1_349, %c0_350] : memref<1x1x18x4xbf16, #tpu.memory_space<vmem>>, vector<1x1x16x4xbf16>
    %191 = vector.shape_cast %190 : vector<1x1x16x4xbf16> to vector<16x4xbf16>
    %192 = tpu.concatenate %161, %163, %165, %167, %169, %171, %173, %175, %177, %179, %181, %183, %185, %187, %189, %191 in 0 : vector<16x4xbf16>, vector<16x4xbf16>, vector<16x4xbf16>, vector<16x4xbf16>, vector<16x4xbf16>, vector<16x4xbf16>, vector<16x4xbf16>, vector<16x4xbf16>, vector<16x4xbf16>, vector<16x4xbf16>, vector<16x4xbf16>, vector<16x4xbf16>, vector<16x4xbf16>, vector<16x4xbf16>, vector<16x4xbf16>, vector<16x4xbf16> -> vector<256x4xbf16>
    %c0_351 = arith.constant 0 : index
    %c0_352 = arith.constant 0 : index
    %193 = vector.load %arg24[%c0_351, %c0_352] : memref<256x128xf32, #tpu.memory_space<vmem>>, vector<256x128xf32>
    %c4 = arith.constant 4 : index
    %c0_353 = arith.constant 0 : index
    %c0_354 = arith.constant 0 : index
    %194 = vector.load %arg21[%c4, %c0_353, %c0_354] : memref<9x4x128xbf16, #tpu.memory_space<vmem>>, vector<1x4x128xbf16>
    %195 = vector.shape_cast %194 : vector<1x4x128xbf16> to vector<4x128xbf16>
    %cst_355 = arith.constant dense<0.000000e+00> : vector<256x128xf32>
    %196 = tpu.matmul %192, %195, %cst_355 {dimension_numbers = #tpu.dot_dimension_numbers<[1], [0], [0], [1], [0, 0, 1, 1], [], []>} : vector<256x4xbf16>, vector<4x128xbf16>, vector<256x128xf32> -> vector<256x128xf32>
    %197 = arith.addf %193, %196 : vector<256x128xf32>
    %c0_356 = arith.constant 0 : index
    %c0_357 = arith.constant 0 : index
    %198 = vector.load %arg24[%c0_356, %c0_357] : memref<256x128xf32, #tpu.memory_space<vmem>>, vector<256x128xf32>
    tpu.vector_store %arg24[%c0_356, %c0_357], %197 {strides = array<i32>} : memref<256x128xf32, #tpu.memory_space<vmem>>, vector<256x128xf32>,
    %c0_358 = arith.constant 0 : index
    %c0_359 = arith.constant 0 : index
    %c2_360 = arith.constant 2 : index
    %c0_361 = arith.constant 0 : index
    %199 = vector.load %arg4[%c0_358, %c0_359, %c2_360, %c0_361] : memref<1x1x18x4xbf16, #tpu.memory_space<vmem>>, vector<1x1x16x4xbf16>
    %200 = vector.shape_cast %199 : vector<1x1x16x4xbf16> to vector<16x4xbf16>
    %c0_362 = arith.constant 0 : index
    %c0_363 = arith.constant 0 : index
    %c2_364 = arith.constant 2 : index
    %c0_365 = arith.constant 0 : index
    %201 = vector.load %arg5[%c0_362, %c0_363, %c2_364, %c0_365] : memref<1x1x18x4xbf16, #tpu.memory_space<vmem>>, vector<1x1x16x4xbf16>
    %202 = vector.shape_cast %201 : vector<1x1x16x4xbf16> to vector<16x4xbf16>
    %c0_366 = arith.constant 0 : index
    %c0_367 = arith.constant 0 : index
    %c2_368 = arith.constant 2 : index
    %c0_369 = arith.constant 0 : index
    %203 = vector.load %arg6[%c0_366, %c0_367, %c2_368, %c0_369] : memref<1x1x18x4xbf16, #tpu.memory_space<vmem>>, vector<1x1x16x4xbf16>
    %204 = vector.shape_cast %203 : vector<1x1x16x4xbf16> to vector<16x4xbf16>
    %c0_370 = arith.constant 0 : index
    %c0_371 = arith.constant 0 : index
    %c2_372 = arith.constant 2 : index
    %c0_373 = arith.constant 0 : index
    %205 = vector.load %arg7[%c0_370, %c0_371, %c2_372, %c0_373] : memref<1x1x18x4xbf16, #tpu.memory_space<vmem>>, vector<1x1x16x4xbf16>
    %206 = vector.shape_cast %205 : vector<1x1x16x4xbf16> to vector<16x4xbf16>
    %c0_374 = arith.constant 0 : index
    %c0_375 = arith.constant 0 : index
    %c2_376 = arith.constant 2 : index
    %c0_377 = arith.constant 0 : index
    %207 = vector.load %arg8[%c0_374, %c0_375, %c2_376, %c0_377] : memref<1x1x18x4xbf16, #tpu.memory_space<vmem>>, vector<1x1x16x4xbf16>
    %208 = vector.shape_cast %207 : vector<1x1x16x4xbf16> to vector<16x4xbf16>
    %c0_378 = arith.constant 0 : index
    %c0_379 = arith.constant 0 : index
    %c2_380 = arith.constant 2 : index
    %c0_381 = arith.constant 0 : index
    %209 = vector.load %arg9[%c0_378, %c0_379, %c2_380, %c0_381] : memref<1x1x18x4xbf16, #tpu.memory_space<vmem>>, vector<1x1x16x4xbf16>
    %210 = vector.shape_cast %209 : vector<1x1x16x4xbf16> to vector<16x4xbf16>
    %c0_382 = arith.constant 0 : index
    %c0_383 = arith.constant 0 : index
    %c2_384 = arith.constant 2 : index
    %c0_385 = arith.constant 0 : index
    %211 = vector.load %arg10[%c0_382, %c0_383, %c2_384, %c0_385] : memref<1x1x18x4xbf16, #tpu.memory_space<vmem>>, vector<1x1x16x4xbf16>
    %212 = vector.shape_cast %211 : vector<1x1x16x4xbf16> to vector<16x4xbf16>
    %c0_386 = arith.constant 0 : index
    %c0_387 = arith.constant 0 : index
    %c2_388 = arith.constant 2 : index
    %c0_389 = arith.constant 0 : index
    %213 = vector.load %arg11[%c0_386, %c0_387, %c2_388, %c0_389] : memref<1x1x18x4xbf16, #tpu.memory_space<vmem>>, vector<1x1x16x4xbf16>
    %214 = vector.shape_cast %213 : vector<1x1x16x4xbf16> to vector<16x4xbf16>
    %c0_390 = arith.constant 0 : index
    %c0_391 = arith.constant 0 : index
    %c2_392 = arith.constant 2 : index
    %c0_393 = arith.constant 0 : index
    %215 = vector.load %arg12[%c0_390, %c0_391, %c2_392, %c0_393] : memref<1x1x18x4xbf16, #tpu.memory_space<vmem>>, vector<1x1x16x4xbf16>
    %216 = vector.shape_cast %215 : vector<1x1x16x4xbf16> to vector<16x4xbf16>
    %c0_394 = arith.constant 0 : index
    %c0_395 = arith.constant 0 : index
    %c2_396 = arith.constant 2 : index
    %c0_397 = arith.constant 0 : index
    %217 = vector.load %arg13[%c0_394, %c0_395, %c2_396, %c0_397] : memref<1x1x18x4xbf16, #tpu.memory_space<vmem>>, vector<1x1x16x4xbf16>
    %218 = vector.shape_cast %217 : vector<1x1x16x4xbf16> to vector<16x4xbf16>
    %c0_398 = arith.constant 0 : index
    %c0_399 = arith.constant 0 : index
    %c2_400 = arith.constant 2 : index
    %c0_401 = arith.constant 0 : index
    %219 = vector.load %arg14[%c0_398, %c0_399, %c2_400, %c0_401] : memref<1x1x18x4xbf16, #tpu.memory_space<vmem>>, vector<1x1x16x4xbf16>
    %220 = vector.shape_cast %219 : vector<1x1x16x4xbf16> to vector<16x4xbf16>
    %c0_402 = arith.constant 0 : index
    %c0_403 = arith.constant 0 : index
    %c2_404 = arith.constant 2 : index
    %c0_405 = arith.constant 0 : index
    %221 = vector.load %arg15[%c0_402, %c0_403, %c2_404, %c0_405] : memref<1x1x18x4xbf16, #tpu.memory_space<vmem>>, vector<1x1x16x4xbf16>
    %222 = vector.shape_cast %221 : vector<1x1x16x4xbf16> to vector<16x4xbf16>
    %c0_406 = arith.constant 0 : index
    %c0_407 = arith.constant 0 : index
    %c2_408 = arith.constant 2 : index
    %c0_409 = arith.constant 0 : index
    %223 = vector.load %arg16[%c0_406, %c0_407, %c2_408, %c0_409] : memref<1x1x18x4xbf16, #tpu.memory_space<vmem>>, vector<1x1x16x4xbf16>
    %224 = vector.shape_cast %223 : vector<1x1x16x4xbf16> to vector<16x4xbf16>
    %c0_410 = arith.constant 0 : index
    %c0_411 = arith.constant 0 : index
    %c2_412 = arith.constant 2 : index
    %c0_413 = arith.constant 0 : index
    %225 = vector.load %arg17[%c0_410, %c0_411, %c2_412, %c0_413] : memref<1x1x18x4xbf16, #tpu.memory_space<vmem>>, vector<1x1x16x4xbf16>
    %226 = vector.shape_cast %225 : vector<1x1x16x4xbf16> to vector<16x4xbf16>
    %c0_414 = arith.constant 0 : index
    %c0_415 = arith.constant 0 : index
    %c2_416 = arith.constant 2 : index
    %c0_417 = arith.constant 0 : index
    %227 = vector.load %arg18[%c0_414, %c0_415, %c2_416, %c0_417] : memref<1x1x18x4xbf16, #tpu.memory_space<vmem>>, vector<1x1x16x4xbf16>
    %228 = vector.shape_cast %227 : vector<1x1x16x4xbf16> to vector<16x4xbf16>
    %c0_418 = arith.constant 0 : index
    %c0_419 = arith.constant 0 : index
    %c2_420 = arith.constant 2 : index
    %c0_421 = arith.constant 0 : index
    %229 = vector.load %arg19[%c0_418, %c0_419, %c2_420, %c0_421] : memref<1x1x18x4xbf16, #tpu.memory_space<vmem>>, vector<1x1x16x4xbf16>
    %230 = vector.shape_cast %229 : vector<1x1x16x4xbf16> to vector<16x4xbf16>
    %231 = tpu.concatenate %200, %202, %204, %206, %208, %210, %212, %214, %216, %218, %220, %222, %224, %226, %228, %230 in 0 : vector<16x4xbf16>, vector<16x4xbf16>, vector<16x4xbf16>, vector<16x4xbf16>, vector<16x4xbf16>, vector<16x4xbf16>, vector<16x4xbf16>, vector<16x4xbf16>, vector<16x4xbf16>, vector<16x4xbf16>, vector<16x4xbf16>, vector<16x4xbf16>, vector<16x4xbf16>, vector<16x4xbf16>, vector<16x4xbf16>, vector<16x4xbf16> -> vector<256x4xbf16>
    %c0_422 = arith.constant 0 : index
    %c0_423 = arith.constant 0 : index
    %232 = vector.load %arg24[%c0_422, %c0_423] : memref<256x128xf32, #tpu.memory_space<vmem>>, vector<256x128xf32>
    %c5 = arith.constant 5 : index
    %c0_424 = arith.constant 0 : index
    %c0_425 = arith.constant 0 : index
    %233 = vector.load %arg21[%c5, %c0_424, %c0_425] : memref<9x4x128xbf16, #tpu.memory_space<vmem>>, vector<1x4x128xbf16>
    %234 = vector.shape_cast %233 : vector<1x4x128xbf16> to vector<4x128xbf16>
    %cst_426 = arith.constant dense<0.000000e+00> : vector<256x128xf32>
    %235 = tpu.matmul %231, %234, %cst_426 {dimension_numbers = #tpu.dot_dimension_numbers<[1], [0], [0], [1], [0, 0, 1, 1], [], []>} : vector<256x4xbf16>, vector<4x128xbf16>, vector<256x128xf32> -> vector<256x128xf32>
    %236 = arith.addf %232, %235 : vector<256x128xf32>
    %c0_427 = arith.constant 0 : index
    %c0_428 = arith.constant 0 : index
    %237 = vector.load %arg24[%c0_427, %c0_428] : memref<256x128xf32, #tpu.memory_space<vmem>>, vector<256x128xf32>
    tpu.vector_store %arg24[%c0_427, %c0_428], %236 {strides = array<i32>} : memref<256x128xf32, #tpu.memory_space<vmem>>, vector<256x128xf32>,
    %c0_429 = arith.constant 0 : index
    %c0_430 = arith.constant 0 : index
    %c0_431 = arith.constant 0 : index
    %c0_432 = arith.constant 0 : index
    %238 = vector.load %arg5[%c0_429, %c0_430, %c0_431, %c0_432] : memref<1x1x18x4xbf16, #tpu.memory_space<vmem>>, vector<1x1x16x4xbf16>
    %239 = vector.shape_cast %238 : vector<1x1x16x4xbf16> to vector<16x4xbf16>
    %c0_433 = arith.constant 0 : index
    %c0_434 = arith.constant 0 : index
    %c0_435 = arith.constant 0 : index
    %c0_436 = arith.constant 0 : index
    %240 = vector.load %arg6[%c0_433, %c0_434, %c0_435, %c0_436] : memref<1x1x18x4xbf16, #tpu.memory_space<vmem>>, vector<1x1x16x4xbf16>
    %241 = vector.shape_cast %240 : vector<1x1x16x4xbf16> to vector<16x4xbf16>
    %c0_437 = arith.constant 0 : index
    %c0_438 = arith.constant 0 : index
    %c0_439 = arith.constant 0 : index
    %c0_440 = arith.constant 0 : index
    %242 = vector.load %arg7[%c0_437, %c0_438, %c0_439, %c0_440] : memref<1x1x18x4xbf16, #tpu.memory_space<vmem>>, vector<1x1x16x4xbf16>
    %243 = vector.shape_cast %242 : vector<1x1x16x4xbf16> to vector<16x4xbf16>
    %c0_441 = arith.constant 0 : index
    %c0_442 = arith.constant 0 : index
    %c0_443 = arith.constant 0 : index
    %c0_444 = arith.constant 0 : index
    %244 = vector.load %arg8[%c0_441, %c0_442, %c0_443, %c0_444] : memref<1x1x18x4xbf16, #tpu.memory_space<vmem>>, vector<1x1x16x4xbf16>
    %245 = vector.shape_cast %244 : vector<1x1x16x4xbf16> to vector<16x4xbf16>
    %c0_445 = arith.constant 0 : index
    %c0_446 = arith.constant 0 : index
    %c0_447 = arith.constant 0 : index
    %c0_448 = arith.constant 0 : index
    %246 = vector.load %arg9[%c0_445, %c0_446, %c0_447, %c0_448] : memref<1x1x18x4xbf16, #tpu.memory_space<vmem>>, vector<1x1x16x4xbf16>
    %247 = vector.shape_cast %246 : vector<1x1x16x4xbf16> to vector<16x4xbf16>
    %c0_449 = arith.constant 0 : index
    %c0_450 = arith.constant 0 : index
    %c0_451 = arith.constant 0 : index
    %c0_452 = arith.constant 0 : index
    %248 = vector.load %arg10[%c0_449, %c0_450, %c0_451, %c0_452] : memref<1x1x18x4xbf16, #tpu.memory_space<vmem>>, vector<1x1x16x4xbf16>
    %249 = vector.shape_cast %248 : vector<1x1x16x4xbf16> to vector<16x4xbf16>
    %c0_453 = arith.constant 0 : index
    %c0_454 = arith.constant 0 : index
    %c0_455 = arith.constant 0 : index
    %c0_456 = arith.constant 0 : index
    %250 = vector.load %arg11[%c0_453, %c0_454, %c0_455, %c0_456] : memref<1x1x18x4xbf16, #tpu.memory_space<vmem>>, vector<1x1x16x4xbf16>
    %251 = vector.shape_cast %250 : vector<1x1x16x4xbf16> to vector<16x4xbf16>
    %c0_457 = arith.constant 0 : index
    %c0_458 = arith.constant 0 : index
    %c0_459 = arith.constant 0 : index
    %c0_460 = arith.constant 0 : index
    %252 = vector.load %arg12[%c0_457, %c0_458, %c0_459, %c0_460] : memref<1x1x18x4xbf16, #tpu.memory_space<vmem>>, vector<1x1x16x4xbf16>
    %253 = vector.shape_cast %252 : vector<1x1x16x4xbf16> to vector<16x4xbf16>
    %c0_461 = arith.constant 0 : index
    %c0_462 = arith.constant 0 : index
    %c0_463 = arith.constant 0 : index
    %c0_464 = arith.constant 0 : index
    %254 = vector.load %arg13[%c0_461, %c0_462, %c0_463, %c0_464] : memref<1x1x18x4xbf16, #tpu.memory_space<vmem>>, vector<1x1x16x4xbf16>
    %255 = vector.shape_cast %254 : vector<1x1x16x4xbf16> to vector<16x4xbf16>
    %c0_465 = arith.constant 0 : index
    %c0_466 = arith.constant 0 : index
    %c0_467 = arith.constant 0 : index
    %c0_468 = arith.constant 0 : index
    %256 = vector.load %arg14[%c0_465, %c0_466, %c0_467, %c0_468] : memref<1x1x18x4xbf16, #tpu.memory_space<vmem>>, vector<1x1x16x4xbf16>
    %257 = vector.shape_cast %256 : vector<1x1x16x4xbf16> to vector<16x4xbf16>
    %c0_469 = arith.constant 0 : index
    %c0_470 = arith.constant 0 : index
    %c0_471 = arith.constant 0 : index
    %c0_472 = arith.constant 0 : index
    %258 = vector.load %arg15[%c0_469, %c0_470, %c0_471, %c0_472] : memref<1x1x18x4xbf16, #tpu.memory_space<vmem>>, vector<1x1x16x4xbf16>
    %259 = vector.shape_cast %258 : vector<1x1x16x4xbf16> to vector<16x4xbf16>
    %c0_473 = arith.constant 0 : index
    %c0_474 = arith.constant 0 : index
    %c0_475 = arith.constant 0 : index
    %c0_476 = arith.constant 0 : index
    %260 = vector.load %arg16[%c0_473, %c0_474, %c0_475, %c0_476] : memref<1x1x18x4xbf16, #tpu.memory_space<vmem>>, vector<1x1x16x4xbf16>
    %261 = vector.shape_cast %260 : vector<1x1x16x4xbf16> to vector<16x4xbf16>
    %c0_477 = arith.constant 0 : index
    %c0_478 = arith.constant 0 : index
    %c0_479 = arith.constant 0 : index
    %c0_480 = arith.constant 0 : index
    %262 = vector.load %arg17[%c0_477, %c0_478, %c0_479, %c0_480] : memref<1x1x18x4xbf16, #tpu.memory_space<vmem>>, vector<1x1x16x4xbf16>
    %263 = vector.shape_cast %262 : vector<1x1x16x4xbf16> to vector<16x4xbf16>
    %c0_481 = arith.constant 0 : index
    %c0_482 = arith.constant 0 : index
    %c0_483 = arith.constant 0 : index
    %c0_484 = arith.constant 0 : index
    %264 = vector.load %arg18[%c0_481, %c0_482, %c0_483, %c0_484] : memref<1x1x18x4xbf16, #tpu.memory_space<vmem>>, vector<1x1x16x4xbf16>
    %265 = vector.shape_cast %264 : vector<1x1x16x4xbf16> to vector<16x4xbf16>
    %c0_485 = arith.constant 0 : index
    %c0_486 = arith.constant 0 : index
    %c0_487 = arith.constant 0 : index
    %c0_488 = arith.constant 0 : index
    %266 = vector.load %arg19[%c0_485, %c0_486, %c0_487, %c0_488] : memref<1x1x18x4xbf16, #tpu.memory_space<vmem>>, vector<1x1x16x4xbf16>
    %267 = vector.shape_cast %266 : vector<1x1x16x4xbf16> to vector<16x4xbf16>
    %c0_489 = arith.constant 0 : index
    %c0_490 = arith.constant 0 : index
    %c0_491 = arith.constant 0 : index
    %c0_492 = arith.constant 0 : index
    %268 = vector.load %arg20[%c0_489, %c0_490, %c0_491, %c0_492] : memref<1x1x18x4xbf16, #tpu.memory_space<vmem>>, vector<1x1x16x4xbf16>
    %269 = vector.shape_cast %268 : vector<1x1x16x4xbf16> to vector<16x4xbf16>
    %270 = tpu.concatenate %239, %241, %243, %245, %247, %249, %251, %253, %255, %257, %259, %261, %263, %265, %267, %269 in 0 : vector<16x4xbf16>, vector<16x4xbf16>, vector<16x4xbf16>, vector<16x4xbf16>, vector<16x4xbf16>, vector<16x4xbf16>, vector<16x4xbf16>, vector<16x4xbf16>, vector<16x4xbf16>, vector<16x4xbf16>, vector<16x4xbf16>, vector<16x4xbf16>, vector<16x4xbf16>, vector<16x4xbf16>, vector<16x4xbf16>, vector<16x4xbf16> -> vector<256x4xbf16>
    %c0_493 = arith.constant 0 : index
    %c0_494 = arith.constant 0 : index
    %271 = vector.load %arg24[%c0_493, %c0_494] : memref<256x128xf32, #tpu.memory_space<vmem>>, vector<256x128xf32>
    %c6 = arith.constant 6 : index
    %c0_495 = arith.constant 0 : index
    %c0_496 = arith.constant 0 : index
    %272 = vector.load %arg21[%c6, %c0_495, %c0_496] : memref<9x4x128xbf16, #tpu.memory_space<vmem>>, vector<1x4x128xbf16>
    %273 = vector.shape_cast %272 : vector<1x4x128xbf16> to vector<4x128xbf16>
    %cst_497 = arith.constant dense<0.000000e+00> : vector<256x128xf32>
    %274 = tpu.matmul %270, %273, %cst_497 {dimension_numbers = #tpu.dot_dimension_numbers<[1], [0], [0], [1], [0, 0, 1, 1], [], []>} : vector<256x4xbf16>, vector<4x128xbf16>, vector<256x128xf32> -> vector<256x128xf32>
    %275 = arith.addf %271, %274 : vector<256x128xf32>
    %c0_498 = arith.constant 0 : index
    %c0_499 = arith.constant 0 : index
    %276 = vector.load %arg24[%c0_498, %c0_499] : memref<256x128xf32, #tpu.memory_space<vmem>>, vector<256x128xf32>
    tpu.vector_store %arg24[%c0_498, %c0_499], %275 {strides = array<i32>} : memref<256x128xf32, #tpu.memory_space<vmem>>, vector<256x128xf32>,
    %c0_500 = arith.constant 0 : index
    %c0_501 = arith.constant 0 : index
    %c1_502 = arith.constant 1 : index
    %c0_503 = arith.constant 0 : index
    %277 = vector.load %arg5[%c0_500, %c0_501, %c1_502, %c0_503] : memref<1x1x18x4xbf16, #tpu.memory_space<vmem>>, vector<1x1x16x4xbf16>
    %278 = vector.shape_cast %277 : vector<1x1x16x4xbf16> to vector<16x4xbf16>
    %c0_504 = arith.constant 0 : index
    %c0_505 = arith.constant 0 : index
    %c1_506 = arith.constant 1 : index
    %c0_507 = arith.constant 0 : index
    %279 = vector.load %arg6[%c0_504, %c0_505, %c1_506, %c0_507] : memref<1x1x18x4xbf16, #tpu.memory_space<vmem>>, vector<1x1x16x4xbf16>
    %280 = vector.shape_cast %279 : vector<1x1x16x4xbf16> to vector<16x4xbf16>
    %c0_508 = arith.constant 0 : index
    %c0_509 = arith.constant 0 : index
    %c1_510 = arith.constant 1 : index
    %c0_511 = arith.constant 0 : index
    %281 = vector.load %arg7[%c0_508, %c0_509, %c1_510, %c0_511] : memref<1x1x18x4xbf16, #tpu.memory_space<vmem>>, vector<1x1x16x4xbf16>
    %282 = vector.shape_cast %281 : vector<1x1x16x4xbf16> to vector<16x4xbf16>
    %c0_512 = arith.constant 0 : index
    %c0_513 = arith.constant 0 : index
    %c1_514 = arith.constant 1 : index
    %c0_515 = arith.constant 0 : index
    %283 = vector.load %arg8[%c0_512, %c0_513, %c1_514, %c0_515] : memref<1x1x18x4xbf16, #tpu.memory_space<vmem>>, vector<1x1x16x4xbf16>
    %284 = vector.shape_cast %283 : vector<1x1x16x4xbf16> to vector<16x4xbf16>
    %c0_516 = arith.constant 0 : index
    %c0_517 = arith.constant 0 : index
    %c1_518 = arith.constant 1 : index
    %c0_519 = arith.constant 0 : index
    %285 = vector.load %arg9[%c0_516, %c0_517, %c1_518, %c0_519] : memref<1x1x18x4xbf16, #tpu.memory_space<vmem>>, vector<1x1x16x4xbf16>
    %286 = vector.shape_cast %285 : vector<1x1x16x4xbf16> to vector<16x4xbf16>
    %c0_520 = arith.constant 0 : index
    %c0_521 = arith.constant 0 : index
    %c1_522 = arith.constant 1 : index
    %c0_523 = arith.constant 0 : index
    %287 = vector.load %arg10[%c0_520, %c0_521, %c1_522, %c0_523] : memref<1x1x18x4xbf16, #tpu.memory_space<vmem>>, vector<1x1x16x4xbf16>
    %288 = vector.shape_cast %287 : vector<1x1x16x4xbf16> to vector<16x4xbf16>
    %c0_524 = arith.constant 0 : index
    %c0_525 = arith.constant 0 : index
    %c1_526 = arith.constant 1 : index
    %c0_527 = arith.constant 0 : index
    %289 = vector.load %arg11[%c0_524, %c0_525, %c1_526, %c0_527] : memref<1x1x18x4xbf16, #tpu.memory_space<vmem>>, vector<1x1x16x4xbf16>
    %290 = vector.shape_cast %289 : vector<1x1x16x4xbf16> to vector<16x4xbf16>
    %c0_528 = arith.constant 0 : index
    %c0_529 = arith.constant 0 : index
    %c1_530 = arith.constant 1 : index
    %c0_531 = arith.constant 0 : index
    %291 = vector.load %arg12[%c0_528, %c0_529, %c1_530, %c0_531] : memref<1x1x18x4xbf16, #tpu.memory_space<vmem>>, vector<1x1x16x4xbf16>
    %292 = vector.shape_cast %291 : vector<1x1x16x4xbf16> to vector<16x4xbf16>
    %c0_532 = arith.constant 0 : index
    %c0_533 = arith.constant 0 : index
    %c1_534 = arith.constant 1 : index
    %c0_535 = arith.constant 0 : index
    %293 = vector.load %arg13[%c0_532, %c0_533, %c1_534, %c0_535] : memref<1x1x18x4xbf16, #tpu.memory_space<vmem>>, vector<1x1x16x4xbf16>
    %294 = vector.shape_cast %293 : vector<1x1x16x4xbf16> to vector<16x4xbf16>
    %c0_536 = arith.constant 0 : index
    %c0_537 = arith.constant 0 : index
    %c1_538 = arith.constant 1 : index
    %c0_539 = arith.constant 0 : index
    %295 = vector.load %arg14[%c0_536, %c0_537, %c1_538, %c0_539] : memref<1x1x18x4xbf16, #tpu.memory_space<vmem>>, vector<1x1x16x4xbf16>
    %296 = vector.shape_cast %295 : vector<1x1x16x4xbf16> to vector<16x4xbf16>
    %c0_540 = arith.constant 0 : index
    %c0_541 = arith.constant 0 : index
    %c1_542 = arith.constant 1 : index
    %c0_543 = arith.constant 0 : index
    %297 = vector.load %arg15[%c0_540, %c0_541, %c1_542, %c0_543] : memref<1x1x18x4xbf16, #tpu.memory_space<vmem>>, vector<1x1x16x4xbf16>
    %298 = vector.shape_cast %297 : vector<1x1x16x4xbf16> to vector<16x4xbf16>
    %c0_544 = arith.constant 0 : index
    %c0_545 = arith.constant 0 : index
    %c1_546 = arith.constant 1 : index
    %c0_547 = arith.constant 0 : index
    %299 = vector.load %arg16[%c0_544, %c0_545, %c1_546, %c0_547] : memref<1x1x18x4xbf16, #tpu.memory_space<vmem>>, vector<1x1x16x4xbf16>
    %300 = vector.shape_cast %299 : vector<1x1x16x4xbf16> to vector<16x4xbf16>
    %c0_548 = arith.constant 0 : index
    %c0_549 = arith.constant 0 : index
    %c1_550 = arith.constant 1 : index
    %c0_551 = arith.constant 0 : index
    %301 = vector.load %arg17[%c0_548, %c0_549, %c1_550, %c0_551] : memref<1x1x18x4xbf16, #tpu.memory_space<vmem>>, vector<1x1x16x4xbf16>
    %302 = vector.shape_cast %301 : vector<1x1x16x4xbf16> to vector<16x4xbf16>
    %c0_552 = arith.constant 0 : index
    %c0_553 = arith.constant 0 : index
    %c1_554 = arith.constant 1 : index
    %c0_555 = arith.constant 0 : index
    %303 = vector.load %arg18[%c0_552, %c0_553, %c1_554, %c0_555] : memref<1x1x18x4xbf16, #tpu.memory_space<vmem>>, vector<1x1x16x4xbf16>
    %304 = vector.shape_cast %303 : vector<1x1x16x4xbf16> to vector<16x4xbf16>
    %c0_556 = arith.constant 0 : index
    %c0_557 = arith.constant 0 : index
    %c1_558 = arith.constant 1 : index
    %c0_559 = arith.constant 0 : index
    %305 = vector.load %arg19[%c0_556, %c0_557, %c1_558, %c0_559] : memref<1x1x18x4xbf16, #tpu.memory_space<vmem>>, vector<1x1x16x4xbf16>
    %306 = vector.shape_cast %305 : vector<1x1x16x4xbf16> to vector<16x4xbf16>
    %c0_560 = arith.constant 0 : index
    %c0_561 = arith.constant 0 : index
    %c1_562 = arith.constant 1 : index
    %c0_563 = arith.constant 0 : index
    %307 = vector.load %arg20[%c0_560, %c0_561, %c1_562, %c0_563] : memref<1x1x18x4xbf16, #tpu.memory_space<vmem>>, vector<1x1x16x4xbf16>
    %308 = vector.shape_cast %307 : vector<1x1x16x4xbf16> to vector<16x4xbf16>
    %309 = tpu.concatenate %278, %280, %282, %284, %286, %288, %290, %292, %294, %296, %298, %300, %302, %304, %306, %308 in 0 : vector<16x4xbf16>, vector<16x4xbf16>, vector<16x4xbf16>, vector<16x4xbf16>, vector<16x4xbf16>, vector<16x4xbf16>, vector<16x4xbf16>, vector<16x4xbf16>, vector<16x4xbf16>, vector<16x4xbf16>, vector<16x4xbf16>, vector<16x4xbf16>, vector<16x4xbf16>, vector<16x4xbf16>, vector<16x4xbf16>, vector<16x4xbf16> -> vector<256x4xbf16>
    %c0_564 = arith.constant 0 : index
    %c0_565 = arith.constant 0 : index
    %310 = vector.load %arg24[%c0_564, %c0_565] : memref<256x128xf32, #tpu.memory_space<vmem>>, vector<256x128xf32>
    %c7 = arith.constant 7 : index
    %c0_566 = arith.constant 0 : index
    %c0_567 = arith.constant 0 : index
    %311 = vector.load %arg21[%c7, %c0_566, %c0_567] : memref<9x4x128xbf16, #tpu.memory_space<vmem>>, vector<1x4x128xbf16>
    %312 = vector.shape_cast %311 : vector<1x4x128xbf16> to vector<4x128xbf16>
    %cst_568 = arith.constant dense<0.000000e+00> : vector<256x128xf32>
    %313 = tpu.matmul %309, %312, %cst_568 {dimension_numbers = #tpu.dot_dimension_numbers<[1], [0], [0], [1], [0, 0, 1, 1], [], []>} : vector<256x4xbf16>, vector<4x128xbf16>, vector<256x128xf32> -> vector<256x128xf32>
    %314 = arith.addf %310, %313 : vector<256x128xf32>
    %c0_569 = arith.constant 0 : index
    %c0_570 = arith.constant 0 : index
    %315 = vector.load %arg24[%c0_569, %c0_570] : memref<256x128xf32, #tpu.memory_space<vmem>>, vector<256x128xf32>
    tpu.vector_store %arg24[%c0_569, %c0_570], %314 {strides = array<i32>} : memref<256x128xf32, #tpu.memory_space<vmem>>, vector<256x128xf32>,
    %c0_571 = arith.constant 0 : index
    %c0_572 = arith.constant 0 : index
    %c2_573 = arith.constant 2 : index
    %c0_574 = arith.constant 0 : index
    %316 = vector.load %arg5[%c0_571, %c0_572, %c2_573, %c0_574] : memref<1x1x18x4xbf16, #tpu.memory_space<vmem>>, vector<1x1x16x4xbf16>
    %317 = vector.shape_cast %316 : vector<1x1x16x4xbf16> to vector<16x4xbf16>
    %c0_575 = arith.constant 0 : index
    %c0_576 = arith.constant 0 : index
    %c2_577 = arith.constant 2 : index
    %c0_578 = arith.constant 0 : index
    %318 = vector.load %arg6[%c0_575, %c0_576, %c2_577, %c0_578] : memref<1x1x18x4xbf16, #tpu.memory_space<vmem>>, vector<1x1x16x4xbf16>
    %319 = vector.shape_cast %318 : vector<1x1x16x4xbf16> to vector<16x4xbf16>
    %c0_579 = arith.constant 0 : index
    %c0_580 = arith.constant 0 : index
    %c2_581 = arith.constant 2 : index
    %c0_582 = arith.constant 0 : index
    %320 = vector.load %arg7[%c0_579, %c0_580, %c2_581, %c0_582] : memref<1x1x18x4xbf16, #tpu.memory_space<vmem>>, vector<1x1x16x4xbf16>
    %321 = vector.shape_cast %320 : vector<1x1x16x4xbf16> to vector<16x4xbf16>
    %c0_583 = arith.constant 0 : index
    %c0_584 = arith.constant 0 : index
    %c2_585 = arith.constant 2 : index
    %c0_586 = arith.constant 0 : index
    %322 = vector.load %arg8[%c0_583, %c0_584, %c2_585, %c0_586] : memref<1x1x18x4xbf16, #tpu.memory_space<vmem>>, vector<1x1x16x4xbf16>
    %323 = vector.shape_cast %322 : vector<1x1x16x4xbf16> to vector<16x4xbf16>
    %c0_587 = arith.constant 0 : index
    %c0_588 = arith.constant 0 : index
    %c2_589 = arith.constant 2 : index
    %c0_590 = arith.constant 0 : index
    %324 = vector.load %arg9[%c0_587, %c0_588, %c2_589, %c0_590] : memref<1x1x18x4xbf16, #tpu.memory_space<vmem>>, vector<1x1x16x4xbf16>
    %325 = vector.shape_cast %324 : vector<1x1x16x4xbf16> to vector<16x4xbf16>
    %c0_591 = arith.constant 0 : index
    %c0_592 = arith.constant 0 : index
    %c2_593 = arith.constant 2 : index
    %c0_594 = arith.constant 0 : index
    %326 = vector.load %arg10[%c0_591, %c0_592, %c2_593, %c0_594] : memref<1x1x18x4xbf16, #tpu.memory_space<vmem>>, vector<1x1x16x4xbf16>
    %327 = vector.shape_cast %326 : vector<1x1x16x4xbf16> to vector<16x4xbf16>
    %c0_595 = arith.constant 0 : index
    %c0_596 = arith.constant 0 : index
    %c2_597 = arith.constant 2 : index
    %c0_598 = arith.constant 0 : index
    %328 = vector.load %arg11[%c0_595, %c0_596, %c2_597, %c0_598] : memref<1x1x18x4xbf16, #tpu.memory_space<vmem>>, vector<1x1x16x4xbf16>
    %329 = vector.shape_cast %328 : vector<1x1x16x4xbf16> to vector<16x4xbf16>
    %c0_599 = arith.constant 0 : index
    %c0_600 = arith.constant 0 : index
    %c2_601 = arith.constant 2 : index
    %c0_602 = arith.constant 0 : index
    %330 = vector.load %arg12[%c0_599, %c0_600, %c2_601, %c0_602] : memref<1x1x18x4xbf16, #tpu.memory_space<vmem>>, vector<1x1x16x4xbf16>
    %331 = vector.shape_cast %330 : vector<1x1x16x4xbf16> to vector<16x4xbf16>
    %c0_603 = arith.constant 0 : index
    %c0_604 = arith.constant 0 : index
    %c2_605 = arith.constant 2 : index
    %c0_606 = arith.constant 0 : index
    %332 = vector.load %arg13[%c0_603, %c0_604, %c2_605, %c0_606] : memref<1x1x18x4xbf16, #tpu.memory_space<vmem>>, vector<1x1x16x4xbf16>
    %333 = vector.shape_cast %332 : vector<1x1x16x4xbf16> to vector<16x4xbf16>
    %c0_607 = arith.constant 0 : index
    %c0_608 = arith.constant 0 : index
    %c2_609 = arith.constant 2 : index
    %c0_610 = arith.constant 0 : index
    %334 = vector.load %arg14[%c0_607, %c0_608, %c2_609, %c0_610] : memref<1x1x18x4xbf16, #tpu.memory_space<vmem>>, vector<1x1x16x4xbf16>
    %335 = vector.shape_cast %334 : vector<1x1x16x4xbf16> to vector<16x4xbf16>
    %c0_611 = arith.constant 0 : index
    %c0_612 = arith.constant 0 : index
    %c2_613 = arith.constant 2 : index
    %c0_614 = arith.constant 0 : index
    %336 = vector.load %arg15[%c0_611, %c0_612, %c2_613, %c0_614] : memref<1x1x18x4xbf16, #tpu.memory_space<vmem>>, vector<1x1x16x4xbf16>
    %337 = vector.shape_cast %336 : vector<1x1x16x4xbf16> to vector<16x4xbf16>
    %c0_615 = arith.constant 0 : index
    %c0_616 = arith.constant 0 : index
    %c2_617 = arith.constant 2 : index
    %c0_618 = arith.constant 0 : index
    %338 = vector.load %arg16[%c0_615, %c0_616, %c2_617, %c0_618] : memref<1x1x18x4xbf16, #tpu.memory_space<vmem>>, vector<1x1x16x4xbf16>
    %339 = vector.shape_cast %338 : vector<1x1x16x4xbf16> to vector<16x4xbf16>
    %c0_619 = arith.constant 0 : index
    %c0_620 = arith.constant 0 : index
    %c2_621 = arith.constant 2 : index
    %c0_622 = arith.constant 0 : index
    %340 = vector.load %arg17[%c0_619, %c0_620, %c2_621, %c0_622] : memref<1x1x18x4xbf16, #tpu.memory_space<vmem>>, vector<1x1x16x4xbf16>
    %341 = vector.shape_cast %340 : vector<1x1x16x4xbf16> to vector<16x4xbf16>
    %c0_623 = arith.constant 0 : index
    %c0_624 = arith.constant 0 : index
    %c2_625 = arith.constant 2 : index
    %c0_626 = arith.constant 0 : index
    %342 = vector.load %arg18[%c0_623, %c0_624, %c2_625, %c0_626] : memref<1x1x18x4xbf16, #tpu.memory_space<vmem>>, vector<1x1x16x4xbf16>
    %343 = vector.shape_cast %342 : vector<1x1x16x4xbf16> to vector<16x4xbf16>
    %c0_627 = arith.constant 0 : index
    %c0_628 = arith.constant 0 : index
    %c2_629 = arith.constant 2 : index
    %c0_630 = arith.constant 0 : index
    %344 = vector.load %arg19[%c0_627, %c0_628, %c2_629, %c0_630] : memref<1x1x18x4xbf16, #tpu.memory_space<vmem>>, vector<1x1x16x4xbf16>
    %345 = vector.shape_cast %344 : vector<1x1x16x4xbf16> to vector<16x4xbf16>
    %c0_631 = arith.constant 0 : index
    %c0_632 = arith.constant 0 : index
    %c2_633 = arith.constant 2 : index
    %c0_634 = arith.constant 0 : index
    %346 = vector.load %arg20[%c0_631, %c0_632, %c2_633, %c0_634] : memref<1x1x18x4xbf16, #tpu.memory_space<vmem>>, vector<1x1x16x4xbf16>
    %347 = vector.shape_cast %346 : vector<1x1x16x4xbf16> to vector<16x4xbf16>
    %348 = tpu.concatenate %317, %319, %321, %323, %325, %327, %329, %331, %333, %335, %337, %339, %341, %343, %345, %347 in 0 : vector<16x4xbf16>, vector<16x4xbf16>, vector<16x4xbf16>, vector<16x4xbf16>, vector<16x4xbf16>, vector<16x4xbf16>, vector<16x4xbf16>, vector<16x4xbf16>, vector<16x4xbf16>, vector<16x4xbf16>, vector<16x4xbf16>, vector<16x4xbf16>, vector<16x4xbf16>, vector<16x4xbf16>, vector<16x4xbf16>, vector<16x4xbf16> -> vector<256x4xbf16>
    %c0_635 = arith.constant 0 : index
    %c0_636 = arith.constant 0 : index
    %349 = vector.load %arg24[%c0_635, %c0_636] : memref<256x128xf32, #tpu.memory_space<vmem>>, vector<256x128xf32>
    %c8 = arith.constant 8 : index
    %c0_637 = arith.constant 0 : index
    %c0_638 = arith.constant 0 : index
    %350 = vector.load %arg21[%c8, %c0_637, %c0_638] : memref<9x4x128xbf16, #tpu.memory_space<vmem>>, vector<1x4x128xbf16>
    %351 = vector.shape_cast %350 : vector<1x4x128xbf16> to vector<4x128xbf16>
    %cst_639 = arith.constant dense<0.000000e+00> : vector<256x128xf32>
    %352 = tpu.matmul %348, %351, %cst_639 {dimension_numbers = #tpu.dot_dimension_numbers<[1], [0], [0], [1], [0, 0, 1, 1], [], []>} : vector<256x4xbf16>, vector<4x128xbf16>, vector<256x128xf32> -> vector<256x128xf32>
    %353 = arith.addf %349, %352 : vector<256x128xf32>
    %c0_640 = arith.constant 0 : index
    %c0_641 = arith.constant 0 : index
    %354 = vector.load %arg24[%c0_640, %c0_641] : memref<256x128xf32, #tpu.memory_space<vmem>>, vector<256x128xf32>
    tpu.vector_store %arg24[%c0_640, %c0_641], %353 {strides = array<i32>} : memref<256x128xf32, #tpu.memory_space<vmem>>, vector<256x128xf32>,
    %c0_642 = arith.constant 0 : index
    %c0_643 = arith.constant 0 : index
    %355 = vector.load %arg24[%c0_642, %c0_643] : memref<256x128xf32, #tpu.memory_space<vmem>>, vector<256x128xf32>
    %cst_644 = arith.constant 0.000000e+00 : f32
    %356 = vector.broadcast %cst_644 : f32 to vector<256x128xf32>
    %357 = arith.cmpf oge, %355, %356 : vector<256x128xf32>
    %cst_645 = arith.constant 1.000000e-01 : f32
    %358 = vector.broadcast %cst_645 : f32 to vector<256x128xf32>
    %359 = arith.mulf %358, %355 : vector<256x128xf32>
    %360 = arith.select %357, %355, %359 : vector<256x128xi1>, vector<256x128xf32>
    %361 = arith.truncf %360 : vector<256x128xf32> to vector<256x128xbf16>
    %c0_646 = arith.constant 0 : index
    %c0_647 = arith.constant 0 : index
    %c0_648 = arith.constant 0 : index
    %362 = vector.load %arg23[%c0_646, %c0_647, %c0_648] : memref<1x256x128xbf16, #tpu.memory_space<vmem>>, vector<1x256x128xbf16>
    %363 = vector.shape_cast %362 : vector<1x256x128xbf16> to vector<256x128xbf16>
    %364 = vector.shape_cast %361 : vector<256x128xbf16> to vector<1x256x128xbf16>
    tpu.vector_store %arg23[%c0_646, %c0_647, %c0_648], %364 {strides = array<i32>} : memref<1x256x128xbf16, #tpu.memory_space<vmem>>, vector<1x256x128xbf16>,
    return
  }
  func.func @transform_0(%arg0: i32, %arg1: i32, %arg2: i32) -> (i32, i32, i32, i32) {
    %c16_i32 = arith.constant 16 : i32
    %0 = arith.muli %arg1, %c16_i32 : i32
    %c1_i32 = arith.constant 1 : i32
    %1 = arith.muli %0, %c1_i32 : i32
    %c0_i32 = arith.constant 0 : i32
    %2 = arith.addi %1, %c0_i32 : i32
    %c0_i32_0 = arith.constant 0 : i32
    %c0_i32_1 = arith.constant 0 : i32
    %c0_i32_2 = arith.constant 0 : i32
    return %arg0, %2, %c0_i32_0, %c0_i32_1 : i32, i32, i32, i32
  }
  func.func @transform_1(%arg0: i32, %arg1: i32, %arg2: i32) -> (i32, i32, i32, i32) {
    %c16_i32 = arith.constant 16 : i32
    %0 = arith.muli %arg1, %c16_i32 : i32
    %c1_i32 = arith.constant 1 : i32
    %1 = arith.muli %0, %c1_i32 : i32
    %c1_i32_0 = arith.constant 1 : i32
    %2 = arith.addi %1, %c1_i32_0 : i32
    %c0_i32 = arith.constant 0 : i32
    %c0_i32_1 = arith.constant 0 : i32
    %c0_i32_2 = arith.constant 0 : i32
    return %arg0, %2, %c0_i32, %c0_i32_1 : i32, i32, i32, i32
  }
  func.func @transform_2(%arg0: i32, %arg1: i32, %arg2: i32) -> (i32, i32, i32, i32) {
    %c16_i32 = arith.constant 16 : i32
    %0 = arith.muli %arg1, %c16_i32 : i32
    %c1_i32 = arith.constant 1 : i32
    %1 = arith.muli %0, %c1_i32 : i32
    %c2_i32 = arith.constant 2 : i32
    %2 = arith.addi %1, %c2_i32 : i32
    %c0_i32 = arith.constant 0 : i32
    %c0_i32_0 = arith.constant 0 : i32
    %c0_i32_1 = arith.constant 0 : i32
    return %arg0, %2, %c0_i32, %c0_i32_0 : i32, i32, i32, i32
  }
  func.func @transform_3(%arg0: i32, %arg1: i32, %arg2: i32) -> (i32, i32, i32, i32) {
    %c16_i32 = arith.constant 16 : i32
    %0 = arith.muli %arg1, %c16_i32 : i32
    %c1_i32 = arith.constant 1 : i32
    %1 = arith.muli %0, %c1_i32 : i32
    %c3_i32 = arith.constant 3 : i32
    %2 = arith.addi %1, %c3_i32 : i32
    %c0_i32 = arith.constant 0 : i32
    %c0_i32_0 = arith.constant 0 : i32
    %c0_i32_1 = arith.constant 0 : i32
    return %arg0, %2, %c0_i32, %c0_i32_0 : i32, i32, i32, i32
  }
  func.func @transform_4(%arg0: i32, %arg1: i32, %arg2: i32) -> (i32, i32, i32, i32) {
    %c16_i32 = arith.constant 16 : i32
    %0 = arith.muli %arg1, %c16_i32 : i32
    %c1_i32 = arith.constant 1 : i32
    %1 = arith.muli %0, %c1_i32 : i32
    %c4_i32 = arith.constant 4 : i32
    %2 = arith.addi %1, %c4_i32 : i32
    %c0_i32 = arith.constant 0 : i32
    %c0_i32_0 = arith.constant 0 : i32
    %c0_i32_1 = arith.constant 0 : i32
    return %arg0, %2, %c0_i32, %c0_i32_0 : i32, i32, i32, i32
  }
  func.func @transform_5(%arg0: i32, %arg1: i32, %arg2: i32) -> (i32, i32, i32, i32) {
    %c16_i32 = arith.constant 16 : i32
    %0 = arith.muli %arg1, %c16_i32 : i32
    %c1_i32 = arith.constant 1 : i32
    %1 = arith.muli %0, %c1_i32 : i32
    %c5_i32 = arith.constant 5 : i32
    %2 = arith.addi %1, %c5_i32 : i32
    %c0_i32 = arith.constant 0 : i32
    %c0_i32_0 = arith.constant 0 : i32
    %c0_i32_1 = arith.constant 0 : i32
    return %arg0, %2, %c0_i32, %c0_i32_0 : i32, i32, i32, i32
  }
  func.func @transform_6(%arg0: i32, %arg1: i32, %arg2: i32) -> (i32, i32, i32, i32) {
    %c16_i32 = arith.constant 16 : i32
    %0 = arith.muli %arg1, %c16_i32 : i32
    %c1_i32 = arith.constant 1 : i32
    %1 = arith.muli %0, %c1_i32 : i32
    %c6_i32 = arith.constant 6 : i32
    %2 = arith.addi %1, %c6_i32 : i32
    %c0_i32 = arith.constant 0 : i32
    %c0_i32_0 = arith.constant 0 : i32
    %c0_i32_1 = arith.constant 0 : i32
    return %arg0, %2, %c0_i32, %c0_i32_0 : i32, i32, i32, i32
  }
  func.func @transform_7(%arg0: i32, %arg1: i32, %arg2: i32) -> (i32, i32, i32, i32) {
    %c16_i32 = arith.constant 16 : i32
    %0 = arith.muli %arg1, %c16_i32 : i32
    %c1_i32 = arith.constant 1 : i32
    %1 = arith.muli %0, %c1_i32 : i32
    %c7_i32 = arith.constant 7 : i32
    %2 = arith.addi %1, %c7_i32 : i32
    %c0_i32 = arith.constant 0 : i32
    %c0_i32_0 = arith.constant 0 : i32
    %c0_i32_1 = arith.constant 0 : i32
    return %arg0, %2, %c0_i32, %c0_i32_0 : i32, i32, i32, i32
  }
  func.func @transform_8(%arg0: i32, %arg1: i32, %arg2: i32) -> (i32, i32, i32, i32) {
    %c16_i32 = arith.constant 16 : i32
    %0 = arith.muli %arg1, %c16_i32 : i32
    %c1_i32 = arith.constant 1 : i32
    %1 = arith.muli %0, %c1_i32 : i32
    %c8_i32 = arith.constant 8 : i32
    %2 = arith.addi %1, %c8_i32 : i32
    %c0_i32 = arith.constant 0 : i32
    %c0_i32_0 = arith.constant 0 : i32
    %c0_i32_1 = arith.constant 0 : i32
    return %arg0, %2, %c0_i32, %c0_i32_0 : i32, i32, i32, i32
  }
  func.func @transform_9(%arg0: i32, %arg1: i32, %arg2: i32) -> (i32, i32, i32, i32) {
    %c16_i32 = arith.constant 16 : i32
    %0 = arith.muli %arg1, %c16_i32 : i32
    %c1_i32 = arith.constant 1 : i32
    %1 = arith.muli %0, %c1_i32 : i32
    %c9_i32 = arith.constant 9 : i32
    %2 = arith.addi %1, %c9_i32 : i32
    %c0_i32 = arith.constant 0 : i32
    %c0_i32_0 = arith.constant 0 : i32
    %c0_i32_1 = arith.constant 0 : i32
    return %arg0, %2, %c0_i32, %c0_i32_0 : i32, i32, i32, i32
  }
  func.func @transform_10(%arg0: i32, %arg1: i32, %arg2: i32) -> (i32, i32, i32, i32) {
    %c16_i32 = arith.constant 16 : i32
    %0 = arith.muli %arg1, %c16_i32 : i32
    %c1_i32 = arith.constant 1 : i32
    %1 = arith.muli %0, %c1_i32 : i32
    %c10_i32 = arith.constant 10 : i32
    %2 = arith.addi %1, %c10_i32 : i32
    %c0_i32 = arith.constant 0 : i32
    %c0_i32_0 = arith.constant 0 : i32
    %c0_i32_1 = arith.constant 0 : i32
    return %arg0, %2, %c0_i32, %c0_i32_0 : i32, i32, i32, i32
  }
  func.func @transform_11(%arg0: i32, %arg1: i32, %arg2: i32) -> (i32, i32, i32, i32) {
    %c16_i32 = arith.constant 16 : i32
    %0 = arith.muli %arg1, %c16_i32 : i32
    %c1_i32 = arith.constant 1 : i32
    %1 = arith.muli %0, %c1_i32 : i32
    %c11_i32 = arith.constant 11 : i32
    %2 = arith.addi %1, %c11_i32 : i32
    %c0_i32 = arith.constant 0 : i32
    %c0_i32_0 = arith.constant 0 : i32
    %c0_i32_1 = arith.constant 0 : i32
    return %arg0, %2, %c0_i32, %c0_i32_0 : i32, i32, i32, i32
  }
  func.func @transform_12(%arg0: i32, %arg1: i32, %arg2: i32) -> (i32, i32, i32, i32) {
    %c16_i32 = arith.constant 16 : i32
    %0 = arith.muli %arg1, %c16_i32 : i32
    %c1_i32 = arith.constant 1 : i32
    %1 = arith.muli %0, %c1_i32 : i32
    %c12_i32 = arith.constant 12 : i32
    %2 = arith.addi %1, %c12_i32 : i32
    %c0_i32 = arith.constant 0 : i32
    %c0_i32_0 = arith.constant 0 : i32
    %c0_i32_1 = arith.constant 0 : i32
    return %arg0, %2, %c0_i32, %c0_i32_0 : i32, i32, i32, i32
  }
  func.func @transform_13(%arg0: i32, %arg1: i32, %arg2: i32) -> (i32, i32, i32, i32) {
    %c16_i32 = arith.constant 16 : i32
    %0 = arith.muli %arg1, %c16_i32 : i32
    %c1_i32 = arith.constant 1 : i32
    %1 = arith.muli %0, %c1_i32 : i32
    %c13_i32 = arith.constant 13 : i32
    %2 = arith.addi %1, %c13_i32 : i32
    %c0_i32 = arith.constant 0 : i32
    %c0_i32_0 = arith.constant 0 : i32
    %c0_i32_1 = arith.constant 0 : i32
    return %arg0, %2, %c0_i32, %c0_i32_0 : i32, i32, i32, i32
  }
  func.func @transform_14(%arg0: i32, %arg1: i32, %arg2: i32) -> (i32, i32, i32, i32) {
    %c16_i32 = arith.constant 16 : i32
    %0 = arith.muli %arg1, %c16_i32 : i32
    %c1_i32 = arith.constant 1 : i32
    %1 = arith.muli %0, %c1_i32 : i32
    %c14_i32 = arith.constant 14 : i32
    %2 = arith.addi %1, %c14_i32 : i32
    %c0_i32 = arith.constant 0 : i32
    %c0_i32_0 = arith.constant 0 : i32
    %c0_i32_1 = arith.constant 0 : i32
    return %arg0, %2, %c0_i32, %c0_i32_0 : i32, i32, i32, i32
  }
  func.func @transform_15(%arg0: i32, %arg1: i32, %arg2: i32) -> (i32, i32, i32, i32) {
    %c16_i32 = arith.constant 16 : i32
    %0 = arith.muli %arg1, %c16_i32 : i32
    %c1_i32 = arith.constant 1 : i32
    %1 = arith.muli %0, %c1_i32 : i32
    %c15_i32 = arith.constant 15 : i32
    %2 = arith.addi %1, %c15_i32 : i32
    %c0_i32 = arith.constant 0 : i32
    %c0_i32_0 = arith.constant 0 : i32
    %c0_i32_1 = arith.constant 0 : i32
    return %arg0, %2, %c0_i32, %c0_i32_0 : i32, i32, i32, i32
  }
  func.func @transform_16(%arg0: i32, %arg1: i32, %arg2: i32) -> (i32, i32, i32, i32) {
    %c16_i32 = arith.constant 16 : i32
    %0 = arith.muli %arg1, %c16_i32 : i32
    %c1_i32 = arith.constant 1 : i32
    %1 = arith.muli %0, %c1_i32 : i32
    %c16_i32_0 = arith.constant 16 : i32
    %2 = arith.addi %1, %c16_i32_0 : i32
    %c0_i32 = arith.constant 0 : i32
    %c0_i32_1 = arith.constant 0 : i32
    %c0_i32_2 = arith.constant 0 : i32
    return %arg0, %2, %c0_i32, %c0_i32_1 : i32, i32, i32, i32
  }
  func.func @transform_17(%arg0: i32, %arg1: i32, %arg2: i32) -> (i32, i32, i32, i32) {
    %c16_i32 = arith.constant 16 : i32
    %0 = arith.muli %arg1, %c16_i32 : i32
    %c1_i32 = arith.constant 1 : i32
    %1 = arith.muli %0, %c1_i32 : i32
    %c17_i32 = arith.constant 17 : i32
    %2 = arith.addi %1, %c17_i32 : i32
    %c0_i32 = arith.constant 0 : i32
    %c0_i32_0 = arith.constant 0 : i32
    %c0_i32_1 = arith.constant 0 : i32
    return %arg0, %2, %c0_i32, %c0_i32_0 : i32, i32, i32, i32
  }
  func.func @transform_18(%arg0: i32, %arg1: i32, %arg2: i32) -> (i32, i32, i32) {
    %c0_i32 = arith.constant 0 : i32
    %c0_i32_0 = arith.constant 0 : i32
    %c0_i32_1 = arith.constant 0 : i32
    return %c0_i32, %c0_i32_0, %arg2 : i32, i32, i32
  }
  func.func @transform_19(%arg0: i32, %arg1: i32, %arg2: i32) -> (i32, i32) {
    %c0_i32 = arith.constant 0 : i32
    %c0_i32_0 = arith.constant 0 : i32
    return %c0_i32, %arg2 : i32, i32
  }
  func.func @transform_20(%arg0: i32, %arg1: i32, %arg2: i32) -> (i32, i32, i32) {
    %c0_i32 = arith.constant 0 : i32
    return %arg0, %arg1, %arg2 : i32, i32, i32
  }
}

</mosaic_0001>

<bundles_post_ra>
// kernel: tpu_custom_call.1
= control target key start
LH: loop header
LB: loop body
LE: loop exit
PB: predicated region body
PF: predicated region fallthrough
CT: control target
= control target key end

     0   :  { %s8800_s0 = inlined_call_operand.vmem [shape: bf16[2,18,18,4], index: 0, kind: input, shape index: {}]   ;;  %s8801_s1 = inlined_call_operand.vmem [shape: bf16[2,18,18,4], index: 1, kind: input, shape index: {}]   ;;  %s8802_s2 = inlined_call_operand.vmem [shape: bf16[2,18,18,4], index: 2, kind: input, shape index: {}]   ;;  %s8803_s3 = inlined_call_operand.vmem [shape: bf16[2,18,18,4], index: 3, kind: input, shape index: {}]   ;;  %s8804_s4 = inlined_call_operand.vmem [shape: bf16[2,18,18,4], index: 4, kind: input, shape index: {}]   ;;  %s8805_s5 = inlined_call_operand.vmem [shape: bf16[2,18,18,4], index: 5, kind: input, shape index: {}]   ;;  %s8806_s6 = inlined_call_operand.vmem [shape: bf16[2,18,18,4], index: 6, kind: input, shape index: {}]   ;;  %s8807_s7 = inlined_call_operand.vmem [shape: bf16[2,18,18,4], index: 7, kind: input, shape index: {}]   ;;  %s8808_s8 = inlined_call_operand.vmem [shape: bf16[2,18,18,4], index: 8, kind: input, shape index: {}]   ;;  %s8809_s9 = inlined_call_operand.vmem [shape: bf16[2,18,18,4], index: 9, kind: input, shape index: {}]   ;;  %s8810_s10 = inlined_call_operand.vmem [shape: bf16[2,18,18,4], index: 10, kind: input, shape index: {}]   ;;  %s8811_s11 = inlined_call_operand.vmem [shape: bf16[2,18,18,4], index: 11, kind: input, shape index: {}]   ;;  %s8812_s12 = inlined_call_operand.vmem [shape: bf16[2,18,18,4], index: 12, kind: input, shape index: {}]   ;;  %s8813_s13 = inlined_call_operand.vmem [shape: bf16[2,18,18,4], index: 13, kind: input, shape index: {}]   ;;  %s8814_s14 = inlined_call_operand.vmem [shape: bf16[2,18,18,4], index: 14, kind: input, shape index: {}]   ;;  %s8815_s15 = inlined_call_operand.vmem [shape: bf16[2,18,18,4], index: 15, kind: input, shape index: {}]   ;;  %s8816_s16 = inlined_call_operand.vmem [shape: bf16[2,18,18,4], index: 16, kind: input, shape index: {}]   ;;  %s8817_s17 = inlined_call_operand.vmem [shape: bf16[2,18,18,4], index: 17, kind: input, shape index: {}]   ;;  %s8818_s18 = inlined_call_operand.vmem [shape: bf16[9,4,128], index: 18, kind: input, shape index: {}]   ;;  %s8819_s19 = inlined_call_operand.vmem [shape: f32[1,128], index: 19, kind: input, shape index: {}]   ;;  %s8820_s20 = inlined_call_operand.hbm [shape: bf16[2,256,128], index: 20, kind: output, shape index: {}]  }
   0x1   :  { %8840 = sst [smem:[#allocation19_spill]] %s8800_s0 }
   0x2   :  { %8841 = sst [smem:[#allocation20_spill]] %s8801_s1 }
   0x3   :  { %8842 = sst [smem:[#allocation21_spill]] %s8802_s2 }
   0x4   :  { %8843 = sst [smem:[#allocation22_spill]] %s8803_s3 }
   0x5   :  { %8844 = sst [smem:[#allocation23_spill]] %s8804_s4 }
   0x6   :  { %8845 = sst [smem:[#allocation24_spill]] %s8805_s5 }
   0x7   :  { %8846 = sst [smem:[#allocation25_spill]] %s8806_s6 }
   0x8   :  { %8847 = sst [smem:[#allocation26_spill]] %s8808_s8 }
   0x9   :  { %8848 = sst [smem:[#allocation27_spill]] %s8809_s9 }
   0xa   :  { %8849 = sst [smem:[#allocation28_spill]] %s8810_s10 }
   0xb   :  { %8850 = sst [smem:[#allocation29_spill]] %s8812_s12 }
   0xc   :  { %8851 = sst [smem:[#allocation30_spill]] %s8813_s13 }
   0xd   :  { %8852 = sst [smem:[#allocation31_spill]] %s8814_s14 }
   0xe   :  { %8853 = sst [smem:[#allocation32_spill]] %s8816_s16 }
   0xf   :  { %8854 = sst [smem:[#allocation33_spill]] %s8817_s17 }
  0x10   :  { %8855 = sst [smem:[#allocation34_spill]] %s8820_s20 }
  0x11   :  { %25 = vsyncpa [#allocation4], 0 }
  0x12   :  { %27 = vsyncpa [#allocation4 + $0x1], 0  ;;  %s7779_s1 = smov 0   ;;  %s7781_s22 = smov 0  }
  0x13   :  { %s7783_s23 = smov 0   ;;  %s7785_s24 = smov 0  }
  0x14   :  { %s7787_s2 = smov 0   ;;  %s7789_s25 = smov 0  }
  0x15 LB: > { %8856 = sst [smem:[#allocation6_spill]] %s7650_s1  ;;  %s6495_s3 = sadd.s32 4294967295, %s7670_s25   ;;  %s7670_s25 = sphi %s7789_s25, %s33_s25   ;;  %s7666_s2 = sphi %s7787_s2, %s8900_s2   ;;  %s7662_s24 = sphi %s7785_s24, %s8899_s24   ;;  %s7658_s23 = sphi %s7783_s23, %s8898_s23   ;;  %s7654_s22 = sphi %s7781_s22, %s8897_s22   ;;  %s7650_s1 = sphi %s7779_s1, %s8896_s1  }
  0x16   : > { %8857 = sst [smem:[#allocation7_spill]] %s7654_s22  ;;  %s6496_s26 = sadd.s32 4294967294, %s7670_s25  }
  0x17   : > { %8858 = sst [smem:[#allocation8_spill]] %s7658_s23  ;;  %s52_s27 = sadd.s32 1, %s7666_s2 }
  0x18   : > { %8859 = sst [smem:[#allocation9_spill]] %s7662_s24  ;;  %s689_s28 = sadd.s32 1, %s7658_s23 }
  0x19   : > { %8860 = sst [smem:[#allocation10_spill]] %s7666_s2  ;;  %p54_p0 = scmp.ge.s32.totalorder %s52_s27, 2 }
  0x1a   : > { %8861 = sst [smem:[#allocation11_spill]] %s7670_s25  ;;  %p699_p1 = scmp.ne.s32.totalorder %s7658_s23, %s7654_s22 }
  0x1b   : > { %p700_p2 = scmp.eq.s32.totalorder %s6495_s3, 1  ;;  %p705_p3 = scmp.ne.s32.totalorder %s7654_s22, %s7650_s1 }
  0x1c   : > { %s8902_s27 = smov (%p54_p0, %s52_s27), 0  ;;  %p706_p5 = scmp.eq.s32.totalorder %s6496_s26, 1 }
  0x1d   : > { %8862 = sst [smem:[#allocation12_spill]] %s8902_s27  ;;  %p7819_p4 = por %p700_p2, %p699_p1 }
  0x1e   : > { %s682_s29 = ssub.s32 %s7666_s2, %s8902_s27  ;;  %p6501_p6 = scmp.ge.s32.totalorder %s7670_s25, 1 }
  0x1f   : > { %s8863_s4 = scalar_select %p7819_p4, 1, 0 }
  0x20   : > { %p687_p7 = scmp.eq.s32.totalorder %s682_s29, 0  ;;  %p7826_p8 = por %p706_p5, %p705_p3 }
  0x21   : > { %8864 = sst [smem:[#allocation13_spill]] %s8863_s4  ;;  %p1023_p9 = scmp.lt.s32.totalorder %s7670_s25, 3 }
  0x22   : > { %s8865_s30 = scalar_select %p7826_p8, 1, 0 }
  0x23   : > { %s7832_s0 = scalar_select %p687_p7, %s7658_s23, %s689_s28  }
  0x24   : > { %8866 = sst [smem:[#allocation14_spill]] %s8865_s30  ;;  %p1024_p10 = pnand %p6501_p6, %p1023_p9 }
  0x25   : > { %8867 = sst [smem:[#allocation15_spill]] %s7832_s0 }
  0x26   : > { %1027 = sbr.rel (%p1024_p10) target bundleno = 771 (0x303), region = 100 }
  0x2b   : > { %v1701_v0 = vld [vmem:[%s8818_s18] sm:$0x3]  ;;  %vm1751_vm0 = vcmask 1041408   ;;  %p1281_p11 = scmp.lt.s32.totalorder %s7662_s24, 1  ;;  %v6746_v2 = vld [vmem:[%s8818_s18 + $0x4] sm:$0x3] }
  0x2c   : > { %v1753_v1 = vsel %vm1751_vm0, %v1701_v0, 0  ;;  %v6827_v3 = vld [vmem:[%s8818_s18 + $0x6] sm:$0x3]  ;;  %v2823_v4 = vsel %vm1751_vm0, %v6746_v2, 0  ;;  %v6665_v6 = vld [vmem:[%s8818_s18 + $0x2] sm:$0x3] }
  0x2d   : > { %7528 = vmatpush.bf16.msra.mxu1 %v1753_v1  ;;  %7529 = vmatpush.bf16.msra.mxu2 %v1753_v1  ;;  %s1282_s28 = scalar_select %p1281_p11, %s7662_s24, 1  ;;  %v3173_v5 = vsel %vm1751_vm0, %v6827_v3, 0  ;;  %v2360_v7 = vsel %vm1751_vm0, %v6665_v6, 0  ;;  %v6908_v8 = vld [vmem:[%s8818_s18 + $0x8] sm:$0x3]  ;;  %vm1702_vm1 = vcmask 31744  }
  0x2e   : > { %7530 = vmatpush.bf16.msra.mxu3 %v1753_v1  ;;  %1762 = vmatpush.bf16.msra.mxu0 %v1753_v1  ;;  %v3779_v9 = vsel %vm1751_vm0, %v6908_v8, 0  ;;  %s8868_s23 = sld [smem:[#allocation23_spill]]  ;;  %v7070_v22 = vld [vmem:[%s8818_s18 + $0xc] sm:$0x3]  ;;  %v7151_v23 = vld [vmem:[%s8818_s18 + $0xe] sm:$0x3] }
  0x2f   : > { %s7855_s2 = smul.u32 216, %s1282_s28  ;;  %s8869_s8 = sld [smem:[#allocation26_spill]]  ;;  %v4591_v24 = vsel %vm1751_vm0, %v7070_v22, 0  ;;  %v5197_v25 = vsel %vm1751_vm0, %v7151_v23, 0  ;;  %v6989_v26 = vld [vmem:[%s8818_s18 + $0xa] sm:$0x3] }
  0x30   : > { %s8870_s20 = sld [smem:[#allocation19_spill]]  ;;  %v7232_v27 = vld [vmem:[%s8818_s18 + $0x10] sm:$0x3]  ;;  %v4241_v28 = vsel %vm1751_vm0, %v6989_v26, 0  ;;  %vm1964_vm2 = vsmask.f32 7424 }
  0x31   : > { %2832 = vmatpush.bf16.msrb.mxu2 %v2823_v4  ;;  %2369 = vmatpush.bf16.msrb.mxu1 %v2360_v7  ;;  %s7261_s27 = sadd.s32 48, %s7855_s2  ;;  %s7269_s21 = sadd.s32 96, %s7855_s2  ;;  %v5659_v29 = vsel %vm1751_vm0, %v7232_v27, 0  ;;  %vm2571_vm3 = vcmask 1046528  }
  0x32   : > { %3182 = vmatpush.bf16.msrb.mxu3 %v3173_v5  ;;  %3788 = vmatpush.bf16.msrb.mxu0 %v3779_v9  ;;  %s7277_s1 = sadd.s32 144, %s7855_s2  ;;  %s8871_s12 = sld [smem:[#allocation29_spill]] }
  0x33   : > { %s7263_s25 = sadd.s32 60, %s7855_s2  ;;  %s7255_s4 = sadd.s32 12, %s7855_s2 }
  0x34   : > { %s7863_s26 = scalar_lea.vmem %s8868_s23, %s7261_s27  ;;  %s8873_s5 = sld [smem:[#allocation24_spill]] }
  0x35   : > { %s7868_s30 = scalar_lea.vmem %s8869_s8, %s7269_s21  ;;  %v7292_v10 = vld [vmem:[%s7863_s26] sm:$0xff]  ;;  %s7279_s21 = sadd.s32 156, %s7855_s2 }
  0x36   : > { %v7296_v11 = vld [vmem:[%s7868_s30] sm:$0xff]  ;;  %s7877_s0 = scalar_lea.vmem %s8870_s20, %s7855_s2  ;;  %6589 = vmatmul.msk.bf16.vlgmr.msra.gmra.mxu1 %vm1702_vm1, %v7292_v10  ;;  %s7271_s20 = sadd.s32 108, %s7855_s2 }
  0x37   : > { %v7288_v12 = vld [vmem:[%s7877_s0] sm:$0xff]  ;;  %6593 = vmatmul.msk.bf16.vlgmr.msra.gmra.mxu2 %vm1702_vm1, %v7296_v11  ;;  %s8874_s9 = sld [smem:[#allocation27_spill]]  ;;  %s7257_s24 = sadd.s32 24, %s7855_s2  ;;  %4250 = vmatpush.bf16.msra.mxu1 %v4241_v28  ;;  %v1910_v30 = vld [vmem:[%s7877_s0 + $0x8] sm:$0x1] }
  0x38   : > { %s7882_s3 = scalar_lea.vmem %s8871_s12, %s7277_s1  ;;  %6585 = vmatmul.msk.bf16.vlgmr.msra.gmra.mxu0 %vm1702_vm1, %v7288_v12  ;;  %s8876_s17 = sld [smem:[#allocation20_spill]]  ;;  %4600 = vmatpush.bf16.msra.mxu2 %v4591_v24  ;;  %v7304_v35 = vld [vmem:[%s7877_s0] sm:$0xff]  ;;  %v1961_v36 = vunpack.c.l.b16 %v1910_v30  ;;  %v2517_v38 = vld [vmem:[%s7877_s0 + $0x8] sm:$0x1] }
  0x39   : > { %8872 = sst [smem:[#allocation16_spill]] %s7882_s3  ;;  %v7300_v13 = vld [vmem:[%s7882_s3] sm:$0xff]  ;;  %s7265_s12 = sadd.s32 72, %s7855_s2  ;;  %5668 = vmatpush.bf16.msra.mxu0 %v5659_v29  ;;  %v1968_v42 = vshll.u32 %v7304_v35, 16  ;;  %v2568_v43 = vunpack.c.l.b16 %v2517_v38  ;;  %v1966_v48 = vshrl.u32 %v7304_v35, 16 }
  0x3a   : > { %6597 = vmatmul.msk.bf16.vlgmr.msra.gmra.mxu3 %vm1702_vm1, %v7300_v13  ;;  %s7897_s29 = scalar_lea.vmem %s8873_s5, %s7263_s25  ;;  %s8877_s13 = sld [smem:[#allocation30_spill]]  ;;  %v1963_v41 = vpack.c.b16 %v1961_v36, %v1961_v36  ;;  %v6684_v44 = vld [vmem:[%s7877_s0] sm:$0xe]  ;;  %v7320_v45 = vld [vmem:[%s7877_s0] sm:$0xf0] }
  0x3b   : > { %v7293_v14 = vld [vmem:[%s7897_s29] sm:$0xff]  ;;  %s7281_s16 = sadd.s32 168, %s7855_s2  ;;  %s8879_s6 = sld [smem:[#allocation25_spill]]  ;;  %5206 = vmatpush.bf16.msra.mxu3 %v5197_v25  ;;  %v1970_v49 = vrot.slane %v1968_v42, 1  ;;  %v6685_v51 = vor.u32 %v7320_v45, %v6684_v44  ;;  %v2570_v52 = vpack.c.b16 %v2568_v43, %v2568_v43 }
  0x3c   : > { %s8880_s10 = sld [smem:[#allocation28_spill]]  ;;  %s7267_s25 = sadd.s32 84, %s7855_s2  ;;  %v1973_v50 = vshll.u32 %v1963_v41, 16 }
  0x3d   : > { %s7902_s8 = scalar_lea.vmem %s8874_s9, %s7271_s20  ;;  %s8881_s5 = sld [smem:[#allocation21_spill]]  ;;  %v1971_v56 = vor.u32 %v1970_v49, %v1966_v48  ;;  %v2572_v58 = vrot.slane %v6685_v51, 1  ;;  %v2573_v59 = vrot.slane %v2570_v52, 1 }
  0x3e   : > { %8875 = sst [smem:[#allocation17_spill]] %s7902_s8  ;;  %s7907_s22 = scalar_lea.vmem %s8876_s17, %s7255_s4  ;;  %v7297_v15 = vld [vmem:[%s7902_s8] sm:$0xff]  ;;  %v1975_v57 = vrot.slane %v1973_v50, 1 }
  0x3f   : > { %v7289_v16 = vld [vmem:[%s7907_s22] sm:$0xff]  ;;  %s7273_s17 = sadd.s32 120, %s7855_s2  ;;  %s8882_s14 = sld [smem:[#allocation31_spill]]  ;;  %v3330_v31 = vld [vmem:[%s7907_s22 + $0x8] sm:$0x1]  ;;  %v2574_v1 = vsel %vm2571_vm3, %v2572_v58, %v2573_v59 }
  0x40   : > { %s7912_s1 = scalar_lea.vmem %s8877_s13, %s7279_s21  ;;  %s7275_s4 = sadd.s32 132, %s7855_s2  ;;  %v7352_v39 = vld [vmem:[%s7907_s22] sm:$0xff]  ;;  %v3381_v40 = vunpack.c.l.b16 %v3330_v31  ;;  %v1913_v62 = vld [vmem:[%s7907_s22 + $0x8] sm:$0x1]  ;;  %v1976_v0 = vsel %vm1964_vm2, %v1971_v56, %v1975_v57 }
  0x41   : > { %8878 = sst [smem:[#allocation18_spill]] %s7912_s1  ;;  %v7301_v17 = vld [vmem:[%s7912_s1] sm:$0xff]  ;;  %s7929_s20 = scalar_lea.vmem %s8879_s6, %s7265_s12  ;;  %v3387_v47 = vshll.u32 %v7352_v39, 16  ;;  %v3385_v53 = vshrl.u32 %v7352_v39, 16  ;;  %v1982_v3 = vunpack.c.l.b16 %v1913_v62  ;;  %v2520_v6 = vld [vmem:[%s7907_s22 + $0x8] sm:$0x1] }
  0x42   : > { %s7934_s28 = scalar_lea.vmem %s8880_s10, %s7273_s17  ;;  %v7294_v18 = vld [vmem:[%s7929_s20] sm:$0xff]  ;;  %s7259_s21 = sadd.s32 36, %s7855_s2  ;;  %v3383_v46 = vpack.c.b16 %v3381_v40, %v3381_v40  ;;  %v2580_v11 = vunpack.c.l.b16 %v2520_v6 }
  0x43   : > { %s7939_s9 = scalar_lea.vmem %s8881_s5, %s7257_s24  ;;  %v7298_v19 = vld [vmem:[%s7934_s28] sm:$0xff]  ;;  %s7283_s23 = sadd.s32 180, %s7855_s2  ;;  %v3389_v54 = vrot.slane %v3387_v47, 1  ;;  %v1984_v9 = vpack.c.b16 %v1982_v3, %v1982_v3 }
  0x44   : > { %v7290_v20 = vld [vmem:[%s7939_s9] sm:$0xff]  ;;  %s7977_s13 = scalar_lea.vmem %s8807_s7, %s7267_s25  ;;  %s7982_s17 = scalar_lea.vmem %s8811_s11, %s7275_s4  ;;  %v3392_v55 = vshll.u32 %v3383_v46, 16  ;;  %v3333_v63 = vld [vmem:[%s7939_s9 + $0x8] sm:$0x1] }
  0x45   : > { %s7944_s8 = scalar_lea.vmem %s8882_s14, %s7281_s16  ;;  %s8883_s3 = sld [smem:[#allocation22_spill]]  ;;  %v7295_v32 = vld [vmem:[%s7977_s13] sm:$0xff]  ;;  %v3390_v60 = vor.u32 %v3389_v54, %v3385_v53  ;;  %v3401_v8 = vunpack.c.l.b16 %v3333_v63  ;;  %v1916_v30 = vld [vmem:[%s7939_s9 + $0x8] sm:$0x1] }
  0x46   : > { %6590 = vmatmul.msk.bf16.gmra.mxu1 %vm1702_vm1, %v7293_v14  ;;  %v7302_v21 = vld [vmem:[%s7944_s8] sm:$0xff]  ;;  %s7993_s27 = scalar_lea.vmem %s8815_s15, %s7283_s23  ;;  %v3394_v61 = vrot.slane %v3392_v55, 1  ;;  %v2002_v35 = vunpack.c.l.b16 %v1916_v30  ;;  %v2523_v38 = vld [vmem:[%s7939_s9 + $0x8] sm:$0x1]  ;;  %s8884_s0 = sld [smem:[#allocation17_spill]] }
  0x47   : > { %6594 = vmatmul.msk.bf16.gmra.mxu2 %vm1702_vm1, %v7297_v15  ;;  %v7299_v33 = vld [vmem:[%s7982_s17] sm:$0xff]  ;;  %v3403_v14 = vpack.c.b16 %v3401_v8, %v3401_v8  ;;  %v2591_v43 = vunpack.c.l.b16 %v2523_v38  ;;  %v3339_v63 = vld [vmem:[%s7863_s26 + $0x8] sm:$0x1]  ;;  %s8885_s25 = sld [smem:[#allocation16_spill]] }
  0x48   : > { %6586 = vmatmul.msk.bf16.gmra.mxu0 %vm1702_vm1, %v7289_v16  ;;  %v7303_v37 = vld [vmem:[%s7993_s27] sm:$0xff]  ;;  %v3395_v5 = vsel %vm1964_vm2, %v3390_v60, %v3394_v61  ;;  %v2004_v41 = vpack.c.b16 %v2002_v35, %v2002_v35  ;;  %v3441_v8 = vunpack.c.l.b16 %v3339_v63  ;;  %v1922_v30 = vld [vmem:[%s7863_s26 + $0x8] sm:$0x1]  ;;  %s8886_s4 = sld [smem:[#allocation18_spill]] }
  0x49   : > { %v7305_v2 = vld [vmem:[%s7907_s22] sm:$0xff]  ;;  %v3412_v23 = vshll.u32 %v3403_v14, 16  ;;  %v2593_v52 = vpack.c.b16 %v2591_v43, %v2591_v43  ;;  %v2042_v35 = vunpack.c.l.b16 %v1922_v30  ;;  %v2529_v38 = vld [vmem:[%s7863_s26 + $0x8] sm:$0x1]  ;;  %s8887_s1 = sld [smem:[#allocation32_spill]] }
  0x4a   : > { %6598 = vmatmul.msk.bf16.gmra.mxu3 %vm1702_vm1, %v7301_v17  ;;  %v7336_v4 = vld [vmem:[%s7907_s22] sm:$0xff]  ;;  %v1988_v10 = vshll.u32 %v7305_v2, 16  ;;  %v1986_v16 = vshrl.u32 %v7305_v2, 16  ;;  %v2013_v50 = vshll.u32 %v2004_v41, 16  ;;  %v3443_v14 = vpack.c.b16 %v3441_v8, %v3441_v8  ;;  %v1925_v63 = vld [vmem:[%s7897_s29 + $0x8] sm:$0x1] }
  0x4b   : > { %s7987_s6 = scalar_lea.vmem %s8883_s3, %s7259_s21  ;;  %v7353_v7 = vld [vmem:[%s7939_s9] sm:$0xff]  ;;  %v3414_v29 = vrot.slane %v3412_v23, 1  ;;  %v2595_v59 = vrot.slane %v2593_v52, 1  ;;  %v2044_v41 = vpack.c.b16 %v2042_v35, %v2042_v35  ;;  %v2613_v43 = vunpack.c.l.b16 %v2529_v38  ;;  %s7285_s21 = sadd.s32 192, %s7855_s2 }
  0x4c   : > { %v7291_v34 = vld [vmem:[%s7987_s6] sm:$0xff]  ;;  %v3407_v15 = vshll.u32 %v7353_v7, 16  ;;  %v1990_v17 = vrot.slane %v1988_v10, 1  ;;  %v3336_v31 = vld [vmem:[%s7987_s6 + $0x8] sm:$0x1]  ;;  %v2015_v57 = vrot.slane %v2013_v50, 1 }
  0x4d   : > { %v6688_v12 = vld [vmem:[%s7907_s22] sm:$0xe]  ;;  %v7321_v13 = vld [vmem:[%s7907_s22] sm:$0xf0]  ;;  %v3421_v40 = vunpack.c.l.b16 %v3336_v31  ;;  %v1919_v62 = vld [vmem:[%s7987_s6 + $0x8] sm:$0x1]  ;;  %v2615_v52 = vpack.c.b16 %v2613_v43, %v2613_v43 }
  0x4e   : > { %v3409_v22 = vrot.slane %v3407_v15, 1  ;;  %v1991_v24 = vor.u32 %v1990_v17, %v1986_v16  ;;  %v7337_v36 = vld [vmem:[%s7939_s9] sm:$0xff]  ;;  %v2022_v3 = vunpack.c.l.b16 %v1919_v62  ;;  %v2526_v6 = vld [vmem:[%s7987_s6 + $0x8] sm:$0x1]  ;;  %v3452_v23 = vshll.u32 %v3443_v14, 16  ;;  %s8891_s16 = sld [smem:[#allocation34_spill]] }
  0x4f   : > { %v7354_v39 = vld [vmem:[%s7987_s6] sm:$0xff]  ;;  %v3423_v46 = vpack.c.b16 %v3421_v40, %v3421_v40  ;;  %v3342_v31 = vld [vmem:[%s7897_s29 + $0x8] sm:$0x1]  ;;  %v2053_v50 = vshll.u32 %v2044_v41, 16  ;;  %s8356_s12 = scalar_lea.vmem %s8887_s1, %s7285_s21 }
  0x50   : > { %v6692_v44 = vld [vmem:[%s7939_s9] sm:$0xe]  ;;  %v7322_v45 = vld [vmem:[%s7939_s9] sm:$0xf0]  ;;  %v3427_v47 = vshll.u32 %v7354_v39, 16  ;;  %v3425_v53 = vshrl.u32 %v7354_v39, 16  ;;  %v3461_v40 = vunpack.c.l.b16 %v3342_v31 }
  0x51   : > { %v6693_v51 = vor.u32 %v7322_v45, %v6692_v44  ;;  %v3432_v55 = vshll.u32 %v3423_v46, 16  ;;  %v7307_v2 = vld [vmem:[%s7987_s6] sm:$0xff]  ;;  %v1928_v41 = vld [vmem:[%s7929_s20 + $0x8] sm:$0x1] }
  0x52   : > { %v3429_v54 = vrot.slane %v3427_v47, 1  ;;  %v2028_v10 = vshll.u32 %v7307_v2, 16  ;;  %v2026_v16 = vshrl.u32 %v7307_v2, 16  ;;  %v7356_v39 = vld [vmem:[%s7897_s29] sm:$0xff]  ;;  %v3463_v46 = vpack.c.b16 %v3461_v40, %v3461_v40  ;;  %v3348_v43 = vld [vmem:[%s7977_s13 + $0x8] sm:$0x1] }
  0x53   : > { %v2594_v58 = vrot.slane %v6693_v51, 1  ;;  %v3434_v61 = vrot.slane %v3432_v55, 1  ;;  %v6700_v44 = vld [vmem:[%s7863_s26] sm:$0xe]  ;;  %v7324_v45 = vld [vmem:[%s7863_s26] sm:$0xf0] }
  0x54   : > { %v3430_v60 = vor.u32 %v3429_v54, %v3425_v53  ;;  %v2030_v17 = vrot.slane %v2028_v10, 1  ;;  %v3467_v47 = vshll.u32 %v7356_v39, 16  ;;  %v6701_v51 = vor.u32 %v7324_v45, %v6700_v44  ;;  %v7340_v8 = vld [vmem:[%s7897_s29] sm:$0xff]  ;;  %v2532_v10 = vld [vmem:[%s7897_s29 + $0x8] sm:$0x1]  ;;  %s7612_s5 = scalar_lea.hbm %s8891_s16, 256 }
  0x55   : > { %v3465_v53 = vshrl.u32 %v7356_v39, 16  ;;  %v3472_v55 = vshll.u32 %v3463_v46, 16  ;;  %v7310_v45 = vld [vmem:[%s7929_s20] sm:$0xff] }
  0x56   : > { %6591 = vmatmul.msk.bf16.gmra.mxu1 %vm1702_vm1, %v7294_v18  ;;  %v1993_v18 = vshll.u32 %v1984_v9, 16  ;;  %v2024_v9 = vpack.c.b16 %v2022_v3, %v2022_v3  ;;  %v3469_v54 = vrot.slane %v3467_v47, 1 }
  0x57   : > { %6595 = vmatmul.msk.bf16.gmra.mxu2 %vm1702_vm1, %v7298_v19  ;;  %v6689_v19 = vor.u32 %v7321_v13, %v6688_v12  ;;  %v6696_v12 = vld [vmem:[%s7987_s6] sm:$0xe]  ;;  %v7323_v13 = vld [vmem:[%s7987_s6] sm:$0xf0]  ;;  %v3474_v62 = vrot.slane %v3472_v55, 1 }
  0x58   : > { %6587 = vmatmul.msk.bf16.gmra.mxu0 %vm1702_vm1, %v7290_v20  ;;  %v2582_v20 = vpack.c.b16 %v2580_v11, %v2580_v11  ;;  %v1995_v25 = vrot.slane %v1993_v18, 1  ;;  %v2602_v11 = vunpack.c.l.b16 %v2526_v6  ;;  %v2033_v18 = vshll.u32 %v2024_v9, 16 }
  0x59   : > { %v2583_v26 = vrot.slane %v6689_v19, 1  ;;  %v6697_v19 = vor.u32 %v7323_v13, %v6696_v12 }
  0x5a   : > { %6599 = vmatmul.msk.bf16.gmra.mxu3 %vm1702_vm1, %v7302_v21  ;;  %v3405_v21 = vshrl.u32 %v7353_v7, 16  ;;  %v2584_v27 = vrot.slane %v2582_v20, 1  ;;  %v7355_v7 = vld [vmem:[%s7863_s26] sm:$0xff]  ;;  %v2604_v20 = vpack.c.b16 %v2602_v11, %v2602_v11 }
  0x5b   : > { %v3447_v15 = vshll.u32 %v7355_v7, 16  ;;  %v7357_v11 = vld [vmem:[%s7929_s20] sm:$0xff] }
  0x5c   : > { %v3410_v28 = vor.u32 %v3409_v22, %v3405_v21  ;;  %v3445_v21 = vshrl.u32 %v7355_v7, 16 }
  0x5d   : > { %v3449_v22 = vrot.slane %v3447_v15, 1  ;;  %v2624_v15 = vunpack.c.l.b16 %v2532_v10 }
  0x66   : > { %6592 = vmatmul.msk.bf16.gmra.mxu1 %vm1702_vm1, %v7295_v32  ;;  %v1996_v32 = vsel %vm1964_vm2, %v1991_v24, %v1995_v25  ;;  %v2031_v24 = vor.u32 %v2030_v17, %v2026_v16  ;;  %v2035_v25 = vrot.slane %v2033_v18, 1  ;;  %v6704_v16 = vld [vmem:[%s7897_s29] sm:$0xe]  ;;  %v7325_v17 = vld [vmem:[%s7897_s29] sm:$0xf0] }
  0x67   : > { %6596 = vmatmul.msk.bf16.gmra.mxu2 %vm1702_vm1, %v7299_v33  ;;  %v2585_v33 = vsel %vm2571_vm3, %v2583_v26, %v2584_v27  ;;  %v2605_v26 = vrot.slane %v6697_v19, 1  ;;  %v2606_v27 = vrot.slane %v2604_v20, 1  ;;  %v3487_v19 = vshll.u32 %v7357_v11, 16 }
  0x68   : > { %6588 = vmatmul.msk.bf16.gmra.mxu0 %vm1702_vm1, %v7291_v34  ;;  %v7306_v34 = vld [vmem:[%s7939_s9] sm:$0xff] }
  0x69   : > { %v2008_v42 = vshll.u32 %v7306_v34, 16  ;;  %v2006_v48 = vshrl.u32 %v7306_v34, 16  ;;  %v7308_v34 = vld [vmem:[%s7863_s26] sm:$0xff] }
  0x6a   : > { %6600 = vmatmul.msk.bf16.gmra.mxu3 %vm1702_vm1, %v7303_v37  ;;  %v3415_v37 = vsel %vm1964_vm2, %v3410_v28, %v3414_v29  ;;  %v3450_v28 = vor.u32 %v3449_v22, %v3445_v21  ;;  %v3454_v29 = vrot.slane %v3452_v23, 1 }
  0x6b   : > { %v2010_v49 = vrot.slane %v2008_v42, 1  ;;  %v2048_v42 = vshll.u32 %v7308_v34, 16 }
  0x6d   : > { %v2011_v56 = vor.u32 %v2010_v49, %v2006_v48  ;;  %v2046_v48 = vshrl.u32 %v7308_v34, 16  ;;  %v2050_v49 = vrot.slane %v2048_v42, 1 }
  0x76   : > { %6666 = vmatmul.msk.bf16.vlgmr.msrb.gmra.mxu1 %vm1702_vm1, %v1976_v0  ;;  %v2016_v0 = vsel %vm1964_vm2, %v2011_v56, %v2015_v57  ;;  %v2051_v56 = vor.u32 %v2050_v49, %v2046_v48  ;;  %v2055_v57 = vrot.slane %v2053_v50, 1  ;;  %v2082_v50 = vunpack.c.l.b16 %v1928_v41 }
  0x77   : > { %6747 = vmatmul.msk.bf16.vlgmr.msrb.gmra.mxu2 %vm1702_vm1, %v2574_v1  ;;  %v2596_v1 = vsel %vm2571_vm3, %v2594_v58, %v2595_v59  ;;  %v2616_v58 = vrot.slane %v6701_v51, 1  ;;  %v2617_v59 = vrot.slane %v2615_v52, 1 }
  0x78   : > { %6909 = vmatmul.msk.bf16.vlgmr.msrb.gmra.mxu0 %vm1702_vm1, %v3395_v5  ;;  %v3435_v5 = vsel %vm1964_vm2, %v3430_v60, %v3434_v61  ;;  %v8072_v60 = vld [vmem:[%s8819_s19] ss:$0 sm:$0xff]  ;;  %v3470_v61 = vor.u32 %v3469_v54, %v3465_v53  ;;  %v2056_v3 = vsel %vm1964_vm2, %v2051_v56, %v2055_v57  ;;  %v2535_v56 = vld [vmem:[%s7929_s20 + $0x8] sm:$0x1] }
  0x79   : > { %v7341_v54 = vld [vmem:[%s7929_s20] sm:$0xff] }
  0x7a   : > { %6828 = vmatmul.msk.bf16.vlgmr.msrb.gmra.mxu3 %vm1702_vm1, %v7336_v4  ;;  %v7338_v4 = vld [vmem:[%s7987_s6] sm:$0xff]  ;;  %v3475_v9 = vsel %vm1964_vm2, %v3470_v61, %v3474_v62  ;;  %v2084_v61 = vpack.c.b16 %v2082_v50, %v2082_v50  ;;  %v2635_v62 = vunpack.c.l.b16 %v2535_v56 }
  0x7b   : > { %v7358_v57 = vld [vmem:[%s7977_s13] sm:$0xff] }
  0x7c   : > { %v7327_v56 = vld [vmem:[%s7977_s13] sm:$0xf0] }
  0x86   : > { %6667 = vmatmul.msk.bf16.gmra.mxu1 %vm1702_vm1, %v1996_v32  ;;  %v2036_v32 = vsel %vm1964_vm2, %v2031_v24, %v2035_v25 }
  0x87   : > { %6748 = vmatmul.msk.bf16.gmra.mxu2 %vm1702_vm1, %v2585_v33  ;;  %v2607_v33 = vsel %vm2571_vm3, %v2605_v26, %v2606_v27  ;;  %v6705_v27 = vor.u32 %v7325_v17, %v6704_v16 }
  0x88   : > { %6910 = vmatmul.msk.bf16.gmra.mxu0 %vm1702_vm1, %v3415_v37  ;;  %v3455_v37 = vsel %vm1964_vm2, %v3450_v28, %v3454_v29  ;;  %v2626_v28 = vpack.c.b16 %v2624_v15, %v2624_v15  ;;  %v3485_v29 = vshrl.u32 %v7357_v11, 16  ;;  %v2093_v11 = vshll.u32 %v2084_v61, 16 }
  0x8a   : > { %6829 = vmatmul.msk.bf16.gmra.mxu3 %vm1702_vm1, %v7337_v36  ;;  %v7339_v36 = vld [vmem:[%s7863_s26] sm:$0xff]  ;;  %v2628_v38 = vrot.slane %v2626_v28, 1 }
  0x96   : > { %6668 = vmatmul.msk.bf16.gmra.mxu1 %vm1702_vm1, %v2016_v0  ;;  %v3345_v0 = vld [vmem:[%s7929_s20 + $0x8] sm:$0x1] }
  0x97   : > { %6749 = vmatmul.msk.bf16.gmra.mxu2 %vm1702_vm1, %v2596_v1  ;;  %v7309_v1 = vld [vmem:[%s7897_s29] sm:$0xff]  ;;  %v3481_v12 = vunpack.c.l.b16 %v3345_v0 }
  0x98   : > { %6911 = vmatmul.msk.bf16.gmra.mxu0 %vm1702_vm1, %v3435_v5  ;;  %v2062_v5 = vunpack.c.l.b16 %v1925_v63  ;;  %v2068_v13 = vshll.u32 %v7309_v1, 16  ;;  %v2066_v22 = vshrl.u32 %v7309_v1, 16  ;;  %v6708_v63 = vld [vmem:[%s7929_s20] sm:$0xe]  ;;  %v7326_v0 = vld [vmem:[%s7929_s20] sm:$0xf0] }
  0x99   : > { %v3483_v18 = vpack.c.b16 %v3481_v12, %v3481_v12  ;;  %v6709_v12 = vor.u32 %v7326_v0, %v6708_v63 }
  0x9a   : > { %6830 = vmatmul.msk.bf16.gmra.mxu3 %vm1702_vm1, %v7338_v4  ;;  %v2618_v4 = vsel %vm2571_vm3, %v2616_v58, %v2617_v59  ;;  %v2064_v14 = vpack.c.b16 %v2062_v5, %v2062_v5  ;;  %v2070_v23 = vrot.slane %v2068_v13, 1  ;;  %v3501_v58 = vunpack.c.l.b16 %v3348_v43  ;;  %v7342_v43 = vld [vmem:[%s7977_s13] sm:$0xff] }
  0x9b   : > { %v3492_v34 = vshll.u32 %v3483_v18, 16  ;;  %v2088_v59 = vshll.u32 %v7310_v45, 16  ;;  %v2086_v5 = vshrl.u32 %v7310_v45, 16  ;;  %v2637_v13 = vpack.c.b16 %v2635_v62, %v2635_v62 }
  0x9c   : > { %v2073_v26 = vshll.u32 %v2064_v14, 16  ;;  %v2071_v35 = vor.u32 %v2070_v23, %v2066_v22  ;;  %v3503_v1 = vpack.c.b16 %v3501_v58, %v3501_v58  ;;  %v3505_v14 = vshrl.u32 %v7358_v57, 16 }
  0x9d   : > { %v3494_v40 = vrot.slane %v3492_v34, 1  ;;  %v2095_v22 = vrot.slane %v2093_v11, 1  ;;  %v2638_v23 = vrot.slane %v6709_v12, 1  ;;  %v7311_v34 = vld [vmem:[%s7977_s13] sm:$0xff] }
  0x9e   : > { %v2106_v62 = vshrl.u32 %v7311_v34, 16 }
  0xa6   : > { %6669 = vmatmul.msk.bf16.gmra.mxu1 %vm1702_vm1, %v2036_v32 }
  0xa7   : > { %6750 = vmatmul.msk.bf16.gmra.mxu2 %vm1702_vm1, %v2607_v33  ;;  %v3489_v33 = vrot.slane %v3487_v19, 1  ;;  %v3512_v19 = vshll.u32 %v3503_v1, 16 }
  0xa8   : > { %6912 = vmatmul.msk.bf16.gmra.mxu0 %vm1702_vm1, %v3455_v37  ;;  %v2627_v37 = vrot.slane %v6705_v27, 1  ;;  %v1931_v27 = vld [vmem:[%s7977_s13 + $0x8] sm:$0x1] }
  0xa9   : > { %v3490_v39 = vor.u32 %v3489_v33, %v3485_v29  ;;  %v3351_v29 = vld [vmem:[%s7868_s30 + $0x8] sm:$0x1] }
  0xaa   : > { %6831 = vmatmul.msk.bf16.gmra.mxu3 %vm1702_vm1, %v7339_v36  ;;  %v2075_v36 = vrot.slane %v2073_v26, 1  ;;  %v2629_v49 = vsel %vm2571_vm3, %v2627_v37, %v2628_v38  ;;  %v3514_v26 = vrot.slane %v3512_v19, 1 }
  0xab   : > { %v3495_v55 = vsel %vm1964_vm2, %v3490_v39, %v3494_v40  ;;  %v2102_v39 = vunpack.c.l.b16 %v1931_v27 }
  0xac   : > { %v2076_v48 = vsel %vm1964_vm2, %v2071_v35, %v2075_v36 }
  0xad   : > { %v2104_v50 = vpack.c.b16 %v2102_v39, %v2102_v39 }
  0xb3   : > { %v1784_v2 = vpop.f32.mrf.mxu1 }
  0xb4   : > { %v8080_v6 = vadd.f32 %v8072_v60, %v1784_v2  ;;  %v3507_v2 = vshll.u32 %v7358_v57, 16 }
  0xb5   : > { %v8082_v7 = vpop.f32.mrf.mxu0 }
  0xb6   : > { %6670 = vmatmul.msk.bf16.gmra.mxu1 %vm1702_vm1, %v2056_v3  ;;  %v3509_v18 = vrot.slane %v3507_v2, 1  ;;  %v2113_v2 = vshll.u32 %v2104_v50, 16 }
  0xb7   : > { %6751 = vmatmul.msk.bf16.gmra.mxu2 %vm1702_vm1, %v2618_v4 }
  0xb8   : > { %6913 = vmatmul.msk.bf16.gmra.mxu0 %vm1702_vm1, %v3475_v9 }
  0xba   : > { %6832 = vmatmul.msk.bf16.gmra.mxu3 %vm1702_vm1, %v7340_v8  ;;  %v1804_v20 = vpop.f32.mrf.mxu2  ;;  %v2090_v8 = vrot.slane %v2088_v59, 1 }
  0xbb   : > { %v8095_v21 = vadd.f32 %v8072_v60, %v1804_v20  ;;  %v1786_v25 = vpop.f32.mrf.mxu1 }
  0xbc   : > { %v8101_v31 = vadd.f32 %v8072_v60, %v1786_v25  ;;  %v2091_v20 = vor.u32 %v2090_v8, %v2086_v5  ;;  %v3510_v25 = vor.u32 %v3509_v18, %v3505_v14  ;;  %v2115_v18 = vrot.slane %v2113_v2, 1 }
  0xbd   : > { %v1824_v24 = vpop.f32.mrf.mxu3  ;;  %v8103_v32 = vpop.f32.mrf.mxu0 }
  0xbe   : > { %v8098_v30 = vadd.f32 %v8072_v60, %v1824_v24  ;;  %v2639_v24 = vrot.slane %v2637_v13, 1  ;;  %v2096_v37 = vsel %vm1964_vm2, %v2091_v20, %v2095_v22  ;;  %v3515_v45 = vsel %vm1964_vm2, %v3510_v25, %v3514_v26  ;;  %v3354_v26 = vld [vmem:[%s8884_s0 + $0x8] sm:$0x1] }
  0xc0   : > { %v2640_v38 = vsel %vm2571_vm3, %v2638_v23, %v2639_v24  ;;  %v1934_v24 = vld [vmem:[%s7868_s30 + $0x8] sm:$0x1] }
  0xc2   : > { %v1806_v42 = vpop.f32.mrf.mxu2 }
  0xc3   : > { %v8108_v44 = vadd.f32 %v8072_v60, %v1806_v42  ;;  %v1789_v47 = vpop.f32.mrf.mxu1 }
  0xc4   : > { %v8117_v52 = vadd.f32 %v8072_v60, %v1789_v47  ;;  %v7359_v47 = vld [vmem:[%s7868_s30] sm:$0xff] }
  0xc5   : > { %v1826_v46 = vpop.f32.mrf.mxu3  ;;  %v8119_v53 = vpop.f32.mrf.mxu0  ;;  %v3527_v58 = vshll.u32 %v7359_v47, 16  ;;  %v3525_v8 = vshrl.u32 %v7359_v47, 16  ;;  %v2541_v47 = vld [vmem:[%s7868_s30 + $0x8] sm:$0x1] }
  0xc6   : > { %v8114_v51 = vadd.f32 %v8072_v60, %v1826_v46  ;;  %6671 = vmatmul.msk.bf16.gmra.mxu1 %vm1702_vm1, %v2076_v48  ;;  %v2538_v46 = vld [vmem:[%s7977_s13 + $0x8] sm:$0x1]  ;;  %v3521_v48 = vunpack.c.l.b16 %v3351_v29 }
  0xc7   : > { %6752 = vmatmul.msk.bf16.gmra.mxu2 %vm1702_vm1, %v2629_v49  ;;  %v2108_v49 = vshll.u32 %v7311_v34, 16  ;;  %v3529_v12 = vrot.slane %v3527_v58, 1 }
  0xc8   : > { %6914 = vmatmul.msk.bf16.gmra.mxu0 %vm1702_vm1, %v3495_v55  ;;  %v6712_v55 = vld [vmem:[%s7977_s13] sm:$0xe]  ;;  %v3523_v57 = vpack.c.b16 %v3521_v48, %v3521_v48 }
  0xc9   : > { %v2110_v63 = vrot.slane %v2108_v49, 1  ;;  %v3530_v22 = vor.u32 %v3529_v12, %v3525_v8  ;;  %v7360_v48 = vld [vmem:[%s8884_s0] sm:$0xff]  ;;  %v3541_v49 = vunpack.c.l.b16 %v3354_v26 }
  0xca   : > { %6833 = vmatmul.msk.bf16.gmra.mxu3 %vm1702_vm1, %v7341_v54  ;;  %v1809_v3 = vpop.f32.mrf.mxu2  ;;  %v2646_v54 = vunpack.c.l.b16 %v2538_v46  ;;  %v3532_v13 = vshll.u32 %v3523_v57, 16  ;;  %v7328_v57 = vld [vmem:[%s7868_s30] sm:$0xf0] }
  0xcb   : > { %v8132_v4 = vadd.f32 %v8072_v60, %v1809_v3  ;;  %v1791_v10 = vpop.f32.mrf.mxu1  ;;  %v6713_v3 = vor.u32 %v7327_v56, %v6712_v55  ;;  %v2111_v14 = vor.u32 %v2110_v63, %v2106_v62  ;;  %v2657_v55 = vunpack.c.l.b16 %v2541_v47  ;;  %v6716_v56 = vld [vmem:[%s7868_s30] sm:$0xe] }
  0xcc   : > { %v8138_v16 = vadd.f32 %v8072_v60, %v1791_v10  ;;  %v2648_v5 = vpack.c.b16 %v2646_v54, %v2646_v54  ;;  %v3534_v23 = vrot.slane %v3532_v13, 1  ;;  %v3543_v58 = vpack.c.b16 %v3541_v49, %v3541_v49 }
  0xcd   : > { %v1829_v9 = vpop.f32.mrf.mxu3  ;;  %v8140_v17 = vpop.f32.mrf.mxu0  ;;  %v2649_v19 = vrot.slane %v6713_v3, 1  ;;  %v6717_v8 = vor.u32 %v7328_v57, %v6716_v56  ;;  %v2659_v12 = vpack.c.b16 %v2657_v55, %v2657_v55  ;;  %v3545_v13 = vshrl.u32 %v7360_v48, 16 }
  0xce   : > { %v8135_v15 = vadd.f32 %v8072_v60, %v1829_v9  ;;  %v2650_v20 = vrot.slane %v2648_v5, 1  ;;  %v3535_v46 = vsel %vm1964_vm2, %v3530_v22, %v3534_v23  ;;  %v3552_v22 = vshll.u32 %v3543_v58, 16  ;;  %v7344_v58 = vld [vmem:[%s8884_s0] sm:$0xff] }
  0xcf   : > { %v2661_v26 = vrot.slane %v2659_v12, 1 }
  0xd2   : > { %v1811_v28 = vpop.f32.mrf.mxu2 }
  0xd3   : > { %v8145_v33 = vadd.f32 %v8072_v60, %v1811_v28  ;;  %v1794_v36 = vpop.f32.mrf.mxu1  ;;  %v7312_v28 = vld [vmem:[%s7868_s30] sm:$0xff] }
  0xd4   : > { %v8154_v41 = vadd.f32 %v8072_v60, %v1794_v36  ;;  %v2651_v36 = vsel %vm2571_vm3, %v2649_v19, %v2650_v20  ;;  %v2128_v50 = vshll.u32 %v7312_v28, 16 }
  0xd5   : > { %v1831_v35 = vpop.f32.mrf.mxu3  ;;  %v8156_v42 = vpop.f32.mrf.mxu0 }
  0xd6   : > { %v8151_v40 = vadd.f32 %v8072_v60, %v1831_v35  ;;  %6672 = vmatmul.msk.bf16.gmra.mxu1 %vm1702_vm1, %v2096_v37  ;;  %v2116_v35 = vsel %vm1964_vm2, %v2111_v14, %v2115_v18  ;;  %v2122_v37 = vunpack.c.l.b16 %v1934_v24 }
  0xd7   : > { %6753 = vmatmul.msk.bf16.gmra.mxu2 %vm1702_vm1, %v2640_v38 }
  0xd8   : > { %6915 = vmatmul.msk.bf16.gmra.mxu0 %vm1702_vm1, %v3515_v45  ;;  %v7343_v45 = vld [vmem:[%s7868_s30] sm:$0xff]  ;;  %v2124_v54 = vpack.c.b16 %v2122_v37, %v2122_v37  ;;  %v1844_v37 = vadd.f32 %v8072_v60, %v8082_v7 }
  0xda   : > { %6834 = vmatmul.msk.bf16.gmra.mxu3 %vm1702_vm1, %v7342_v43  ;;  %v1814_v59 = vpop.f32.mrf.mxu2  ;;  %v2133_v5 = vshll.u32 %v2124_v54, 16 }
  0xdb   : > { %v8169_v61 = vadd.f32 %v8072_v60, %v1814_v59  ;;  %v1796_v1 = vpop.f32.mrf.mxu1  ;;  %v3547_v59 = vshll.u32 %v7360_v48, 16 }
  0xdc   : > { %v8175_v10 = vadd.f32 %v8072_v60, %v1796_v1  ;;  %v2130_v1 = vrot.slane %v2128_v50, 1  ;;  %v2135_v24 = vrot.slane %v2133_v5, 1  ;;  %v6720_v5 = vld [vmem:[%s8884_s0] sm:$0xe] }
  0xdd   : > { %v1834_v0 = vpop.f32.mrf.mxu3  ;;  %v8177_v11 = vpop.f32.mrf.mxu0  ;;  %v3549_v20 = vrot.slane %v3547_v59, 1  ;;  %v2544_v59 = vld [vmem:[%s8884_s0 + $0x8] sm:$0x1] }
  0xde   : > { %v8172_v9 = vadd.f32 %v8072_v60, %v1834_v0  ;;  %v2126_v0 = vshrl.u32 %v7312_v28, 16 }
  0xdf   : > { %v3550_v28 = vor.u32 %v3549_v20, %v3545_v13 }
  0xe0   : > { %v2131_v23 = vor.u32 %v2130_v1, %v2126_v0 }
  0xe2   : > { %v1816_v25 = vpop.f32.mrf.mxu2  ;;  %v2136_v49 = vsel %vm1964_vm2, %v2131_v23, %v2135_v24 }
  0xe3   : > { %v8182_v27 = vadd.f32 %v8072_v60, %v1816_v25  ;;  %v1799_v34 = vpop.f32.mrf.mxu1  ;;  %v2660_v25 = vrot.slane %v6717_v8, 1  ;;  %v7329_v8 = vld [vmem:[%s8884_s0] sm:$0xf0] }
  0xe4   : > { %v8191_v39 = vadd.f32 %v8072_v60, %v1799_v34  ;;  %v1937_v34 = vld [vmem:[%s8884_s0 + $0x8] sm:$0x1] }
  0xe5   : > { %v1836_v29 = vpop.f32.mrf.mxu3  ;;  %v8193_v43 = vpop.f32.mrf.mxu0  ;;  %v2662_v50 = vsel %vm2571_vm3, %v2660_v25, %v2661_v26  ;;  %v2142_v54 = vunpack.c.l.b16 %v1937_v34  ;;  %v6721_v34 = vor.u32 %v7329_v8, %v6720_v5  ;;  %v7314_v5 = vld [vmem:[%s7934_s28] sm:$0xff] }
  0xe6   : > { %v8188_v38 = vadd.f32 %v8072_v60, %v1836_v29  ;;  %6673 = vmatmul.msk.bf16.gmra.mxu1 %vm1702_vm1, %v2116_v35  ;;  %v3554_v29 = vrot.slane %v3552_v22, 1  ;;  %v1845_v22 = vadd.f32 %v8072_v60, %v8103_v32 }
  0xe7   : > { %6754 = vmatmul.msk.bf16.gmra.mxu2 %vm1702_vm1, %v2651_v36  ;;  %v3357_v36 = vld [vmem:[%s7934_s28 + $0x8] sm:$0x1] }
  0xe8   : > { %6916 = vmatmul.msk.bf16.gmra.mxu0 %vm1702_vm1, %v3535_v46  ;;  %v7313_v46 = vld [vmem:[%s8884_s0] sm:$0xff]  ;;  %v3555_v7 = vsel %vm1964_vm2, %v3550_v28, %v3554_v29  ;;  %v3561_v0 = vunpack.c.l.b16 %v3357_v36 }
  0xe9   : > { %v2148_v1 = vshll.u32 %v7313_v46, 16  ;;  %v2146_v24 = vshrl.u32 %v7313_v46, 16  ;;  %v2671_v46 = vrot.slane %v6721_v34, 1  ;;  %v2168_v34 = vshll.u32 %v7314_v5, 16 }
  0xea   : > { %6835 = vmatmul.msk.bf16.gmra.mxu3 %vm1702_vm1, %v7343_v45  ;;  %v1819_v62 = vpop.f32.mrf.mxu2  ;;  %v3563_v12 = vpack.c.b16 %v3561_v0, %v3561_v0  ;;  %v1940_v0 = vld [vmem:[%s7934_s28 + $0x8] sm:$0x1] }
  0xeb   : > { %v8206_v63 = vadd.f32 %v8072_v60, %v1819_v62  ;;  %v1801_v3 = vpop.f32.mrf.mxu1  ;;  %v7361_v62 = vld [vmem:[%s7934_s28] sm:$0xff]  ;;  %v2150_v25 = vrot.slane %v2148_v1, 1 }
  0xec   : > { %v8212_v18 = vadd.f32 %v8072_v60, %v1801_v3  ;;  %v2668_v3 = vunpack.c.l.b16 %v2544_v59  ;;  %v3567_v13 = vshll.u32 %v7361_v62, 16  ;;  %v3565_v36 = vshrl.u32 %v7361_v62, 16  ;;  %v3360_v62 = vld [vmem:[%s7982_s17 + $0x8] sm:$0x1] }
  0xed   : > { %v1839_v2 = vpop.f32.mrf.mxu3  ;;  %v8214_v19 = vpop.f32.mrf.mxu0  ;;  %v2151_v32 = vor.u32 %v2150_v25, %v2146_v24  ;;  %v7345_v25 = vld [vmem:[%s7934_s28] sm:$0xff] }
  0xee   : > { %v8209_v14 = vadd.f32 %v8072_v60, %v1839_v2  ;;  %v2144_v2 = vpack.c.b16 %v2142_v54, %v2142_v54 }
  0xf0   : > { %v2153_v29 = vshll.u32 %v2144_v2, 16  ;;  %v1846_v2 = vadd.f32 %v8072_v60, %v8119_v53  ;;  %v3581_v53 = vunpack.c.l.b16 %v3360_v62 }
  0xf2   : > { %v1821_v35 = vpop.f32.mrf.mxu2 }
  0xf3   : > { %v8221_v45 = vadd.f32 %v8072_v60, %v1821_v35  ;;  %v2371_v48 = vpop.f32.mrf.mxu1  ;;  %v2670_v35 = vpack.c.b16 %v2668_v3, %v2668_v3 }
  0xf4   : > { %v2451_v56 = vadd.f32 %v2371_v48, %v1844_v37 }
  0xf5   : > { %v1841_v47 = vpop.f32.mrf.mxu3  ;;  %v3790_v57 = vpop.f32.mrf.mxu0 }
  0xf6   : > { %v8227_v55 = vadd.f32 %v8072_v60, %v1841_v47  ;;  %6674 = vmatmul.msk.bf16.gmra.mxu1 %vm1702_vm1, %v2136_v49  ;;  %v3569_v49 = vrot.slane %v3567_v13, 1 }
  0xf7   : > { %6755 = vmatmul.msk.bf16.gmra.mxu2 %vm1702_vm1, %v2662_v50  ;;  %v3572_v50 = vshll.u32 %v3563_v12, 16 }
  0xf8   : > { %6917 = vmatmul.msk.bf16.gmra.mxu0 %vm1702_vm1, %v3555_v7  ;;  %v3570_v7 = vor.u32 %v3569_v49, %v3565_v36  ;;  %v7330_v49 = vld [vmem:[%s7934_s28] sm:$0xf0] }
  0xf9   : > { %v3574_v59 = vrot.slane %v3572_v50, 1  ;;  %v3583_v50 = vpack.c.b16 %v3581_v53, %v3581_v53  ;;  %v1943_v53 = vld [vmem:[%s7982_s17 + $0x8] sm:$0x1] }
  0xfa   : > { %6836 = vmatmul.msk.bf16.gmra.mxu3 %vm1702_vm1, %v7344_v58  ;;  %v2834_v20 = vpop.f32.mrf.mxu2  ;;  %v2672_v58 = vrot.slane %v2670_v35, 1 }
  0xfb   : > { %v2914_v23 = vadd.f32 %v2834_v20, %v2451_v56  ;;  %v2373_v28 = vpop.f32.mrf.mxu1  ;;  %v2155_v56 = vrot.slane %v2153_v29, 1  ;;  %v2162_v20 = vunpack.c.l.b16 %v1940_v0  ;;  %v7362_v29 = vld [vmem:[%s7982_s17] sm:$0xff] }
  0xfc   : > { %v2452_v47 = vadd.f32 %v2373_v28, %v1845_v22  ;;  %v2673_v13 = vsel %vm2571_vm3, %v2671_v46, %v2672_v58  ;;  %v2547_v28 = vld [vmem:[%s7934_s28 + $0x8] sm:$0x1]  ;;  %v1847_v46 = vadd.f32 %v8072_v60, %v8140_v17 }
  0xfd   : > { %v3184_v26 = vpop.f32.mrf.mxu3  ;;  %v3792_v48 = vpop.f32.mrf.mxu0  ;;  %v2156_v12 = vsel %vm1964_vm2, %v2151_v32, %v2155_v56  ;;  %v2164_v36 = vpack.c.b16 %v2162_v20, %v2162_v20  ;;  %v3587_v32 = vshll.u32 %v7362_v29, 16  ;;  %v3592_v20 = vshll.u32 %v3583_v50, 16 }
  0xfe   : > { %v3264_v37 = vadd.f32 %v3184_v26, %v2914_v23  ;;  %v3575_v26 = vsel %vm1964_vm2, %v3570_v7, %v3574_v59  ;;  %v2166_v7 = vshrl.u32 %v7314_v5, 16  ;;  %v2170_v59 = vrot.slane %v2168_v34, 1 }
 0x100   : > { %v8241_v54 = vadd.f32 %v3790_v57, %v3264_v37  ;;  %v2679_v37 = vunpack.c.l.b16 %v2547_v28  ;;  %v2171_v17 = vor.u32 %v2170_v59, %v2166_v7  ;;  %v3594_v28 = vrot.slane %v3592_v20, 1  ;;  %v7346_v59 = vld [vmem:[%s7982_s17] sm:$0xff] }
 0x102   : > { %v2836_v1 = vpop.f32.mrf.mxu2 }
 0x103   : > { %v2915_v3 = vadd.f32 %v2836_v1, %v2452_v47  ;;  %v2376_v57 = vpop.f32.mrf.mxu1  ;;  %v6724_v47 = vld [vmem:[%s7934_s28] sm:$0xe]  ;;  %v2173_v1 = vshll.u32 %v2164_v36, 16  ;;  %v1848_v36 = vadd.f32 %v8072_v60, %v8156_v42 }
 0x104   : > { %v2453_v23 = vadd.f32 %v2376_v57, %v1846_v2  ;;  %v6725_v62 = vor.u32 %v7330_v49, %v6724_v47  ;;  %v2681_v2 = vpack.c.b16 %v2679_v37, %v2679_v37  ;;  %v7315_v47 = vld [vmem:[%s7982_s17] sm:$0xff] }
 0x105   : > { %v3186_v8 = vpop.f32.mrf.mxu3  ;;  %v3795_v24 = vpop.f32.mrf.mxu0 }
 0x106   : > { %v3265_v22 = vadd.f32 %v3186_v8, %v2915_v3  ;;  %6675 = vmatmul.msk.bf16.gmra.mxu1 %vm1702_vm1, %v2156_v12  ;;  %v3585_v3 = vshrl.u32 %v7362_v29, 16  ;;  %v2682_v5 = vrot.slane %v6725_v62, 1  ;;  %v3363_v29 = vld [vmem:[%s8885_s25 + $0x8] sm:$0x1]  ;;  %v2188_v62 = vshll.u32 %v7315_v47, 16 }
 0x107   : > { %6756 = vmatmul.msk.bf16.gmra.mxu2 %vm1702_vm1, %v2673_v13  ;;  %v3589_v13 = vrot.slane %v3587_v32, 1  ;;  %v3601_v42 = vunpack.c.l.b16 %v3363_v29 }
 0x108   : > { %v8256_v35 = vadd.f32 %v3792_v48, %v3265_v22  ;;  %6918 = vmatmul.msk.bf16.gmra.mxu0 %vm1702_vm1, %v3575_v26 }
 0x109   : > { %v3590_v26 = vor.u32 %v3589_v13, %v3585_v3  ;;  %v7331_v13 = vld [vmem:[%s7982_s17] sm:$0xf0]  ;;  %v3603_v20 = vpack.c.b16 %v3601_v42, %v3601_v42  ;;  %v1946_v42 = vld [vmem:[%s8885_s25 + $0x8] sm:$0x1] }
 0x10a   : > { %6837 = vmatmul.msk.bf16.gmra.mxu3 %vm1702_vm1, %v7345_v25  ;;  %v2839_v56 = vpop.f32.mrf.mxu2  ;;  %v2683_v25 = vrot.slane %v2681_v2, 1 }
 0x10b   : > { %v2916_v58 = vadd.f32 %v2839_v56, %v2453_v23  ;;  %v2378_v48 = vpop.f32.mrf.mxu1  ;;  %v2175_v23 = vrot.slane %v2173_v1, 1  ;;  %v2182_v56 = vunpack.c.l.b16 %v1943_v53  ;;  %v7363_v1 = vld [vmem:[%s8885_s25] sm:$0xff] }
 0x10c   : > { %v2454_v57 = vadd.f32 %v2378_v48, %v1847_v46  ;;  %v2684_v32 = vsel %vm2571_vm3, %v2682_v5, %v2683_v25  ;;  %v2550_v48 = vld [vmem:[%s7982_s17 + $0x8] sm:$0x1]  ;;  %v1849_v5 = vadd.f32 %v8072_v60, %v8177_v11 }
 0x10d   : > { %v3189_v0 = vpop.f32.mrf.mxu3  ;;  %v3797_v12 = vpop.f32.mrf.mxu0  ;;  %v2176_v50 = vsel %vm1964_vm2, %v2171_v17, %v2175_v23  ;;  %v2184_v3 = vpack.c.b16 %v2182_v56, %v2182_v56  ;;  %v3607_v17 = vshll.u32 %v7363_v1, 16  ;;  %v3612_v56 = vshll.u32 %v3603_v20, 16 }
 0x10e   : > { %v3266_v8 = vadd.f32 %v3189_v0, %v2916_v58  ;;  %v3595_v0 = vsel %vm1964_vm2, %v3590_v26, %v3594_v28  ;;  %v2186_v26 = vshrl.u32 %v7315_v47, 16  ;;  %v2190_v28 = vrot.slane %v2188_v62, 1 }
 0x110   : > { %v8264_v22 = vadd.f32 %v3795_v24, %v3266_v8  ;;  %v2690_v8 = vunpack.c.l.b16 %v2550_v48  ;;  %v2191_v11 = vor.u32 %v2190_v28, %v2186_v26  ;;  %v3614_v48 = vrot.slane %v3612_v56, 1  ;;  %v7347_v28 = vld [vmem:[%s8885_s25] sm:$0xff] }
 0x112   : > { %v2841_v34 = vpop.f32.mrf.mxu2 }
 0x113   : > { %v2917_v37 = vadd.f32 %v2841_v34, %v2454_v57  ;;  %v2381_v24 = vpop.f32.mrf.mxu1  ;;  %v6728_v57 = vld [vmem:[%s7982_s17] sm:$0xe]  ;;  %v2193_v34 = vshll.u32 %v2184_v3, 16  ;;  %v1850_v3 = vadd.f32 %v8072_v60, %v8193_v43 }
 0x114   : > { %v2455_v58 = vadd.f32 %v2381_v24, %v1848_v36  ;;  %v6729_v29 = vor.u32 %v7331_v13, %v6728_v57  ;;  %v2692_v36 = vpack.c.b16 %v2690_v8, %v2690_v8  ;;  %v7316_v57 = vld [vmem:[%s8885_s25] sm:$0xff] }
 0x115   : > { %v3191_v49 = vpop.f32.mrf.mxu3  ;;  %v3800_v7 = vpop.f32.mrf.mxu0 }
 0x116   : > { %v3267_v46 = vadd.f32 %v3191_v49, %v2917_v37  ;;  %6676 = vmatmul.msk.bf16.gmra.mxu1 %vm1702_vm1, %v2176_v50  ;;  %v3605_v37 = vshrl.u32 %v7363_v1, 16  ;;  %v2693_v47 = vrot.slane %v6729_v29, 1  ;;  %v3366_v1 = vld [vmem:[%s8886_s4 + $0x8] sm:$0x1]  ;;  %v2208_v29 = vshll.u32 %v7316_v57, 16 }
 0x117   : > { %6757 = vmatmul.msk.bf16.gmra.mxu2 %vm1702_vm1, %v2684_v32  ;;  %v3609_v32 = vrot.slane %v3607_v17, 1  ;;  %v3621_v43 = vunpack.c.l.b16 %v3366_v1 }
 0x118   : > { %v8279_v2 = vadd.f32 %v3797_v12, %v3267_v46  ;;  %6919 = vmatmul.msk.bf16.gmra.mxu0 %vm1702_vm1, %v3595_v0 }
 0x119   : > { %v3610_v0 = vor.u32 %v3609_v32, %v3605_v37  ;;  %v7332_v32 = vld [vmem:[%s8885_s25] sm:$0xf0]  ;;  %v3623_v56 = vpack.c.b16 %v3621_v43, %v3621_v43 }
 0x11a   : > { %6838 = vmatmul.msk.bf16.gmra.mxu3 %vm1702_vm1, %v7346_v59  ;;  %v2844_v23 = vpop.f32.mrf.mxu2  ;;  %v2694_v59 = vrot.slane %v2692_v36, 1 }
 0x11b   : > { %v2918_v25 = vadd.f32 %v2844_v23, %v2455_v58  ;;  %v2383_v12 = vpop.f32.mrf.mxu1  ;;  %v2195_v58 = vrot.slane %v2193_v34, 1  ;;  %v2202_v23 = vunpack.c.l.b16 %v1946_v42  ;;  %v7364_v34 = vld [vmem:[%s8886_s4] sm:$0xff] }
 0x11c   : > { %v2456_v24 = vadd.f32 %v2383_v12, %v1849_v5  ;;  %v2695_v17 = vsel %vm2571_vm3, %v2693_v47, %v2694_v59  ;;  %v2553_v12 = vld [vmem:[%s8885_s25 + $0x8] sm:$0x1]  ;;  %v1851_v47 = vadd.f32 %v8072_v60, %v8214_v19 }
 0x11d   : > { %v3194_v53 = vpop.f32.mrf.mxu3  ;;  %v3802_v50 = vpop.f32.mrf.mxu0  ;;  %v2196_v20 = vsel %vm1964_vm2, %v2191_v11, %v2195_v58  ;;  %v2204_v37 = vpack.c.b16 %v2202_v23, %v2202_v23  ;;  %v3627_v11 = vshll.u32 %v7364_v34, 16  ;;  %v3632_v23 = vshll.u32 %v3623_v56, 16 }
 0x11e   : > { %v3268_v49 = vadd.f32 %v3194_v53, %v2918_v25  ;;  %v3615_v53 = vsel %vm1964_vm2, %v3610_v0, %v3614_v48  ;;  %v2206_v0 = vshrl.u32 %v7316_v57, 16  ;;  %v2210_v48 = vrot.slane %v2208_v29, 1 }
 0x120   : > { %v8287_v46 = vadd.f32 %v3800_v7, %v3268_v49  ;;  %v2701_v49 = vunpack.c.l.b16 %v2553_v12  ;;  %v2211_v60 = vor.u32 %v2210_v48, %v2206_v0  ;;  %v1949_v12 = vld [vmem:[%s8886_s4 + $0x8] sm:$0x1] }
 0x121   : > { %v2222_v56 = vunpack.c.l.b16 %v1949_v12  ;;  %v2556_v48 = vld [vmem:[%s8886_s4 + $0x8] sm:$0x1] }
 0x122   : > { %v2846_v62 = vpop.f32.mrf.mxu2 }
 0x123   : > { %v2919_v8 = vadd.f32 %v2846_v62, %v2456_v24  ;;  %v2386_v7 = vpop.f32.mrf.mxu1  ;;  %v6732_v24 = vld [vmem:[%s8885_s25] sm:$0xe]  ;;  %v2213_v62 = vshll.u32 %v2204_v37, 16 }
 0x124   : > { %v2457_v25 = vadd.f32 %v2386_v7, %v1850_v3  ;;  %v6733_v1 = vor.u32 %v7332_v32, %v6732_v24  ;;  %v2703_v3 = vpack.c.b16 %v2701_v49, %v2701_v49  ;;  %v7317_v37 = vld [vmem:[%s8886_s4] sm:$0xff] }
 0x125   : > { %v3196_v13 = vpop.f32.mrf.mxu3  ;;  %v3805_v26 = vpop.f32.mrf.mxu0  ;;  %v2215_v19 = vrot.slane %v2213_v62, 1  ;;  %v2228_v62 = vshll.u32 %v7317_v37, 16 }
 0x126   : > { %v3269_v5 = vadd.f32 %v3196_v13, %v2919_v8  ;;  %6677 = vmatmul.msk.bf16.gmra.mxu1 %vm1702_vm1, %v2196_v20  ;;  %v3625_v8 = vshrl.u32 %v7364_v34, 16  ;;  %v2704_v57 = vrot.slane %v6733_v1, 1  ;;  %v3369_v34 = vld [vmem:[%s7944_s8 + $0x8] sm:$0x1] }
 0x127   : > { %6758 = vmatmul.msk.bf16.gmra.mxu2 %vm1702_vm1, %v2695_v17  ;;  %v3629_v17 = vrot.slane %v3627_v11, 1  ;;  %v2216_v32 = vsel %vm1964_vm2, %v2211_v60, %v2215_v19  ;;  %v2226_v19 = vshrl.u32 %v7317_v37, 16 }
 0x128   : > { %v8302_v36 = vadd.f32 %v3802_v50, %v3269_v5  ;;  %6920 = vmatmul.msk.bf16.gmra.mxu0 %vm1702_vm1, %v3615_v53  ;;  %v3634_v53 = vrot.slane %v3632_v23, 1 }
 0x12a   : > { %6839 = vmatmul.msk.bf16.gmra.mxu3 %vm1702_vm1, %v7347_v28  ;;  %v2849_v58 = vpop.f32.mrf.mxu2  ;;  %v3630_v28 = vor.u32 %v3629_v17, %v3625_v8  ;;  %v2712_v8 = vunpack.c.l.b16 %v2556_v48  ;;  %v1952_v48 = vld [vmem:[%s7944_s8 + $0x8] sm:$0x1] }
 0x12b   : > { %v2920_v59 = vadd.f32 %v2849_v58, %v2457_v25  ;;  %v2388_v50 = vpop.f32.mrf.mxu1  ;;  %v2705_v25 = vrot.slane %v2703_v3, 1  ;;  %v2224_v3 = vpack.c.b16 %v2222_v56, %v2222_v56 }
 0x12c   : > { %v2458_v7 = vadd.f32 %v2388_v50, %v1851_v47  ;;  %v3635_v0 = vsel %vm1964_vm2, %v3630_v28, %v3634_v53  ;;  %v3641_v50 = vunpack.c.l.b16 %v3369_v34  ;;  %v2714_v12 = vpack.c.b16 %v2712_v8, %v2712_v8 }
 0x12d   : > { %v3199_v42 = vpop.f32.mrf.mxu3  ;;  %v3807_v20 = vpop.f32.mrf.mxu0  ;;  %v2233_v53 = vshll.u32 %v2224_v3, 16  ;;  %v7318_v3 = vld [vmem:[%s7944_s8] sm:$0xff] }
 0x12e   : > { %v3270_v13 = vadd.f32 %v3199_v42, %v2920_v59  ;;  %v7348_v59 = vld [vmem:[%s8886_s4] sm:$0xff] }
 0x12f   : > { %v7365_v42 = vld [vmem:[%s7944_s8] sm:$0xff]  ;;  %v2235_v37 = vrot.slane %v2233_v53, 1  ;;  %v2248_v53 = vshll.u32 %v7318_v3, 16 }
 0x130   : > { %v8310_v5 = vadd.f32 %v3805_v26, %v3270_v13  ;;  %v2706_v26 = vsel %vm2571_vm3, %v2704_v57, %v2705_v25  ;;  %v7333_v13 = vld [vmem:[%s8886_s4] sm:$0xf0]  ;;  %v3647_v17 = vshll.u32 %v7365_v42, 16  ;;  %v2230_v57 = vrot.slane %v2228_v62, 1 }
 0x132   : > { %v2851_v43 = vpop.f32.mrf.mxu2  ;;  %v2231_v56 = vor.u32 %v2230_v57, %v2226_v19  ;;  %v2559_v57 = vld [vmem:[%s7944_s8 + $0x8] sm:$0x1] }
 0x133   : > { %v2921_v29 = vadd.f32 %v2851_v43, %v2458_v7  ;;  %v2391_v24 = vpop.f32.mrf.mxu1  ;;  %v3643_v7 = vpack.c.b16 %v3641_v50, %v3641_v50  ;;  %v3645_v43 = vshrl.u32 %v7365_v42, 16  ;;  %v3372_v50 = vld [vmem:[%s7993_s27 + $0x8] sm:$0x1] }
 0x134   : > { %v2459_v58 = vadd.f32 %v2391_v24, %v8080_v6  ;;  %v6736_v6 = vld [vmem:[%s8886_s4] sm:$0xe]  ;;  %v3649_v24 = vrot.slane %v3647_v17, 1 }
 0x135   : > { %v3201_v49 = vpop.f32.mrf.mxu3  ;;  %v3810_v47 = vpop.f32.mrf.mxu0 }
 0x136   : > { %v3271_v11 = vadd.f32 %v3201_v49, %v2921_v29  ;;  %6678 = vmatmul.msk.bf16.gmra.mxu1 %vm1702_vm1, %v2216_v32  ;;  %v3652_v32 = vshll.u32 %v3643_v7, 16 }
 0x137   : > { %6759 = vmatmul.msk.bf16.gmra.mxu2 %vm1702_vm1, %v2706_v26 }
 0x138   : > { %v8324_v1 = vadd.f32 %v3807_v20, %v3271_v11  ;;  %6921 = vmatmul.msk.bf16.gmra.mxu0 %vm1702_vm1, %v3635_v0  ;;  %v6737_v20 = vor.u32 %v7333_v13, %v6736_v6  ;;  %v3654_v0 = vrot.slane %v3652_v32, 1  ;;  %v2236_v6 = vsel %vm1964_vm2, %v2231_v56, %v2235_v37 }
 0x139   : > { %v2242_v13 = vunpack.c.l.b16 %v1952_v48  ;;  %v2246_v37 = vshrl.u32 %v7318_v3, 16 }
 0x13a   : > { %6840 = vmatmul.msk.bf16.gmra.mxu3 %vm1702_vm1, %v7348_v59  ;;  %v2854_v23 = vpop.f32.mrf.mxu2  ;;  %v2715_v11 = vrot.slane %v6737_v20, 1  ;;  %v3650_v59 = vor.u32 %v3649_v24, %v3645_v43  ;;  %v2723_v43 = vunpack.c.l.b16 %v2559_v57 }
 0x13b   : > { %v2922_v60 = vadd.f32 %v2854_v23, %v2459_v58  ;;  %v2393_v28 = vpop.f32.mrf.mxu1  ;;  %v2716_v58 = vrot.slane %v2714_v12, 1  ;;  %v2244_v12 = vpack.c.b16 %v2242_v13, %v2242_v13 }
 0x13c   : > { %v2460_v29 = vadd.f32 %v2393_v28, %v8101_v31  ;;  %v3655_v19 = vsel %vm1964_vm2, %v3650_v59, %v3654_v0  ;;  %v3661_v28 = vunpack.c.l.b16 %v3372_v50  ;;  %v2725_v48 = vpack.c.b16 %v2723_v43, %v2723_v43 }
 0x13d   : > { %v3204_v25 = vpop.f32.mrf.mxu3  ;;  %v3812_v49 = vpop.f32.mrf.mxu0  ;;  %v2253_v0 = vshll.u32 %v2244_v12, 16 }
 0x13e   : > { %v3272_v34 = vadd.f32 %v3204_v25, %v2922_v60  ;;  %v7349_v60 = vld [vmem:[%s7944_s8] sm:$0xff] }
 0x13f   : > { %v7366_v25 = vld [vmem:[%s7993_s27] sm:$0xff]  ;;  %v2255_v13 = vrot.slane %v2253_v0, 1 }
 0x140   : > { %v8331_v26 = vadd.f32 %v3810_v47, %v3272_v34  ;;  %v2717_v47 = vsel %vm2571_vm3, %v2715_v11, %v2716_v58  ;;  %v7334_v34 = vld [vmem:[%s7944_s8] sm:$0xf0]  ;;  %v3667_v24 = vshll.u32 %v7366_v25, 16  ;;  %v2250_v11 = vrot.slane %v2248_v53, 1 }
 0x141   : > { %v7319_v53 = vld [vmem:[%s7993_s27] sm:$0xff] }
 0x142   : > { %v2856_v42 = vpop.f32.mrf.mxu2  ;;  %v2268_v0 = vshll.u32 %v7319_v53, 16 }
 0x143   : > { %v2923_v62 = vadd.f32 %v2856_v42, %v2460_v29  ;;  %v2396_v8 = vpop.f32.mrf.mxu1  ;;  %v3663_v29 = vpack.c.b16 %v3661_v28, %v3661_v28  ;;  %v3665_v42 = vshrl.u32 %v7366_v25, 16  ;;  %v3375_v25 = vld [vmem:[%s8356_s12 + $0x8] sm:$0x1] }
 0x144   : > { %v2461_v17 = vadd.f32 %v2396_v8, %v8117_v52  ;;  %v6740_v52 = vld [vmem:[%s7944_s8] sm:$0xe]  ;;  %v3669_v8 = vrot.slane %v3667_v24, 1 }
 0x145   : > { %v3206_v31 = vpop.f32.mrf.mxu3  ;;  %v3815_v23 = vpop.f32.mrf.mxu0 }
 0x146   : > { %v3273_v7 = vadd.f32 %v3206_v31, %v2923_v62  ;;  %6679 = vmatmul.msk.bf16.gmra.mxu1 %vm1702_vm1, %v2236_v6  ;;  %v3672_v6 = vshll.u32 %v3663_v29, 16 }
 0x147   : > { %6760 = vmatmul.msk.bf16.gmra.mxu2 %vm1702_vm1, %v2717_v47  ;;  %v2251_v47 = vor.u32 %v2250_v11, %v2246_v37  ;;  %v2562_v11 = vld [vmem:[%s7993_s27 + $0x8] sm:$0x1] }
 0x148   : > { %v8345_v20 = vadd.f32 %v3812_v49, %v3273_v7  ;;  %6922 = vmatmul.msk.bf16.gmra.mxu0 %vm1702_vm1, %v3655_v19  ;;  %v6741_v49 = vor.u32 %v7334_v34, %v6740_v52  ;;  %v3674_v19 = vrot.slane %v3672_v6, 1 }
 0x149   : > { %v2256_v52 = vsel %vm1964_vm2, %v2251_v47, %v2255_v13  ;;  %v2266_v13 = vshrl.u32 %v7319_v53, 16 }
 0x14a   : > { %6841 = vmatmul.msk.bf16.gmra.mxu3 %vm1702_vm1, %v7349_v60  ;;  %v2859_v32 = vpop.f32.mrf.mxu2  ;;  %v2726_v7 = vrot.slane %v6741_v49, 1  ;;  %v3670_v60 = vor.u32 %v3669_v8, %v3665_v42  ;;  %v2734_v42 = vunpack.c.l.b16 %v2562_v11 }
 0x14b   : > { %v2924_v56 = vadd.f32 %v2859_v32, %v2461_v17  ;;  %v2398_v59 = vpop.f32.mrf.mxu1  ;;  %v2727_v17 = vrot.slane %v2725_v48, 1 }
 0x14c   : > { %v2462_v62 = vadd.f32 %v2398_v59, %v8138_v16  ;;  %v1955_v16 = vld [vmem:[%s7993_s27 + $0x8] sm:$0x1]  ;;  %v3675_v37 = vsel %vm1964_vm2, %v3670_v60, %v3674_v19  ;;  %v3681_v59 = vunpack.c.l.b16 %v3375_v25 }
 0x14d   : > { %v3209_v58 = vpop.f32.mrf.mxu3  ;;  %v3817_v31 = vpop.f32.mrf.mxu0  ;;  %v2262_v34 = vunpack.c.l.b16 %v1955_v16 }
 0x14e   : > { %v3274_v50 = vadd.f32 %v3209_v58, %v2924_v56  ;;  %v7350_v56 = vld [vmem:[%s7993_s27] sm:$0xff] }
 0x14f   : > { %v7367_v58 = vld [vmem:[%s8356_s12] sm:$0xff]  ;;  %v2264_v48 = vpack.c.b16 %v2262_v34, %v2262_v34 }
 0x150   : > { %v8358_v3 = vadd.f32 %v3815_v23, %v3274_v50  ;;  %v2728_v23 = vsel %vm2571_vm3, %v2726_v7, %v2727_v17  ;;  %v7335_v50 = vld [vmem:[%s7993_s27] sm:$0xf0]  ;;  %v3687_v8 = vshll.u32 %v7367_v58, 16  ;;  %v2270_v7 = vrot.slane %v2268_v0, 1 }
 0x151   : > { %v2273_v19 = vshll.u32 %v2264_v48, 16 }
 0x152   : > { %v2861_v57 = vpop.f32.mrf.mxu2  ;;  %v2271_v34 = vor.u32 %v2270_v7, %v2266_v13  ;;  %v5354_v7 = vld [vmem:[%s7939_s9 + $0x8] sm:$0x1] }
 0x153   : > { %v2925_v28 = vadd.f32 %v2861_v57, %v2462_v62  ;;  %v2401_v43 = vpop.f32.mrf.mxu1  ;;  %v3683_v62 = vpack.c.b16 %v3681_v59, %v3681_v59  ;;  %v3685_v57 = vshrl.u32 %v7367_v58, 16  ;;  %v4748_v59 = vld [vmem:[%s7939_s9 + $0x8] sm:$0x1] }
 0x154   : > { %v2463_v24 = vadd.f32 %v2401_v43, %v8154_v41  ;;  %v6744_v41 = vld [vmem:[%s7993_s27] sm:$0xe]  ;;  %v3689_v43 = vrot.slane %v3687_v8, 1  ;;  %v4799_v13 = vunpack.c.l.b16 %v4748_v59 }
 0x155   : > { %v3211_v12 = vpop.f32.mrf.mxu3  ;;  %v3820_v32 = vpop.f32.mrf.mxu0  ;;  %v6745_v16 = vor.u32 %v7335_v50, %v6744_v41 }
 0x156   : > { %v3275_v29 = vadd.f32 %v3211_v12, %v2925_v28  ;;  %6680 = vmatmul.msk.bf16.gmra.mxu1 %vm1702_vm1, %v2256_v52  ;;  %v3692_v52 = vshll.u32 %v3683_v62, 16  ;;  %v7351_v62 = vld [vmem:[%s8356_s12] sm:$0xff] }
 0x157   : > { %6761 = vmatmul.msk.bf16.gmra.mxu2 %vm1702_vm1, %v2728_v23  ;;  %v2737_v53 = vrot.slane %v6745_v16, 1  ;;  %v5405_v16 = vunpack.c.l.b16 %v5354_v7  ;;  %v7384_v7 = vld [vmem:[%s7939_s9] sm:$0xff] }
 0x158   : > { %v8372_v49 = vadd.f32 %v3817_v31, %v3275_v29  ;;  %6923 = vmatmul.msk.bf16.gmra.mxu0 %vm1702_vm1, %v3675_v37  ;;  %v2736_v31 = vpack.c.b16 %v2734_v42, %v2734_v42  ;;  %v2275_v29 = vrot.slane %v2273_v19, 1  ;;  %v3694_v37 = vrot.slane %v3692_v52, 1  ;;  %v7368_v19 = vld [vmem:[%s7907_s22] sm:$0xf0] }
 0x15a   : > { %6842 = vmatmul.msk.bf16.gmra.mxu3 %vm1702_vm1, %v7350_v56  ;;  %v2864_v6 = vpop.f32.mrf.mxu2  ;;  %v3690_v56 = vor.u32 %v3689_v43, %v3685_v57  ;;  %v2276_v48 = vsel %vm1964_vm2, %v2271_v34, %v2275_v29  ;;  %v4801_v57 = vpack.c.b16 %v4799_v13, %v4799_v13  ;;  %v7416_v43 = vld [vmem:[%s7939_s9] sm:$0xf0] }
 0x15b   : > { %v2926_v47 = vadd.f32 %v2864_v6, %v2463_v24  ;;  %v2403_v60 = vpop.f32.mrf.mxu1  ;;  %v2738_v24 = vrot.slane %v2736_v31, 1  ;;  %v3936_v6 = vld [vmem:[%s7907_s22 + $0x8] sm:$0x1] }
 0x15c   : > { %v2464_v28 = vadd.f32 %v2403_v60, %v8175_v10  ;;  %v3695_v8 = vsel %vm1964_vm2, %v3690_v56, %v3694_v37  ;;  %v3987_v60 = vunpack.c.l.b16 %v3936_v6 }
 0x15d   : > { %v3214_v17 = vpop.f32.mrf.mxu3  ;;  %v3822_v12 = vpop.f32.mrf.mxu0 }
 0x15e   : > { %v3276_v25 = vadd.f32 %v3214_v17, %v2926_v47  ;;  %v7400_v47 = vld [vmem:[%s7939_s9] sm:$0xff] }
 0x15f   : > { %v4803_v59 = vshrl.u32 %v7400_v47, 16 }
 0x160   : > { %v8379_v23 = vadd.f32 %v3820_v32, %v3276_v25  ;;  %v2739_v32 = vsel %vm2571_vm3, %v2737_v53, %v2738_v24  ;;  %v4805_v25 = vshll.u32 %v7400_v47, 16  ;;  %v3989_v24 = vpack.c.b16 %v3987_v60, %v3987_v60  ;;  %v4751_v60 = vld [vmem:[%s7987_s6 + $0x8] sm:$0x1] }
 0x162   : > { %v2866_v11 = vpop.f32.mrf.mxu2 }
 0x163   : > { %v2927_v58 = vadd.f32 %v2866_v11, %v2464_v28  ;;  %v2406_v10 = vpop.f32.mrf.mxu1  ;;  %v7170_v28 = vld [vmem:[%s7939_s9] sm:$0xe] }
 0x164   : > { %v2465_v41 = vadd.f32 %v2406_v10, %v8191_v39  ;;  %v6927_v39 = vld [vmem:[%s7907_s22] sm:$0xe]  ;;  %v7171_v11 = vor.u32 %v7416_v43, %v7170_v28  ;;  %v4810_v10 = vshll.u32 %v4801_v57, 16 }
 0x165   : > { %v3216_v0 = vpop.f32.mrf.mxu3  ;;  %v3825_v50 = vpop.f32.mrf.mxu0  ;;  %v6928_v53 = vor.u32 %v7368_v19, %v6927_v39  ;;  %v7401_v43 = vld [vmem:[%s7987_s6] sm:$0xff] }
 0x166   : > { %v3277_v42 = vadd.f32 %v3216_v0, %v2927_v58  ;;  %6681 = vmatmul.msk.bf16.gmra.mxu1 %vm1702_vm1, %v2276_v48  ;;  %v5407_v58 = vpack.c.b16 %v5405_v16, %v5405_v16  ;;  %v4807_v0 = vrot.slane %v4805_v25, 1  ;;  %v3939_v25 = vld [vmem:[%s7939_s9 + $0x8] sm:$0x1] }
 0x167   : > { %6762 = vmatmul.msk.bf16.gmra.mxu2 %vm1702_vm1, %v2739_v32  ;;  %v3990_v32 = vrot.slane %v6928_v53, 1  ;;  %v6931_v53 = vld [vmem:[%s7939_s9] sm:$0xe] }
 0x168   : > { %v8392_v17 = vadd.f32 %v3822_v12, %v3277_v42  ;;  %6924 = vmatmul.msk.bf16.gmra.mxu0 %vm1702_vm1, %v3695_v8  ;;  %v3991_v42 = vrot.slane %v3989_v24, 1  ;;  %v4808_v6 = vor.u32 %v4807_v0, %v4803_v59  ;;  %v7369_v24 = vld [vmem:[%s7939_s9] sm:$0xf0]  ;;  %v7174_v59 = vld [vmem:[%s7987_s6] sm:$0xe] }
 0x169   : > { %v7417_v0 = vld [vmem:[%s7987_s6] sm:$0xf0] }
 0x16a   : > { %6843 = vmatmul.msk.bf16.gmra.mxu3 %vm1702_vm1, %v7351_v62  ;;  %v2869_v31 = vpop.f32.mrf.mxu2  ;;  %v5409_v62 = vrot.slane %v5407_v58, 1  ;;  %v3992_v47 = vsel %vm2571_vm3, %v3990_v32, %v3991_v42  ;;  %v4825_v58 = vshll.u32 %v7401_v43, 16 }
 0x16b   : > { %v2928_v52 = vadd.f32 %v2869_v31, %v2465_v41  ;;  %v2408_v29 = vpop.f32.mrf.mxu1  ;;  %v5408_v41 = vrot.slane %v7171_v11, 1 }
 0x16c   : > { %v2466_v56 = vadd.f32 %v2408_v29, %v8212_v18  ;;  %v4812_v18 = vrot.slane %v4810_v10, 1 }
 0x16d   : > { %v3219_v34 = vpop.f32.mrf.mxu3  ;;  %v3827_v37 = vpop.f32.mrf.mxu0  ;;  %v5410_v57 = vsel %vm2571_vm3, %v5408_v41, %v5409_v62  ;;  %v6932_v41 = vor.u32 %v7369_v24, %v6931_v53 }
 0x16e   : > { %v3278_v12 = vadd.f32 %v3219_v34, %v2928_v52  ;;  %v4813_v28 = vsel %vm1964_vm2, %v4808_v6, %v4812_v18  ;;  %v4819_v52 = vunpack.c.l.b16 %v4751_v60  ;;  %v5357_v34 = vld [vmem:[%s7987_s6 + $0x8] sm:$0x1]  ;;  %v7175_v18 = vor.u32 %v7417_v0, %v7174_v59  ;;  %v7402_v0 = vld [vmem:[%s7863_s26] sm:$0xff] }
 0x16f   : > { %v4827_v60 = vrot.slane %v4825_v58, 1  ;;  %v3942_v58 = vld [vmem:[%s7987_s6 + $0x8] sm:$0x1] }
 0x170   : > { %v8401_v48 = vadd.f32 %v3825_v50, %v3278_v12  ;;  %v5416_v12 = vunpack.c.l.b16 %v5357_v34  ;;  %v4821_v11 = vpack.c.b16 %v4819_v52, %v4819_v52  ;;  %v7385_v34 = vld [vmem:[%s7987_s6] sm:$0xff] }
 0x172   : > { %v2871_v8 = vpop.f32.mrf.mxu2 }
 0x173   : > { %v2929_v13 = vadd.f32 %v2871_v8, %v2466_v56  ;;  %v2411_v19 = vpop.f32.mrf.mxu1 }
 0x174   : > { %v2467_v16 = vadd.f32 %v2411_v19, %v8095_v21  ;;  %v3998_v21 = vunpack.c.l.b16 %v3939_v25 }
 0x175   : > { %v3221_v39 = vpop.f32.mrf.mxu3  ;;  %v3830_v31 = vpop.f32.mrf.mxu0 }
 0x176   : > { %v3279_v50 = vadd.f32 %v3221_v39, %v2929_v13  ;;  %6990 = vmatmul.msk.bf16.vlgmr.msra.gmra.mxu1 %vm1702_vm1, %v3992_v47  ;;  %v4000_v62 = vpack.c.b16 %v3998_v21, %v3998_v21  ;;  %v5418_v13 = vpack.c.b16 %v5416_v12, %v5416_v12  ;;  %v4830_v39 = vshll.u32 %v4821_v11, 16  ;;  %v4754_v21 = vld [vmem:[%s7863_s26 + $0x8] sm:$0x1] }
 0x177   : > { %7071 = vmatmul.msk.bf16.vlgmr.msra.gmra.mxu2 %vm1702_vm1, %v7384_v7  ;;  %v4823_v7 = vshrl.u32 %v7401_v43, 16  ;;  %v4001_v47 = vrot.slane %v6932_v41, 1  ;;  %v6935_v41 = vld [vmem:[%s7987_s6] sm:$0xe] }
 0x178   : > { %v8414_v29 = vadd.f32 %v3827_v37, %v3279_v50  ;;  %7233 = vmatmul.msk.bf16.vlgmr.msra.gmra.mxu0 %vm1702_vm1, %v5410_v57  ;;  %v4002_v50 = vrot.slane %v4000_v62, 1  ;;  %v5420_v57 = vrot.slane %v5418_v13, 1  ;;  %v7370_v62 = vld [vmem:[%s7987_s6] sm:$0xf0]  ;;  %v4845_v13 = vshll.u32 %v7402_v0, 16  ;;  %s8888_s6 = sld [smem:[#allocation7_spill]] }
 0x17a   : > { %7152 = vmatmul.msk.bf16.vlgmr.msra.gmra.mxu3 %vm1702_vm1, %v4813_v28  ;;  %v2874_v56 = vpop.f32.mrf.mxu2  ;;  %v4828_v28 = vor.u32 %v4827_v60, %v4823_v7  ;;  %v4003_v43 = vsel %vm2571_vm3, %v4001_v47, %v4002_v50  ;;  %v7178_v7 = vld [vmem:[%s7863_s26] sm:$0xe]  ;;  %v7418_v60 = vld [vmem:[%s7863_s26] sm:$0xf0] }
 0x17b   : > { %v2930_v10 = vadd.f32 %v2874_v56, %v2467_v16  ;;  %v2413_v42 = vpop.f32.mrf.mxu1  ;;  %v5419_v16 = vrot.slane %v7175_v18, 1 }
 0x17c   : > { %v2468_v8 = vadd.f32 %v2413_v42, %v8108_v44  ;;  %v4832_v44 = vrot.slane %v4830_v39, 1 }
 0x17d   : > { %v3224_v32 = vpop.f32.mrf.mxu3  ;;  %v3832_v6 = vpop.f32.mrf.mxu0  ;;  %v5421_v11 = vsel %vm2571_vm3, %v5419_v16, %v5420_v57  ;;  %v6936_v16 = vor.u32 %v7370_v62, %v6935_v41 }
 0x17e   : > { %v3280_v37 = vadd.f32 %v3224_v32, %v2930_v10  ;;  %v4833_v59 = vsel %vm1964_vm2, %v4828_v28, %v4832_v44  ;;  %v4839_v10 = vunpack.c.l.b16 %v4754_v21  ;;  %v5360_v32 = vld [vmem:[%s7863_s26 + $0x8] sm:$0x1]  ;;  %v7179_v44 = vor.u32 %v7418_v60, %v7178_v7  ;;  %v7403_v60 = vld [vmem:[%s7897_s29] sm:$0xff]  ;;  %s1277_s9 = sand.u32 1, %s8888_s6  }
 0x17f   : > { %v4847_v21 = vrot.slane %v4845_v13, 1  ;;  %v3945_v13 = vld [vmem:[%s7863_s26 + $0x8] sm:$0x1]  ;;  %s6502_s22 = sshll.u32 %s1277_s9, 7 }
 0x180   : > { %v8423_v19 = vadd.f32 %v3830_v31, %v3280_v37  ;;  %v5427_v37 = vunpack.c.l.b16 %v5360_v32  ;;  %v4841_v18 = vpack.c.b16 %v4839_v10, %v4839_v10  ;;  %v7386_v32 = vld [vmem:[%s7863_s26] sm:$0xff] }
 0x182   : > { %v2876_v25 = vpop.f32.mrf.mxu2 }
 0x183   : > { %v2931_v52 = vadd.f32 %v2876_v25, %v2468_v8  ;;  %v2416_v24 = vpop.f32.mrf.mxu1 }
 0x184   : > { %v2469_v12 = vadd.f32 %v2416_v24, %v8132_v4  ;;  %v4009_v4 = vunpack.c.l.b16 %v3942_v58 }
 0x185   : > { %v3226_v53 = vpop.f32.mrf.mxu3  ;;  %v3835_v56 = vpop.f32.mrf.mxu0 }
 0x186   : > { %v3281_v31 = vadd.f32 %v3226_v53, %v2931_v52  ;;  %6991 = vmatmul.msk.bf16.gmra.mxu1 %vm1702_vm1, %v4003_v43  ;;  %v4011_v57 = vpack.c.b16 %v4009_v4, %v4009_v4  ;;  %v5429_v52 = vpack.c.b16 %v5427_v37, %v5427_v37  ;;  %v4850_v53 = vshll.u32 %v4841_v18, 16  ;;  %v4757_v4 = vld [vmem:[%s7897_s29 + $0x8] sm:$0x1] }
 0x187   : > { %7072 = vmatmul.msk.bf16.gmra.mxu2 %vm1702_vm1, %v7385_v34  ;;  %v4843_v34 = vshrl.u32 %v7402_v0, 16  ;;  %v4012_v43 = vrot.slane %v6936_v16, 1  ;;  %v6939_v16 = vld [vmem:[%s7863_s26] sm:$0xe] }
 0x188   : > { %v8436_v42 = vadd.f32 %v3832_v6, %v3281_v31  ;;  %7234 = vmatmul.msk.bf16.gmra.mxu0 %vm1702_vm1, %v5421_v11  ;;  %v4013_v31 = vrot.slane %v4011_v57, 1  ;;  %v5431_v11 = vrot.slane %v5429_v52, 1  ;;  %v7371_v57 = vld [vmem:[%s7863_s26] sm:$0xf0]  ;;  %v4865_v52 = vshll.u32 %v7403_v60, 16 }
 0x18a   : > { %7153 = vmatmul.msk.bf16.gmra.mxu3 %vm1702_vm1, %v4833_v59  ;;  %v2879_v8 = vpop.f32.mrf.mxu2  ;;  %v4848_v59 = vor.u32 %v4847_v21, %v4843_v34  ;;  %v4014_v0 = vsel %vm2571_vm3, %v4012_v43, %v4013_v31  ;;  %v7182_v34 = vld [vmem:[%s7897_s29] sm:$0xe]  ;;  %v7419_v21 = vld [vmem:[%s7897_s29] sm:$0xf0] }
 0x18b   : > { %v2932_v39 = vadd.f32 %v2879_v8, %v2469_v12  ;;  %v2418_v50 = vpop.f32.mrf.mxu1  ;;  %v5430_v12 = vrot.slane %v7179_v44, 1 }
 0x18c   : > { %v2470_v25 = vadd.f32 %v2418_v50, %v8145_v33  ;;  %v4852_v33 = vrot.slane %v4850_v53, 1 }
 0x18d   : > { %v3229_v47 = vpop.f32.mrf.mxu3  ;;  %v3837_v28 = vpop.f32.mrf.mxu0  ;;  %v5432_v18 = vsel %vm2571_vm3, %v5430_v12, %v5431_v11  ;;  %v6940_v12 = vor.u32 %v7371_v57, %v6939_v16 }
 0x18e   : > { %v3282_v6 = vadd.f32 %v3229_v47, %v2932_v39  ;;  %v4853_v7 = vsel %vm1964_vm2, %v4848_v59, %v4852_v33  ;;  %v4859_v39 = vunpack.c.l.b16 %v4757_v4  ;;  %v5363_v47 = vld [vmem:[%s7897_s29 + $0x8] sm:$0x1]  ;;  %v7183_v33 = vor.u32 %v7419_v21, %v7182_v34  ;;  %v7404_v21 = vld [vmem:[%s7929_s20] sm:$0xff] }
 0x18f   : > { %v4867_v4 = vrot.slane %v4865_v52, 1  ;;  %v3948_v52 = vld [vmem:[%s7897_s29 + $0x8] sm:$0x1] }
 0x190   : > { %v8445_v24 = vadd.f32 %v3835_v56, %v3282_v6  ;;  %v5438_v6 = vunpack.c.l.b16 %v5363_v47  ;;  %v4861_v44 = vpack.c.b16 %v4859_v39, %v4859_v39  ;;  %v7387_v47 = vld [vmem:[%s7897_s29] sm:$0xff] }
 0x192   : > { %v2881_v58 = vpop.f32.mrf.mxu2 }
 0x193   : > { %v2933_v10 = vadd.f32 %v2881_v58, %v2470_v25  ;;  %v2421_v62 = vpop.f32.mrf.mxu1 }
 0x194   : > { %v2471_v37 = vadd.f32 %v2421_v62, %v8169_v61  ;;  %v4020_v61 = vunpack.c.l.b16 %v3945_v13 }
 0x195   : > { %v3231_v41 = vpop.f32.mrf.mxu3  ;;  %v3840_v8 = vpop.f32.mrf.mxu0 }
 0x196   : > { %v3283_v56 = vadd.f32 %v3231_v41, %v2933_v10  ;;  %6992 = vmatmul.msk.bf16.gmra.mxu1 %vm1702_vm1, %v4014_v0  ;;  %v4022_v11 = vpack.c.b16 %v4020_v61, %v4020_v61  ;;  %v5440_v10 = vpack.c.b16 %v5438_v6, %v5438_v6  ;;  %v4870_v41 = vshll.u32 %v4861_v44, 16  ;;  %v4760_v61 = vld [vmem:[%s7929_s20 + $0x8] sm:$0x1] }
 0x197   : > { %7073 = vmatmul.msk.bf16.gmra.mxu2 %vm1702_vm1, %v7386_v32  ;;  %v4863_v32 = vshrl.u32 %v7403_v60, 16  ;;  %v4023_v0 = vrot.slane %v6940_v12, 1  ;;  %v6943_v12 = vld [vmem:[%s7897_s29] sm:$0xe] }
 0x198   : > { %v8458_v50 = vadd.f32 %v3837_v28, %v3283_v56  ;;  %7235 = vmatmul.msk.bf16.gmra.mxu0 %vm1702_vm1, %v5432_v18  ;;  %v4024_v56 = vrot.slane %v4022_v11, 1  ;;  %v5442_v18 = vrot.slane %v5440_v10, 1  ;;  %v7372_v11 = vld [vmem:[%s7897_s29] sm:$0xf0]  ;;  %v4885_v10 = vshll.u32 %v7404_v21, 16 }
 0x19a   : > { %7154 = vmatmul.msk.bf16.gmra.mxu3 %vm1702_vm1, %v4853_v7  ;;  %v2884_v25 = vpop.f32.mrf.mxu2  ;;  %v4868_v7 = vor.u32 %v4867_v4, %v4863_v32  ;;  %v4025_v60 = vsel %vm2571_vm3, %v4023_v0, %v4024_v56  ;;  %v7186_v32 = vld [vmem:[%s7929_s20] sm:$0xe]  ;;  %v7420_v4 = vld [vmem:[%s7929_s20] sm:$0xf0] }
 0x19b   : > { %v2934_v53 = vadd.f32 %v2884_v25, %v2471_v37  ;;  %v2423_v31 = vpop.f32.mrf.mxu1  ;;  %v5441_v37 = vrot.slane %v7183_v33, 1 }
 0x19c   : > { %v2472_v58 = vadd.f32 %v2423_v31, %v8182_v27  ;;  %v4872_v27 = vrot.slane %v4870_v41, 1 }
 0x19d   : > { %v3234_v43 = vpop.f32.mrf.mxu3  ;;  %v3842_v59 = vpop.f32.mrf.mxu0  ;;  %v5443_v44 = vsel %vm2571_vm3, %v5441_v37, %v5442_v18  ;;  %v6944_v37 = vor.u32 %v7372_v11, %v6943_v12 }
 0x19e   : > { %v3284_v28 = vadd.f32 %v3234_v43, %v2934_v53  ;;  %v4873_v34 = vsel %vm1964_vm2, %v4868_v7, %v4872_v27  ;;  %v4879_v53 = vunpack.c.l.b16 %v4760_v61  ;;  %v5366_v43 = vld [vmem:[%s7929_s20 + $0x8] sm:$0x1]  ;;  %v7187_v27 = vor.u32 %v7420_v4, %v7186_v32  ;;  %v7405_v4 = vld [vmem:[%s7977_s13] sm:$0xff] }
 0x19f   : > { %v4887_v61 = vrot.slane %v4885_v10, 1  ;;  %v3951_v10 = vld [vmem:[%s7929_s20 + $0x8] sm:$0x1] }
 0x1a0   : > { %v8467_v62 = vadd.f32 %v3840_v8, %v3284_v28  ;;  %v5449_v28 = vunpack.c.l.b16 %v5366_v43  ;;  %v4881_v33 = vpack.c.b16 %v4879_v53, %v4879_v53  ;;  %v7388_v43 = vld [vmem:[%s7929_s20] sm:$0xff] }
 0x1a2   : > { %v2886_v13 = vpop.f32.mrf.mxu2 }
 0x1a3   : > { %v2935_v39 = vadd.f32 %v2886_v13, %v2472_v58  ;;  %v2426_v57 = vpop.f32.mrf.mxu1 }
 0x1a4   : > { %v2473_v6 = vadd.f32 %v2426_v57, %v8206_v63  ;;  %v4031_v63 = vunpack.c.l.b16 %v3948_v52 }
 0x1a5   : > { %v3236_v16 = vpop.f32.mrf.mxu3  ;;  %v3845_v25 = vpop.f32.mrf.mxu0 }
 0x1a6   : > { %v3285_v8 = vadd.f32 %v3236_v16, %v2935_v39  ;;  %6993 = vmatmul.msk.bf16.gmra.mxu1 %vm1702_vm1, %v4025_v60  ;;  %v4033_v18 = vpack.c.b16 %v4031_v63, %v4031_v63  ;;  %v5451_v39 = vpack.c.b16 %v5449_v28, %v5449_v28  ;;  %v4890_v16 = vshll.u32 %v4881_v33, 16  ;;  %v4763_v63 = vld [vmem:[%s7977_s13 + $0x8] sm:$0x1] }
 0x1a7   : > { %7074 = vmatmul.msk.bf16.gmra.mxu2 %vm1702_vm1, %v7387_v47  ;;  %v4883_v47 = vshrl.u32 %v7404_v21, 16  ;;  %v4034_v60 = vrot.slane %v6944_v37, 1  ;;  %v6947_v37 = vld [vmem:[%s7929_s20] sm:$0xe] }
 0x1a8   : > { %v8480_v31 = vadd.f32 %v3842_v59, %v3285_v8  ;;  %7236 = vmatmul.msk.bf16.gmra.mxu0 %vm1702_vm1, %v5443_v44  ;;  %v4035_v8 = vrot.slane %v4033_v18, 1  ;;  %v5453_v44 = vrot.slane %v5451_v39, 1  ;;  %v7373_v18 = vld [vmem:[%s7929_s20] sm:$0xf0]  ;;  %v4905_v39 = vshll.u32 %v7405_v4, 16  ;;  %s8889_s20 = sld [smem:[#allocation33_spill]] }
 0x1aa   : > { %7155 = vmatmul.msk.bf16.gmra.mxu3 %vm1702_vm1, %v4873_v34  ;;  %v2889_v58 = vpop.f32.mrf.mxu2  ;;  %v4888_v34 = vor.u32 %v4887_v61, %v4883_v47  ;;  %v4036_v21 = vsel %vm2571_vm3, %v4034_v60, %v4035_v8  ;;  %v7190_v47 = vld [vmem:[%s7977_s13] sm:$0xe]  ;;  %v7421_v61 = vld [vmem:[%s7977_s13] sm:$0xf0] }
 0x1ab   : > { %v2936_v41 = vadd.f32 %v2889_v58, %v2473_v6  ;;  %v2428_v56 = vpop.f32.mrf.mxu1  ;;  %v5452_v6 = vrot.slane %v7187_v27, 1 }
 0x1ac   : > { %v2474_v13 = vadd.f32 %v2428_v56, %v8221_v45  ;;  %v4892_v45 = vrot.slane %v4890_v16, 1 }
 0x1ad   : > { %v3239_v0 = vpop.f32.mrf.mxu3  ;;  %v3847_v7 = vpop.f32.mrf.mxu0  ;;  %v5454_v33 = vsel %vm2571_vm3, %v5452_v6, %v5453_v44  ;;  %v6948_v6 = vor.u32 %v7373_v18, %v6947_v37 }
 0x1ae   : > { %v3286_v59 = vadd.f32 %v3239_v0, %v2936_v41  ;;  %v4893_v32 = vsel %vm1964_vm2, %v4888_v34, %v4892_v45  ;;  %v4899_v41 = vunpack.c.l.b16 %v4763_v63  ;;  %v5369_v0 = vld [vmem:[%s7977_s13 + $0x8] sm:$0x1]  ;;  %v7191_v45 = vor.u32 %v7421_v61, %v7190_v47  ;;  %v7406_v61 = vld [vmem:[%s7868_s30] sm:$0xff] }
 0x1af   : > { %v4907_v63 = vrot.slane %v4905_v39, 1  ;;  %v3954_v39 = vld [vmem:[%s7977_s13 + $0x8] sm:$0x1] }
 0x1b0   : > { %v8489_v57 = vadd.f32 %v3845_v25, %v3286_v59  ;;  %v5460_v59 = vunpack.c.l.b16 %v5369_v0  ;;  %v4901_v27 = vpack.c.b16 %v4899_v41, %v4899_v41  ;;  %v7389_v0 = vld [vmem:[%s7977_s13] sm:$0xff] }
 0x1b2   : > { %v2891_v52 = vpop.f32.mrf.mxu2 }
 0x1b3   : > { %v2937_v53 = vadd.f32 %v2891_v52, %v2474_v13  ;;  %v2431_v11 = vpop.f32.mrf.mxu1 }
 0x1b4   : > { %v2475_v28 = vadd.f32 %v2431_v11, %v8098_v30  ;;  %v4042_v30 = vunpack.c.l.b16 %v3951_v10 }
 0x1b5   : > { %v3241_v12 = vpop.f32.mrf.mxu3  ;;  %v3850_v58 = vpop.f32.mrf.mxu0 }
 0x1b6   : > { %v3287_v25 = vadd.f32 %v3241_v12, %v2937_v53  ;;  %6994 = vmatmul.msk.bf16.gmra.mxu1 %vm1702_vm1, %v4036_v21  ;;  %v4044_v44 = vpack.c.b16 %v4042_v30, %v4042_v30  ;;  %v5462_v53 = vpack.c.b16 %v5460_v59, %v5460_v59  ;;  %v4910_v12 = vshll.u32 %v4901_v27, 16  ;;  %v4766_v30 = vld [vmem:[%s7868_s30 + $0x8] sm:$0x1] }
 0x1b7   : > { %7075 = vmatmul.msk.bf16.gmra.mxu2 %vm1702_vm1, %v7388_v43  ;;  %v4903_v43 = vshrl.u32 %v7405_v4, 16  ;;  %v4045_v21 = vrot.slane %v6948_v6, 1  ;;  %v6951_v6 = vld [vmem:[%s7977_s13] sm:$0xe] }
 0x1b8   : > { %v8502_v56 = vadd.f32 %v3847_v7, %v3287_v25  ;;  %7237 = vmatmul.msk.bf16.gmra.mxu0 %vm1702_vm1, %v5454_v33  ;;  %v4046_v25 = vrot.slane %v4044_v44, 1  ;;  %v5464_v33 = vrot.slane %v5462_v53, 1  ;;  %v7374_v44 = vld [vmem:[%s7977_s13] sm:$0xf0]  ;;  %v4925_v53 = vshll.u32 %v7406_v61, 16 }
 0x1ba   : > { %7156 = vmatmul.msk.bf16.gmra.mxu3 %vm1702_vm1, %v4893_v32  ;;  %v2894_v13 = vpop.f32.mrf.mxu2  ;;  %v4908_v32 = vor.u32 %v4907_v63, %v4903_v43  ;;  %v4047_v4 = vsel %vm2571_vm3, %v4045_v21, %v4046_v25  ;;  %v7194_v43 = vld [vmem:[%s7868_s30] sm:$0xe]  ;;  %v7422_v63 = vld [vmem:[%s7868_s30] sm:$0xf0] }
 0x1bb   : > { %v2938_v16 = vadd.f32 %v2894_v13, %v2475_v28  ;;  %v2433_v8 = vpop.f32.mrf.mxu1  ;;  %v5463_v28 = vrot.slane %v7191_v45, 1 }
 0x1bc   : > { %v2476_v52 = vadd.f32 %v2433_v8, %v8114_v51  ;;  %v4912_v51 = vrot.slane %v4910_v12, 1 }
 0x1bd   : > { %v3244_v60 = vpop.f32.mrf.mxu3  ;;  %v3852_v34 = vpop.f32.mrf.mxu0  ;;  %v5465_v27 = vsel %vm2571_vm3, %v5463_v28, %v5464_v33  ;;  %v6952_v28 = vor.u32 %v7374_v44, %v6951_v6 }
 0x1be   : > { %v3288_v7 = vadd.f32 %v3244_v60, %v2938_v16  ;;  %v4913_v47 = vsel %vm1964_vm2, %v4908_v32, %v4912_v51  ;;  %v4919_v16 = vunpack.c.l.b16 %v4766_v30  ;;  %v5372_v60 = vld [vmem:[%s7868_s30 + $0x8] sm:$0x1]  ;;  %v7195_v51 = vor.u32 %v7422_v63, %v7194_v43  ;;  %v7407_v63 = vld [vmem:[%s8884_s0] sm:$0xff] }
 0x1bf   : > { %v4927_v30 = vrot.slane %v4925_v53, 1  ;;  %v3957_v53 = vld [vmem:[%s7868_s30 + $0x8] sm:$0x1] }
 0x1c0   : > { %v8511_v11 = vadd.f32 %v3850_v58, %v3288_v7  ;;  %v5471_v7 = vunpack.c.l.b16 %v5372_v60  ;;  %v4921_v45 = vpack.c.b16 %v4919_v16, %v4919_v16  ;;  %v7390_v60 = vld [vmem:[%s7868_s30] sm:$0xff] }
 0x1c2   : > { %v2896_v10 = vpop.f32.mrf.mxu2 }
 0x1c3   : > { %v2939_v41 = vadd.f32 %v2896_v10, %v2476_v52  ;;  %v2436_v18 = vpop.f32.mrf.mxu1 }
 0x1c4   : > { %v2477_v59 = vadd.f32 %v2436_v18, %v8135_v15  ;;  %v4053_v15 = vunpack.c.l.b16 %v3954_v39 }
 0x1c5   : > { %v3246_v37 = vpop.f32.mrf.mxu3  ;;  %v3855_v13 = vpop.f32.mrf.mxu0 }
 0x1c6   : > { %v3289_v58 = vadd.f32 %v3246_v37, %v2939_v41  ;;  %6995 = vmatmul.msk.bf16.gmra.mxu1 %vm1702_vm1, %v4047_v4  ;;  %v4055_v33 = vpack.c.b16 %v4053_v15, %v4053_v15  ;;  %v5473_v41 = vpack.c.b16 %v5471_v7, %v5471_v7  ;;  %v4930_v37 = vshll.u32 %v4921_v45, 16  ;;  %v4769_v15 = vld [vmem:[%s8884_s0 + $0x8] sm:$0x1] }
 0x1c7   : > { %7076 = vmatmul.msk.bf16.gmra.mxu2 %vm1702_vm1, %v7389_v0  ;;  %v4923_v0 = vshrl.u32 %v7406_v61, 16  ;;  %v4056_v4 = vrot.slane %v6952_v28, 1  ;;  %v6955_v28 = vld [vmem:[%s7868_s30] sm:$0xe] }
 0x1c8   : > { %v8524_v8 = vadd.f32 %v3852_v34, %v3289_v58  ;;  %7238 = vmatmul.msk.bf16.gmra.mxu0 %vm1702_vm1, %v5465_v27  ;;  %v4057_v58 = vrot.slane %v4055_v33, 1  ;;  %v5475_v27 = vrot.slane %v5473_v41, 1  ;;  %v7375_v33 = vld [vmem:[%s7868_s30] sm:$0xf0]  ;;  %v4945_v41 = vshll.u32 %v7407_v63, 16  ;;  %s8620_s30 = scalar_lea.vmem [#allocation3], %s6502_s22 }
 0x1c9   : > { %s6022_s10 = sshll.u32 %s8620_s30, 4  ;;  %s6023_s10 = int_to_ptr.vmem [resolvable:$true] %s6022_s10 }
 0x1ca   : > { %7157 = vmatmul.msk.bf16.gmra.mxu3 %vm1702_vm1, %v4913_v47  ;;  %v2899_v52 = vpop.f32.mrf.mxu2  ;;  %v4928_v47 = vor.u32 %v4927_v30, %v4923_v0  ;;  %v4058_v61 = vsel %vm2571_vm3, %v4056_v4, %v4057_v58  ;;  %v7198_v0 = vld [vmem:[%s8884_s0] sm:$0xe]  ;;  %v7423_v30 = vld [vmem:[%s8884_s0] sm:$0xf0] }
 0x1cb   : > { %v2940_v12 = vadd.f32 %v2899_v52, %v2477_v59  ;;  %v2438_v25 = vpop.f32.mrf.mxu1  ;;  %v5474_v59 = vrot.slane %v7195_v51, 1 }
 0x1cc   : > { %v2478_v10 = vadd.f32 %v2438_v25, %v8151_v40  ;;  %v4932_v40 = vrot.slane %v4930_v37, 1 }
 0x1cd   : > { %v3249_v21 = vpop.f32.mrf.mxu3  ;;  %v3857_v32 = vpop.f32.mrf.mxu0  ;;  %v5476_v45 = vsel %vm2571_vm3, %v5474_v59, %v5475_v27  ;;  %v6956_v59 = vor.u32 %v7375_v33, %v6955_v28 }
 0x1ce   : > { %v3290_v34 = vadd.f32 %v3249_v21, %v2940_v12  ;;  %v4933_v43 = vsel %vm1964_vm2, %v4928_v47, %v4932_v40  ;;  %v4939_v12 = vunpack.c.l.b16 %v4769_v15  ;;  %v5375_v21 = vld [vmem:[%s8884_s0 + $0x8] sm:$0x1]  ;;  %v7199_v40 = vor.u32 %v7423_v30, %v7198_v0  ;;  %v7408_v30 = vld [vmem:[%s7934_s28] sm:$0xff] }
 0x1cf   : > { %v4947_v15 = vrot.slane %v4945_v41, 1  ;;  %v3960_v41 = vld [vmem:[%s8884_s0 + $0x8] sm:$0x1] }
 0x1d0   : > { %v8533_v18 = vadd.f32 %v3855_v13, %v3290_v34  ;;  %v5482_v34 = vunpack.c.l.b16 %v5375_v21  ;;  %v4941_v51 = vpack.c.b16 %v4939_v12, %v4939_v12  ;;  %v7391_v21 = vld [vmem:[%s8884_s0] sm:$0xff] }
 0x1d2   : > { %v2901_v39 = vpop.f32.mrf.mxu2 }
 0x1d3   : > { %v2941_v16 = vadd.f32 %v2901_v39, %v2478_v10  ;;  %v2441_v44 = vpop.f32.mrf.mxu1 }
 0x1d4   : > { %v2479_v7 = vadd.f32 %v2441_v44, %v8172_v9  ;;  %v4064_v9 = vunpack.c.l.b16 %v3957_v53 }
 0x1d5   : > { %v3251_v6 = vpop.f32.mrf.mxu3  ;;  %v3860_v52 = vpop.f32.mrf.mxu0 }
 0x1d6   : > { %v3291_v13 = vadd.f32 %v3251_v6, %v2941_v16  ;;  %6996 = vmatmul.msk.bf16.gmra.mxu1 %vm1702_vm1, %v4058_v61  ;;  %v4066_v27 = vpack.c.b16 %v4064_v9, %v4064_v9  ;;  %v5484_v16 = vpack.c.b16 %v5482_v34, %v5482_v34  ;;  %v4950_v6 = vshll.u32 %v4941_v51, 16  ;;  %v4772_v9 = vld [vmem:[%s7934_s28 + $0x8] sm:$0x1] }
 0x1d7   : > { %7077 = vmatmul.msk.bf16.gmra.mxu2 %vm1702_vm1, %v7390_v60  ;;  %v4943_v60 = vshrl.u32 %v7407_v63, 16  ;;  %v4067_v61 = vrot.slane %v6956_v59, 1  ;;  %v6959_v59 = vld [vmem:[%s8884_s0] sm:$0xe] }
 0x1d8   : > { %v8546_v25 = vadd.f32 %v3857_v32, %v3291_v13  ;;  %7239 = vmatmul.msk.bf16.gmra.mxu0 %vm1702_vm1, %v5476_v45  ;;  %v4068_v13 = vrot.slane %v4066_v27, 1  ;;  %v5486_v45 = vrot.slane %v5484_v16, 1  ;;  %v7376_v27 = vld [vmem:[%s8884_s0] sm:$0xf0]  ;;  %v4965_v16 = vshll.u32 %v7408_v30, 16  ;;  %s6007_s0 = scalar_lea.sflag [#allocation4], %s1277_s9 }
 0x1da   : > { %7158 = vmatmul.msk.bf16.gmra.mxu3 %vm1702_vm1, %v4933_v43  ;;  %v2904_v10 = vpop.f32.mrf.mxu2  ;;  %v4948_v43 = vor.u32 %v4947_v15, %v4943_v60  ;;  %v4069_v63 = vsel %vm2571_vm3, %v4067_v61, %v4068_v13  ;;  %v7202_v60 = vld [vmem:[%s7934_s28] sm:$0xe]  ;;  %v7424_v15 = vld [vmem:[%s7934_s28] sm:$0xf0] }
 0x1db   : > { %v2942_v37 = vadd.f32 %v2904_v10, %v2479_v7  ;;  %v2443_v58 = vpop.f32.mrf.mxu1  ;;  %v5485_v7 = vrot.slane %v7199_v40, 1 }
 0x1dc   : > { %v2480_v39 = vadd.f32 %v2443_v58, %v8188_v38  ;;  %v4952_v38 = vrot.slane %v4950_v6, 1 }
 0x1dd   : > { %v3254_v4 = vpop.f32.mrf.mxu3  ;;  %v3862_v47 = vpop.f32.mrf.mxu0  ;;  %v5487_v51 = vsel %vm2571_vm3, %v5485_v7, %v5486_v45  ;;  %v6960_v7 = vor.u32 %v7376_v27, %v6959_v59 }
 0x1de   : > { %v3292_v32 = vadd.f32 %v3254_v4, %v2942_v37  ;;  %v4953_v0 = vsel %vm1964_vm2, %v4948_v43, %v4952_v38  ;;  %v4959_v37 = vunpack.c.l.b16 %v4772_v9  ;;  %v5378_v4 = vld [vmem:[%s7934_s28 + $0x8] sm:$0x1]  ;;  %v7203_v38 = vor.u32 %v7424_v15, %v7202_v60  ;;  %v7409_v60 = vld [vmem:[%s7982_s17] sm:$0xff] }
 0x1df   : > { %v4967_v9 = vrot.slane %v4965_v16, 1 }
 0x1e0   : > { %v8555_v44 = vadd.f32 %v3860_v52, %v3292_v32  ;;  %v5493_v32 = vunpack.c.l.b16 %v5378_v4  ;;  %v4961_v40 = vpack.c.b16 %v4959_v37, %v4959_v37  ;;  %v7392_v4 = vld [vmem:[%s7934_s28] sm:$0xff] }
 0x1e2   : > { %v2906_v53 = vpop.f32.mrf.mxu2 }
 0x1e3   : > { %v2943_v12 = vadd.f32 %v2906_v53, %v2480_v39  ;;  %v2446_v33 = vpop.f32.mrf.mxu1 }
 0x1e4   : > { %v2481_v34 = vadd.f32 %v2446_v33, %v8209_v14  ;;  %v4075_v14 = vunpack.c.l.b16 %v3960_v41 }
 0x1e5   : > { %v3256_v28 = vpop.f32.mrf.mxu3  ;;  %v3865_v10 = vpop.f32.mrf.mxu0 }
 0x1e6   : > { %v3293_v52 = vadd.f32 %v3256_v28, %v2943_v12  ;;  %6997 = vmatmul.msk.bf16.gmra.mxu1 %vm1702_vm1, %v4069_v63  ;;  %v4077_v45 = vpack.c.b16 %v4075_v14, %v4075_v14  ;;  %v5495_v12 = vpack.c.b16 %v5493_v32, %v5493_v32  ;;  %v4970_v28 = vshll.u32 %v4961_v40, 16  ;;  %v4775_v14 = vld [vmem:[%s7982_s17 + $0x8] sm:$0x1] }
 0x1e7   : > { %7078 = vmatmul.msk.bf16.gmra.mxu2 %vm1702_vm1, %v7391_v21  ;;  %v4963_v21 = vshrl.u32 %v7408_v30, 16  ;;  %v4078_v63 = vrot.slane %v6960_v7, 1  ;;  %v3963_v40 = vld [vmem:[%s7934_s28 + $0x8] sm:$0x1]  ;;  %v4979_v15 = vunpack.c.l.b16 %v4775_v14 }
 0x1e8   : > { %v8568_v58 = vadd.f32 %v3862_v47, %v3293_v52  ;;  %7240 = vmatmul.msk.bf16.gmra.mxu0 %vm1702_vm1, %v5487_v51  ;;  %v4079_v52 = vrot.slane %v4077_v45, 1  ;;  %v5497_v51 = vrot.slane %v5495_v12, 1  ;;  %v6963_v45 = vld [vmem:[%s7934_s28] sm:$0xe] }
 0x1e9   : > { %v4981_v12 = vpack.c.b16 %v4979_v15, %v4979_v15 }
 0x1ea   : > { %7159 = vmatmul.msk.bf16.gmra.mxu3 %vm1702_vm1, %v4953_v0  ;;  %v2909_v39 = vpop.f32.mrf.mxu2  ;;  %v4968_v0 = vor.u32 %v4967_v9, %v4963_v21  ;;  %v4080_v30 = vsel %vm2571_vm3, %v4078_v63, %v4079_v52  ;;  %v4985_v21 = vshll.u32 %v7409_v60, 16  ;;  %v7206_v9 = vld [vmem:[%s7982_s17] sm:$0xe] }
 0x1eb   : > { %v2944_v6 = vadd.f32 %v2909_v39, %v2481_v34  ;;  %v2448_v13 = vpop.f32.mrf.mxu1  ;;  %v5496_v34 = vrot.slane %v7203_v38, 1 }
 0x1ec   : > { %v2482_v53 = vadd.f32 %v2448_v13, %v8227_v55  ;;  %v4972_v55 = vrot.slane %v4970_v28, 1  ;;  %v4086_v13 = vunpack.c.l.b16 %v3963_v40  ;;  %v7425_v28 = vld [vmem:[%s7982_s17] sm:$0xf0] }
 0x1ed   : > { %v3259_v61 = vpop.f32.mrf.mxu3  ;;  %v3867_v43 = vpop.f32.mrf.mxu0  ;;  %v5498_v39 = vsel %vm2571_vm3, %v5496_v34, %v5497_v51 }
 0x1ee   : > { %v3294_v47 = vadd.f32 %v3259_v61, %v2944_v6  ;;  %v4973_v16 = vsel %vm1964_vm2, %v4968_v0, %v4972_v55  ;;  %v5381_v6 = vld [vmem:[%s7982_s17 + $0x8] sm:$0x1]  ;;  %v4088_v51 = vpack.c.b16 %v4086_v13, %v4086_v13  ;;  %v7207_v0 = vor.u32 %v7425_v28, %v7206_v9  ;;  %v7410_v28 = vld [vmem:[%s8885_s25] sm:$0xff] }
 0x1f0   : > { %v8577_v33 = vadd.f32 %v3865_v10, %v3294_v47  ;;  %v7377_v47 = vld [vmem:[%s7934_s28] sm:$0xf0] }
 0x1f2   : > { %v2911_v41 = vpop.f32.mrf.mxu2 }
 0x1f3   : > { %v2945_v37 = vadd.f32 %v2911_v41, %v2482_v53  ;;  %v4252_v27 = vpop.f32.mrf.mxu1  ;;  %v5504_v53 = vunpack.c.l.b16 %v5381_v6 }
 0x1f4   : > { %v4332_v7 = vadd.f32 %v4252_v27, %v8241_v54  ;;  %v4983_v54 = vshrl.u32 %v7409_v60, 16  ;;  %v4090_v27 = vrot.slane %v4088_v51, 1  ;;  %v4778_v60 = vld [vmem:[%s8885_s25 + $0x8] sm:$0x1] }
 0x1f5   : > { %v3261_v59 = vpop.f32.mrf.mxu3  ;;  %v5670_v32 = vpop.f32.mrf.mxu0  ;;  %v5506_v55 = vpack.c.b16 %v5504_v53, %v5504_v53 }
 0x1f6   : > { %v3295_v10 = vadd.f32 %v3261_v59, %v2945_v37  ;;  %6998 = vmatmul.msk.bf16.gmra.mxu1 %vm1702_vm1, %v4080_v30  ;;  %v4987_v37 = vrot.slane %v4985_v21, 1  ;;  %v3966_v21 = vld [vmem:[%s7982_s17 + $0x8] sm:$0x1] }
 0x1f7   : > { %7079 = vmatmul.msk.bf16.gmra.mxu2 %vm1702_vm1, %v7392_v4  ;;  %v4990_v4 = vshll.u32 %v4981_v12, 16  ;;  %v4097_v51 = vunpack.c.l.b16 %v3966_v21 }
 0x1f8   : > { %v8589_v61 = vadd.f32 %v3867_v43, %v3295_v10  ;;  %7241 = vmatmul.msk.bf16.gmra.mxu0 %vm1702_vm1, %v5498_v39  ;;  %v6964_v43 = vor.u32 %v7377_v47, %v6963_v45  ;;  %v5507_v10 = vrot.slane %v7207_v0, 1  ;;  %v5508_v39 = vrot.slane %v5506_v55, 1 }
 0x1f9   : > { %v4992_v15 = vrot.slane %v4990_v4, 1 }
 0x1fa   : > { %7160 = vmatmul.msk.bf16.gmra.mxu3 %vm1702_vm1, %v4973_v16  ;;  %v4602_v38 = vpop.f32.mrf.mxu2  ;;  %v4089_v59 = vrot.slane %v6964_v43, 1  ;;  %v4988_v16 = vor.u32 %v4987_v37, %v4983_v54  ;;  %v5509_v12 = vsel %vm2571_vm3, %v5507_v10, %v5508_v39  ;;  %v6967_v43 = vld [vmem:[%s7982_s17] sm:$0xe] }
 0x1fb   : > { %v4682_v63 = vadd.f32 %v4602_v38, %v4332_v7  ;;  %v4254_v34 = vpop.f32.mrf.mxu1  ;;  %v7393_v7 = vld [vmem:[%s7982_s17] sm:$0xff] }
 0x1fc   : > { %v4333_v30 = vadd.f32 %v4254_v34, %v8256_v35  ;;  %v4091_v53 = vsel %vm2571_vm3, %v4089_v59, %v4090_v27  ;;  %v4993_v9 = vsel %vm1964_vm2, %v4988_v16, %v4992_v15  ;;  %v7210_v59 = vld [vmem:[%s8885_s25] sm:$0xe]  ;;  %v7426_v27 = vld [vmem:[%s8885_s25] sm:$0xf0] }
 0x1fd   : > { %v5208_v52 = vpop.f32.mrf.mxu3  ;;  %v5672_v41 = vpop.f32.mrf.mxu0 }
 0x1fe   : > { %v5288_v14 = vadd.f32 %v5208_v52, %v4682_v63  ;;  %v5384_v63 = vld [vmem:[%s8885_s25 + $0x8] sm:$0x1] }
 0x1ff   : > { %v5515_v54 = vunpack.c.l.b16 %v5384_v63 }
 0x200   : > { %v5750_v6 = vadd.f32 %v5670_v32, %v5288_v14  ;;  %v4999_v32 = vunpack.c.l.b16 %v4778_v60  ;;  %v5005_v14 = vshll.u32 %v7410_v28, 16 }
 0x202   : > { %v4604_v40 = vpop.f32.mrf.mxu2  ;;  %v5878_v52 = vmul.f32 0.1, %v5750_v6  ;;  %vm5846_vm4 = vcmp.ge.f32.partialorder %v5750_v6, 0.0  ;;  %v5001_v4 = vpack.c.b16 %v4999_v32, %v4999_v32 }
 0x203   : > { %v4683_v13 = vadd.f32 %v4604_v40, %v4333_v30  ;;  %v4257_v47 = vpop.f32.mrf.mxu1 }
 0x204   : > { %v4334_v55 = vadd.f32 %v4257_v47, %v8264_v22  ;;  %v5910_v30 = vsel %vm5846_vm4, %v5750_v6, %v5878_v52  ;;  %v7211_v22 = vor.u32 %v7426_v27, %v7210_v59  ;;  %v5003_v47 = vshrl.u32 %v7410_v28, 16  ;;  %v3969_v59 = vld [vmem:[%s8885_s25 + $0x8] sm:$0x1] }
 0x205   : > { %v5210_v45 = vpop.f32.mrf.mxu3  ;;  %v5675_v38 = vpop.f32.mrf.mxu0 }
 0x206   : > { %v5289_v35 = vadd.f32 %v5210_v45, %v4683_v13  ;;  %6999 = vmatmul.msk.bf16.gmra.mxu1 %vm1702_vm1, %v4091_v53  ;;  %v5517_v45 = vpack.c.b16 %v5515_v54, %v5515_v54  ;;  %v5007_v53 = vrot.slane %v5005_v14, 1  ;;  %v5518_v32 = vrot.slane %v7211_v22, 1  ;;  %v7379_v22 = vld [vmem:[%s8885_s25] sm:$0xf0] }
 0x207   : > { %7080 = vmatmul.msk.bf16.gmra.mxu2 %vm1702_vm1, %v7393_v7  ;;  %v4099_v7 = vpack.c.b16 %v4097_v51, %v4097_v51 }
 0x208   : > { %v5751_v34 = vadd.f32 %v5672_v41, %v5289_v35  ;;  %7242 = vmatmul.msk.bf16.gmra.mxu0 %vm1702_vm1, %v5509_v12  ;;  %v7378_v41 = vld [vmem:[%s7982_s17] sm:$0xf0]  ;;  %v5010_v35 = vshll.u32 %v5001_v4, 16  ;;  %v5519_v63 = vrot.slane %v5517_v45, 1 }
 0x209   : > { %v6968_v13 = vor.u32 %v7378_v41, %v6967_v43  ;;  %v4101_v21 = vrot.slane %v4099_v7, 1  ;;  %v4781_v41 = vld [vmem:[%s8886_s4 + $0x8] sm:$0x1] }
 0x20a   : > { %vm5847_vm5 = vcmp.ge.f32.partialorder %v5751_v34, 0.0  ;;  %v5879_v0 = vmul.f32 0.1, %v5751_v34  ;;  %7161 = vmatmul.msk.bf16.gmra.mxu3 %vm1702_vm1, %v4993_v9  ;;  %v4607_v37 = vpop.f32.mrf.mxu2  ;;  %v5012_v43 = vrot.slane %v5010_v35, 1  ;;  %v7214_v35 = vld [vmem:[%s8886_s4] sm:$0xe] }
 0x20b   : > { %v4684_v39 = vadd.f32 %v4607_v37, %v4334_v55  ;;  %v4259_v15 = vpop.f32.mrf.mxu1  ;;  %v4100_v12 = vrot.slane %v6968_v13, 1  ;;  %v7394_v55 = vld [vmem:[%s8885_s25] sm:$0xff] }
 0x20c   : > { %v5911_v10 = vsel %vm5847_vm5, %v5751_v34, %v5879_v0  ;;  %v4335_v9 = vadd.f32 %v4259_v15, %v8279_v2  ;;  %v5008_v34 = vor.u32 %v5007_v53, %v5003_v47  ;;  %v5520_v2 = vsel %vm2571_vm3, %v5518_v32, %v5519_v63 }
 0x20d   : > { %v7436_v40 = vpack.c.bf16 %v5911_v10, %v5910_v30  ;;  %v5213_v16 = vpop.f32.mrf.mxu3  ;;  %v5677_v60 = vpop.f32.mrf.mxu0  ;;  %v4102_v37 = vsel %vm2571_vm3, %v4100_v12, %v4101_v21  ;;  %v7411_v30 = vld [vmem:[%s8886_s4] sm:$0xff]  ;;  %v5019_v10 = vunpack.c.l.b16 %v4781_v41  ;;  %v4108_v15 = vunpack.c.l.b16 %v3969_v59 }
 0x20e   : > { %v5290_v6 = vadd.f32 %v5213_v16, %v4684_v39  ;;  %v5013_v27 = vsel %vm1964_vm2, %v5008_v34, %v5012_v43  ;;  %v5387_v39 = vld [vmem:[%s8886_s4 + $0x8] sm:$0x1]  ;;  %v6971_v16 = vld [vmem:[%s8885_s25] sm:$0xe]  ;;  %v5025_v53 = vshll.u32 %v7411_v30, 16  ;;  %v5023_v41 = vshrl.u32 %v7411_v30, 16 }
 0x20f   : > { %7437 = vst [vmem:[%s8620_s30] sm:$0xff] %v7436_v40   ;;  %v5526_v45 = vunpack.c.l.b16 %v5387_v39  ;;  %v5021_v47 = vpack.c.b16 %v5019_v10, %v5019_v10  ;;  %v6972_v34 = vor.u32 %v7379_v22, %v6971_v16  ;;  %v4110_v43 = vpack.c.b16 %v4108_v15, %v4108_v15  ;;  %v7395_v15 = vld [vmem:[%s8886_s4] sm:$0xff] }
 0x210   : > { %v5752_v51 = vadd.f32 %v5675_v38, %v5290_v6  ;;  %v7427_v6 = vld [vmem:[%s8886_s4] sm:$0xf0] }
 0x212   : > { %v4609_v52 = vpop.f32.mrf.mxu2  ;;  %v5880_v38 = vmul.f32 0.1, %v5752_v51  ;;  %vm5848_vm6 = vcmp.ge.f32.partialorder %v5752_v51, 0.0 }
 0x213   : > { %v4685_v0 = vadd.f32 %v4609_v52, %v4335_v9  ;;  %v4262_v54 = vpop.f32.mrf.mxu1 }
 0x214   : > { %v4336_v7 = vadd.f32 %v4262_v54, %v8287_v46  ;;  %v5912_v12 = vsel %vm5848_vm6, %v5752_v51, %v5880_v38  ;;  %v7215_v46 = vor.u32 %v7427_v6, %v7214_v35  ;;  %v5030_v54 = vshll.u32 %v5021_v47, 16  ;;  %v3972_v47 = vld [vmem:[%s8886_s4 + $0x8] sm:$0x1]  ;;  %v7412_v35 = vld [vmem:[%s7944_s8] sm:$0xff] }
 0x215   : > { %v5215_v28 = vpop.f32.mrf.mxu3  ;;  %v5680_v14 = vpop.f32.mrf.mxu0 }
 0x216   : > { %v5291_v4 = vadd.f32 %v5215_v28, %v4685_v0  ;;  %7000 = vmatmul.msk.bf16.gmra.mxu1 %vm1702_vm1, %v4102_v37  ;;  %v5027_v28 = vrot.slane %v5025_v53, 1  ;;  %v5529_v59 = vrot.slane %v7215_v46, 1  ;;  %v5032_v38 = vrot.slane %v5030_v54, 1 }
 0x217   : > { %7081 = vmatmul.msk.bf16.gmra.mxu2 %vm1702_vm1, %v7394_v55  ;;  %v5528_v55 = vpack.c.b16 %v5526_v45, %v5526_v45 }
 0x218   : > { %v5753_v40 = vadd.f32 %v5677_v60, %v5291_v4  ;;  %7243 = vmatmul.msk.bf16.gmra.mxu0 %vm1702_vm1, %v5520_v2  ;;  %v4111_v4 = vrot.slane %v6972_v34, 1  ;;  %v4112_v2 = vrot.slane %v4110_v43, 1  ;;  %v5028_v39 = vor.u32 %v5027_v28, %v5023_v41  ;;  %v7380_v34 = vld [vmem:[%s8886_s4] sm:$0xf0]  ;;  %v7218_v41 = vld [vmem:[%s7944_s8] sm:$0xe] }
 0x219   : > { %v7428_v28 = vld [vmem:[%s7944_s8] sm:$0xf0] }
 0x21a   : > { %vm5849_vm7 = vcmp.ge.f32.partialorder %v5753_v40, 0.0  ;;  %v5881_v13 = vmul.f32 0.1, %v5753_v40  ;;  %7162 = vmatmul.msk.bf16.gmra.mxu3 %vm1702_vm1, %v5013_v27  ;;  %v4612_v60 = vpop.f32.mrf.mxu2  ;;  %v5530_v27 = vrot.slane %v5528_v55, 1  ;;  %v4113_v22 = vsel %vm2571_vm3, %v4111_v4, %v4112_v2 }
 0x21b   : > { %v4686_v9 = vadd.f32 %v4612_v60, %v4336_v7  ;;  %v4264_v52 = vpop.f32.mrf.mxu1  ;;  %v5033_v53 = vsel %vm1964_vm2, %v5028_v39, %v5032_v38  ;;  %v5045_v55 = vshll.u32 %v7412_v35, 16 }
 0x21c   : > { %v5913_v21 = vsel %vm5849_vm7, %v5753_v40, %v5881_v13  ;;  %v4337_v51 = vadd.f32 %v4264_v52, %v8302_v36  ;;  %v4784_v13 = vld [vmem:[%s7944_s8 + $0x8] sm:$0x1]  ;;  %v5531_v36 = vsel %vm2571_vm3, %v5529_v59, %v5530_v27 }
 0x21d   : > { %v7441_v32 = vpack.c.bf16 %v5913_v21, %v5912_v12  ;;  %v5218_v63 = vpop.f32.mrf.mxu3  ;;  %v5682_v0 = vpop.f32.mrf.mxu0  ;;  %v5039_v6 = vunpack.c.l.b16 %v4784_v13  ;;  %v5390_v12 = vld [vmem:[%s7944_s8 + $0x8] sm:$0x1] }
 0x21e   : > { %v5292_v37 = vadd.f32 %v5218_v63, %v4686_v9  ;;  %v6975_v9 = vld [vmem:[%s8886_s4] sm:$0xe]  ;;  %v5537_v43 = vunpack.c.l.b16 %v5390_v12 }
 0x21f   : > { %7513 = vst [vmem:[%s8620_s30 + $0x8] sm:$0xff] %v7441_v32   ;;  %v4119_v32 = vunpack.c.l.b16 %v3972_v47  ;;  %v5041_v46 = vpack.c.b16 %v5039_v6, %v5039_v6  ;;  %v6976_v27 = vor.u32 %v7380_v34, %v6975_v9  ;;  %v4787_v9 = vld [vmem:[%s7993_s27 + $0x8] sm:$0x1] }
 0x220   : > { %v5754_v40 = vadd.f32 %v5680_v14, %v5292_v37  ;;  %v5539_v38 = vpack.c.b16 %v5537_v43, %v5537_v43  ;;  %v3975_v43 = vld [vmem:[%s7944_s8 + $0x8] sm:$0x1] }
 0x221   : > { %v5050_v13 = vshll.u32 %v5041_v46, 16  ;;  %v7413_v46 = vld [vmem:[%s7993_s27] sm:$0xff] }
 0x222   : > { %v4614_v10 = vpop.f32.mrf.mxu2  ;;  %v5882_v14 = vmul.f32 0.1, %v5754_v40  ;;  %vm5850_vm8 = vcmp.ge.f32.partialorder %v5754_v40, 0.0 }
 0x223   : > { %v4687_v16 = vadd.f32 %v4614_v10, %v4337_v51  ;;  %v4267_v7 = vpop.f32.mrf.mxu1  ;;  %v4121_v10 = vpack.c.b16 %v4119_v32, %v4119_v32  ;;  %v5052_v6 = vrot.slane %v5050_v13, 1 }
 0x224   : > { %v4338_v52 = vadd.f32 %v4267_v7, %v8310_v5  ;;  %v5914_v54 = vsel %vm5850_vm8, %v5754_v40, %v5882_v14  ;;  %v7219_v5 = vor.u32 %v7428_v28, %v7218_v41  ;;  %v4122_v7 = vrot.slane %v6976_v27, 1  ;;  %v5393_v41 = vld [vmem:[%s7993_s27 + $0x8] sm:$0x1] }
 0x225   : > { %v5220_v30 = vpop.f32.mrf.mxu3  ;;  %v5685_v60 = vpop.f32.mrf.mxu0 }
 0x226   : > { %v5293_v45 = vadd.f32 %v5220_v30, %v4687_v16  ;;  %7001 = vmatmul.msk.bf16.gmra.mxu1 %vm1702_vm1, %v4113_v22  ;;  %v5043_v16 = vshrl.u32 %v7412_v35, 16  ;;  %v4123_v22 = vrot.slane %v4121_v10, 1 }
 0x227   : > { %7082 = vmatmul.msk.bf16.gmra.mxu2 %vm1702_vm1, %v7395_v15  ;;  %v5047_v15 = vrot.slane %v5045_v55, 1  ;;  %v5059_v55 = vunpack.c.l.b16 %v4787_v9 }
 0x228   : > { %v5755_v21 = vadd.f32 %v5682_v0, %v5293_v45  ;;  %7244 = vmatmul.msk.bf16.gmra.mxu0 %vm1702_vm1, %v5531_v36  ;;  %v5540_v45 = vrot.slane %v7219_v5, 1  ;;  %v5541_v36 = vrot.slane %v5539_v38, 1  ;;  %v7222_v5 = vld [vmem:[%s7993_s27] sm:$0xe]  ;;  %v7429_v38 = vld [vmem:[%s7993_s27] sm:$0xf0] }
 0x229   : > { %v5061_v10 = vpack.c.b16 %v5059_v55, %v5059_v55 }
 0x22a   : > { %vm5851_vm9 = vcmp.ge.f32.partialorder %v5755_v21, 0.0  ;;  %v5883_v63 = vmul.f32 0.1, %v5755_v21  ;;  %7163 = vmatmul.msk.bf16.gmra.mxu3 %vm1702_vm1, %v5033_v53  ;;  %v4617_v0 = vpop.f32.mrf.mxu2  ;;  %v5048_v53 = vor.u32 %v5047_v15, %v5043_v16 }
 0x22b   : > { %v4688_v4 = vadd.f32 %v4617_v0, %v4338_v52  ;;  %v4269_v59 = vpop.f32.mrf.mxu1 }
 0x22c   : > { %v5915_v37 = vsel %vm5851_vm9, %v5755_v21, %v5883_v63  ;;  %v4339_v40 = vadd.f32 %v4269_v59, %v8324_v1  ;;  %v7396_v21 = vld [vmem:[%s7944_s8] sm:$0xff]  ;;  %v4124_v63 = vsel %vm2571_vm3, %v4122_v7, %v4123_v22  ;;  %v5542_v1 = vsel %vm2571_vm3, %v5540_v45, %v5541_v36 }
 0x22d   : > { %v7446_v2 = vpack.c.bf16 %v5915_v37, %v5914_v54  ;;  %v5223_v51 = vpop.f32.mrf.mxu3  ;;  %v5687_v39 = vpop.f32.mrf.mxu0  ;;  %v5053_v0 = vsel %vm1964_vm2, %v5048_v53, %v5052_v6  ;;  %v6979_v54 = vld [vmem:[%s7944_s8] sm:$0xe]  ;;  %v4130_v37 = vunpack.c.l.b16 %v3975_v43  ;;  %v5548_v59 = vunpack.c.l.b16 %v5393_v41 }
 0x22e   : > { %v5294_v30 = vadd.f32 %v5223_v51, %v4688_v4  ;;  %v7381_v51 = vld [vmem:[%s7944_s8] sm:$0xf0]  ;;  %v5063_v53 = vshrl.u32 %v7413_v46, 16  ;;  %s7287_s8 = sadd.s32 204, %s7855_s2  ;;  %s8890_s2 = sld [smem:[#allocation9_spill]] }
 0x22f   : > { %7514 = vst [vmem:[%s8620_s30 + $0x10] sm:$0xff] %v7446_v2   ;;  %v4132_v45 = vpack.c.b16 %v4130_v37, %v4130_v37  ;;  %v7397_v41 = vld [vmem:[%s7993_s27] sm:$0xff]  ;;  %s8703_s28 = scalar_lea.vmem %s8889_s20, %s7287_s8 }
 0x230   : > { %v5756_v12 = vadd.f32 %v5685_v60, %v5294_v30 }
 0x232   : > { %v4619_v47 = vpop.f32.mrf.mxu2  ;;  %v5884_v60 = vmul.f32 0.1, %v5756_v12  ;;  %vm5852_vm10 = vcmp.ge.f32.partialorder %v5756_v12, 0.0 }
 0x233   : > { %v4689_v14 = vadd.f32 %v4619_v47, %v4339_v40  ;;  %v4272_v32 = vpop.f32.mrf.mxu1  ;;  %v6980_v40 = vor.u32 %v7381_v51, %v6979_v54  ;;  %v5550_v47 = vpack.c.b16 %v5548_v59, %v5548_v59  ;;  %v7414_v59 = vld [vmem:[%s8356_s12] sm:$0xff] }
 0x234   : > { %v4340_v2 = vadd.f32 %v4272_v32, %v8331_v26  ;;  %v5916_v16 = vsel %vm5852_vm10, %v5756_v12, %v5884_v60  ;;  %v7223_v26 = vor.u32 %v7429_v38, %v7222_v5  ;;  %v4790_v60 = vld [vmem:[%s8356_s12 + $0x8] sm:$0x1]  ;;  %v6983_v5 = vld [vmem:[%s7993_s27] sm:$0xe]  ;;  %s7432_s13 = sshll.u32 %s8890_s2, 7 }
 0x235   : > { %v5225_v35 = vpop.f32.mrf.mxu3  ;;  %v5690_v34 = vpop.f32.mrf.mxu0  ;;  %v4133_v9 = vrot.slane %v6980_v40, 1  ;;  %v5085_v40 = vshll.u32 %v7414_v59, 16  ;;  %s6021_s3 = scalar_lea.hbm %s8891_s16, %s7432_s13 }
 0x236   : > { %v5295_v52 = vadd.f32 %v5225_v35, %v4689_v14  ;;  %7002 = vmatmul.msk.bf16.gmra.mxu1 %vm1702_vm1, %v4124_v63  ;;  %v5070_v14 = vshll.u32 %v5061_v10, 16  ;;  %v4134_v35 = vrot.slane %v4132_v45, 1  ;;  %v5551_v32 = vrot.slane %v7223_v26, 1  ;;  %v5396_v10 = vld [vmem:[%s8356_s12 + $0x8] sm:$0x1]  ;;  %s6024_s14 = sshll.u32 %s6021_s3, 4  ;;  %s6025_s14 = int_to_ptr.hbm [resolvable:$true] %s6024_s14 }
 0x237   : > { %7083 = vmatmul.msk.bf16.gmra.mxu2 %vm1702_vm1, %v7396_v21  ;;  %v5552_v63 = vrot.slane %v5550_v47, 1  ;;  %v7226_v45 = vld [vmem:[%s8356_s12] sm:$0xe]  ;;  %s7606_s25 = sshra.s32 %s6025_s14, 4  ;;  %s7607_s25 = int_to_ptr.hbm [resolvable:$true] %s7606_s25 }
 0x238   : > { %v5757_v28 = vadd.f32 %v5687_v39, %v5295_v52  ;;  %7245 = vmatmul.msk.bf16.gmra.mxu0 %vm1702_vm1, %v5542_v1  ;;  %v5065_v39 = vshll.u32 %v7413_v46, 16  ;;  %v5072_v43 = vrot.slane %v5070_v14, 1  ;;  %v4135_v54 = vsel %vm2571_vm3, %v4133_v9, %v4134_v35  ;;  %s7608_s4 = scalar_lea.hbm %s7607_s25, 128  ;;  %p7613_p1 = scmp.lt.s32.totalorder %s7607_s25, %s8891_s16 }
 0x239   : > { %p7609_p12 = scmp.ne.s32.totalorder %s7607_s25, %s7608_s4  ;;  %p7614_p2 = scmp.lt.s32.totalorder %s7612_s5, %s7608_s4 }
 0x23a   : > { %vm5853_vm11 = vcmp.ge.f32.partialorder %v5757_v28, 0.0  ;;  %v5885_v4 = vmul.f32 0.1, %v5757_v28  ;;  %7164 = vmatmul.msk.bf16.gmra.mxu3 %vm1702_vm1, %v5053_v0  ;;  %v4622_v27 = vpop.f32.mrf.mxu2  ;;  %v5067_v6 = vrot.slane %v5065_v39, 1 }
 0x23b   : > { %v4690_v13 = vadd.f32 %v4622_v27, %v4340_v2  ;;  %v4274_v22 = vpop.f32.mrf.mxu1  ;;  %v3978_v2 = vld [vmem:[%s7993_s27 + $0x8] sm:$0x1]  ;;  %v5079_v27 = vunpack.c.l.b16 %v4790_v60  ;;  %p7610_p13 = pnand %p7609_p12, %p7819_p4  ;;  %p7615_p3 = por %p7614_p2, %p7613_p1 }
 0x23c   : > { %v5917_v15 = vsel %vm5853_vm11, %v5757_v28, %v5885_v4  ;;  %v4341_v12 = vadd.f32 %v4274_v22, %v8345_v20  ;;  %v5068_v1 = vor.u32 %v5067_v6, %v5063_v53  ;;  %v5553_v20 = vsel %vm2571_vm3, %v5551_v32, %v5552_v63 }
 0x23d   : > { %v7451_v30 = vpack.c.bf16 %v5917_v15, %v5916_v16  ;;  %v5228_v7 = vpop.f32.mrf.mxu3  ;;  %v5692_v36 = vpop.f32.mrf.mxu0  ;;  %v4141_v38 = vunpack.c.l.b16 %v3978_v2  ;;  %v5081_v22 = vpack.c.b16 %v5079_v27, %v5079_v27  ;;  %v5083_v63 = vshrl.u32 %v7414_v59, 16  ;;  %v4793_v59 = vld [vmem:[%s8703_s28 + $0x8] sm:$0x1]  ;;  %p7611_p0 = pneg %p7610_p13 }
 0x23e   : > { %v5296_v21 = vadd.f32 %v5228_v7, %v4690_v13  ;;  %v5073_v51 = vsel %vm1964_vm2, %v5068_v1, %v5072_v43  ;;  %v7382_v13 = vld [vmem:[%s7993_s27] sm:$0xf0] }
 0x23f   : > { %7515 = vst [vmem:[%s8620_s30 + $0x18] sm:$0xff] %v7451_v30   ;;  %v5559_v30 = vunpack.c.l.b16 %v5396_v10  ;;  %v6984_v9 = vor.u32 %v7382_v13, %v6983_v5  ;;  %v4143_v35 = vpack.c.b16 %v4141_v38, %v4141_v38  ;;  %v5090_v1 = vshll.u32 %v5081_v22, 16  ;;  %v3981_v38 = vld [vmem:[%s8356_s12 + $0x8] sm:$0x1]  ;;  %v6987_v22 = vld [vmem:[%s8356_s12] sm:$0xe]  ;;  %p7616_p5 = pnand %p7615_p3, %p7611_p0 }
 0x240   : > { %v5758_v0 = vadd.f32 %v5690_v34, %v5296_v21  ;;  %v5099_v13 = vunpack.c.l.b16 %v4793_v59 }
 0x241   : > { %v5561_v32 = vpack.c.b16 %v5559_v30, %v5559_v30  ;;  %v5399_v30 = vld [vmem:[%s8703_s28 + $0x8] sm:$0x1] }
 0x242   : > { %v4624_v52 = vpop.f32.mrf.mxu2  ;;  %v5886_v34 = vmul.f32 0.1, %v5758_v0  ;;  %vm5854_vm12 = vcmp.ge.f32.partialorder %v5758_v0, 0.0 }
 0x243   : > { %v4691_v55 = vadd.f32 %v4624_v52, %v4341_v12  ;;  %v4277_v28 = vpop.f32.mrf.mxu1  ;;  %v5087_v52 = vrot.slane %v5085_v40, 1  ;;  %v4152_v40 = vunpack.c.l.b16 %v3981_v38 }
 0x244   : > { %v4342_v15 = vadd.f32 %v4277_v28, %v8358_v3  ;;  %v5918_v26 = vsel %vm5854_vm12, %v5758_v0, %v5886_v34 }
 0x245   : > { %v5230_v46 = vpop.f32.mrf.mxu3  ;;  %v5695_v4 = vpop.f32.mrf.mxu0 }
 0x246   : > { %v5297_v37 = vadd.f32 %v5230_v46, %v4691_v55  ;;  %7003 = vmatmul.msk.bf16.gmra.mxu1 %vm1702_vm1, %v4135_v54  ;;  %v4144_v55 = vrot.slane %v6984_v9, 1  ;;  %v5563_v46 = vrot.slane %v5561_v32, 1  ;;  %v5088_v54 = vor.u32 %v5087_v52, %v5083_v63  ;;  %v7431_v9 = vld [vmem:[%s8703_s28] sm:$0xf0] }
 0x247   : > { %7084 = vmatmul.msk.bf16.gmra.mxu2 %vm1702_vm1, %v7397_v41  ;;  %v4145_v41 = vrot.slane %v4143_v35, 1 }
 0x248   : > { %v5759_v39 = vadd.f32 %v5692_v36, %v5297_v37  ;;  %7246 = vmatmul.msk.bf16.gmra.mxu0 %vm1702_vm1, %v5553_v20  ;;  %v7430_v36 = vld [vmem:[%s8356_s12] sm:$0xf0]  ;;  %v5092_v37 = vrot.slane %v5090_v1, 1 }
 0x249   : > { %v7227_v12 = vor.u32 %v7430_v36, %v7226_v45  ;;  %v4146_v34 = vsel %vm2571_vm3, %v4144_v55, %v4145_v41 }
 0x24a   : > { %vm5855_vm13 = vcmp.ge.f32.partialorder %v5759_v39, 0.0  ;;  %v5887_v16 = vmul.f32 0.1, %v5759_v39  ;;  %7165 = vmatmul.msk.bf16.gmra.mxu3 %vm1702_vm1, %v5073_v51  ;;  %v4627_v7 = vpop.f32.mrf.mxu2  ;;  %v7398_v51 = vld [vmem:[%s8356_s12] sm:$0xff] }
 0x24b   : > { %v4692_v53 = vadd.f32 %v4627_v7, %v4342_v15  ;;  %v4279_v21 = vpop.f32.mrf.mxu1  ;;  %v5562_v60 = vrot.slane %v7227_v12, 1  ;;  %v7415_v15 = vld [vmem:[%s8703_s28] sm:$0xff] }
 0x24c   : > { %v5919_v47 = vsel %vm5855_vm13, %v5759_v39, %v5887_v16  ;;  %v4343_v0 = vadd.f32 %v4279_v21, %v8372_v49  ;;  %v5093_v16 = vsel %vm1964_vm2, %v5088_v54, %v5092_v37  ;;  %v7230_v21 = vld [vmem:[%s8703_s28] sm:$0xe] }
 0x24d   : > { %v7456_v6 = vpack.c.bf16 %v5919_v47, %v5918_v26  ;;  %v5233_v14 = vpop.f32.mrf.mxu3  ;;  %v5697_v3 = vpop.f32.mrf.mxu0  ;;  %v5564_v49 = vsel %vm2571_vm3, %v5562_v60, %v5563_v46  ;;  %v7383_v26 = vld [vmem:[%s8356_s12] sm:$0xf0]  ;;  %v5570_v47 = vunpack.c.l.b16 %v5399_v30 }
 0x24e   : > { %v5298_v43 = vadd.f32 %v5233_v14, %v4692_v53  ;;  %v5105_v14 = vshll.u32 %v7415_v15, 16  ;;  %v6988_v1 = vor.u32 %v7383_v26, %v6987_v22 }
 0x24f   : > { %7516 = vst [vmem:[%s8620_s30 + $0x20] sm:$0xff] %v7456_v6   ;;  %v5101_v6 = vpack.c.b16 %v5099_v13, %v5099_v13  ;;  %v5572_v41 = vpack.c.b16 %v5570_v47, %v5570_v47 }
 0x250   : > { %v5760_v20 = vadd.f32 %v5695_v4, %v5298_v43  ;;  %v4154_v43 = vpack.c.b16 %v4152_v40, %v4152_v40  ;;  %v5107_v60 = vrot.slane %v5105_v14, 1  ;;  %v4155_v54 = vrot.slane %v6988_v1, 1 }
 0x251   : > { %v5110_v46 = vshll.u32 %v5101_v6, 16 }
 0x252   : > { %v4629_v28 = vpop.f32.mrf.mxu2  ;;  %v5888_v4 = vmul.f32 0.1, %v5760_v20  ;;  %vm5856_vm14 = vcmp.ge.f32.partialorder %v5760_v20, 0.0  ;;  %v4156_v37 = vrot.slane %v4154_v43, 1 }
 0x253   : > { %v4693_v2 = vadd.f32 %v4629_v28, %v4343_v0  ;;  %v4282_v10 = vpop.f32.mrf.mxu1  ;;  %v5103_v0 = vshrl.u32 %v7415_v15, 16 }
 0x254   : > { %v4344_v36 = vadd.f32 %v4282_v10, %v8379_v23  ;;  %v5920_v35 = vsel %vm5856_vm14, %v5760_v20, %v5888_v4  ;;  %v7231_v23 = vor.u32 %v7431_v9, %v7230_v21  ;;  %v5112_v10 = vrot.slane %v5110_v46, 1 }
 0x255   : > { %v5235_v27 = vpop.f32.mrf.mxu3  ;;  %v5700_v5 = vpop.f32.mrf.mxu0  ;;  %v4157_v13 = vsel %vm2571_vm3, %v4155_v54, %v4156_v37 }
 0x256   : > { %v5299_v39 = vadd.f32 %v5235_v27, %v4693_v2  ;;  %7004 = vmatmul.msk.bf16.gmra.mxu1 %vm1702_vm1, %v4146_v34  ;;  %v5573_v2 = vrot.slane %v7231_v23, 1  ;;  %v5108_v27 = vor.u32 %v5107_v60, %v5103_v0 }
 0x257   : > { %7085 = vmatmul.msk.bf16.gmra.mxu2 %vm1702_vm1, %v7398_v51  ;;  %v5574_v51 = vrot.slane %v5572_v41, 1 }
 0x258   : > { %v5761_v7 = vadd.f32 %v5697_v3, %v5299_v39  ;;  %7247 = vmatmul.msk.bf16.gmra.mxu0 %vm1702_vm1, %v5564_v49  ;;  %v7399_v49 = vld [vmem:[%s8703_s28] sm:$0xff] }
 0x259   : > { %v5575_v4 = vsel %vm2571_vm3, %v5573_v2, %v5574_v51 }
 0x25a   : > { %vm5857_vm15 = vcmp.ge.f32.partialorder %v5761_v7, 0.0  ;;  %v5889_v45 = vmul.f32 0.1, %v5761_v7  ;;  %7166 = vmatmul.msk.bf16.gmra.mxu3 %vm1702_vm1, %v5093_v16  ;;  %v4632_v53 = vpop.f32.mrf.mxu2 }
 0x25b   : > { %v4694_v12 = vadd.f32 %v4632_v53, %v4344_v36  ;;  %v4284_v52 = vpop.f32.mrf.mxu1 }
 0x25c   : > { %v5921_v3 = vsel %vm5857_vm15, %v5761_v7, %v5889_v45  ;;  %v4345_v20 = vadd.f32 %v4284_v52, %v8392_v17  ;;  %v5113_v7 = vsel %vm1964_vm2, %v5108_v27, %v5112_v10 }
 0x25d   : > { %v7461_v32 = vpack.c.bf16 %v5921_v3, %v5920_v35  ;;  %v5238_v63 = vpop.f32.mrf.mxu3  ;;  %v5702_v55 = vpop.f32.mrf.mxu0 }
 0x25e   : > { %v5300_v28 = vadd.f32 %v5238_v63, %v4694_v12 }
 0x25f   : > { %7517 = vst [vmem:[%s8620_s30 + $0x28] sm:$0xff] %v7461_v32  }
 0x260   : > { %v5762_v34 = vadd.f32 %v5700_v5, %v5300_v28 }
 0x262   : > { %v4634_v59 = vpop.f32.mrf.mxu2  ;;  %v5890_v22 = vmul.f32 0.1, %v5762_v34  ;;  %vm5858_vm0 = vcmp.ge.f32.partialorder %v5762_v34, 0.0 }
 0x263   : > { %v4695_v39 = vadd.f32 %v4634_v59, %v4345_v20  ;;  %v4287_v16 = vpop.f32.mrf.mxu1 }
 0x264   : > { %v4346_v40 = vadd.f32 %v4287_v16, %v8401_v48  ;;  %v5922_v36 = vsel %vm5858_vm0, %v5762_v34, %v5890_v22 }
 0x265   : > { %v5240_v38 = vpop.f32.mrf.mxu3  ;;  %v5705_v30 = vpop.f32.mrf.mxu0 }
 0x266   : > { %v5301_v15 = vadd.f32 %v5240_v38, %v4695_v39  ;;  %7005 = vmatmul.msk.bf16.gmra.mxu1 %vm1702_vm1, %v4157_v13 }
 0x267   : > { %7086 = vmatmul.msk.bf16.gmra.mxu2 %vm1702_vm1, %v7399_v49 }
 0x268   : > { %v5763_v17 = vadd.f32 %v5702_v55, %v5301_v15  ;;  %7248 = vmatmul.msk.bf16.gmra.mxu0 %vm1702_vm1, %v5575_v4 }
 0x26a   : > { %vm5859_vm4 = vcmp.ge.f32.partialorder %v5763_v17, 0.0  ;;  %v5891_v5 = vmul.f32 0.1, %v5763_v17  ;;  %7167 = vmatmul.msk.bf16.gmra.mxu3 %vm1702_vm1, %v5113_v7  ;;  %v4637_v45 = vpop.f32.mrf.mxu2 }
 0x26b   : > { %v4696_v47 = vadd.f32 %v4637_v45, %v4346_v40  ;;  %v4289_v14 = vpop.f32.mrf.mxu1 }
 0x26c   : > { %v5923_v26 = vsel %vm5859_vm4, %v5763_v17, %v5891_v5  ;;  %v4347_v35 = vadd.f32 %v4289_v14, %v8414_v29 }
 0x26d   : > { %v7466_v53 = vpack.c.bf16 %v5923_v26, %v5922_v36  ;;  %v5243_v6 = vpop.f32.mrf.mxu3  ;;  %v5707_v21 = vpop.f32.mrf.mxu0 }
 0x26e   : > { %v5302_v9 = vadd.f32 %v5243_v6, %v4696_v47 }
 0x26f   : > { %7518 = vst [vmem:[%s8620_s30 + $0x30] sm:$0xff] %v7466_v53  }
 0x270   : > { %v5764_v12 = vadd.f32 %v5705_v30, %v5302_v9 }
 0x272   : > { %v4639_v3 = vpop.f32.mrf.mxu2  ;;  %v5892_v43 = vmul.f32 0.1, %v5764_v12  ;;  %vm5860_vm1 = vcmp.ge.f32.partialorder %v5764_v12, 0.0 }
 0x273   : > { %v4697_v32 = vadd.f32 %v4639_v3, %v4347_v35  ;;  %v4292_v52 = vpop.f32.mrf.mxu1 }
 0x274   : > { %v4348_v41 = vadd.f32 %v4292_v52, %v8423_v19  ;;  %v5924_v60 = vsel %vm5860_vm1, %v5764_v12, %v5892_v43 }
 0x275   : > { %v5245_v63 = vpop.f32.mrf.mxu3  ;;  %v5710_v1 = vpop.f32.mrf.mxu0 }
 0x276   : > { %v5303_v48 = vadd.f32 %v5245_v63, %v4697_v32 }
 0x278   : > { %v5765_v55 = vadd.f32 %v5707_v21, %v5303_v48 }
 0x27a   : > { %vm5861_vm2 = vcmp.ge.f32.partialorder %v5765_v55, 0.0  ;;  %v5893_v23 = vmul.f32 0.1, %v5765_v55  ;;  %v4642_v0 = vpop.f32.mrf.mxu2 }
 0x27b   : > { %v4698_v28 = vadd.f32 %v4642_v0, %v4348_v41  ;;  %v4294_v37 = vpop.f32.mrf.mxu1 }
 0x27c   : > { %v5925_v46 = vsel %vm5861_vm2, %v5765_v55, %v5893_v23  ;;  %v4349_v51 = vadd.f32 %v4294_v37, %v8436_v42 }
 0x27d   : > { %v7471_v29 = vpack.c.bf16 %v5925_v46, %v5924_v60  ;;  %v5248_v54 = vpop.f32.mrf.mxu3  ;;  %v5712_v20 = vpop.f32.mrf.mxu0 }
 0x27e   : > { %v5304_v2 = vadd.f32 %v5248_v54, %v4698_v28 }
 0x27f   : > { %7519 = vst [vmem:[%s8620_s30 + $0x38] sm:$0xff] %v7471_v29  }
 0x280   : > { %v5766_v27 = vadd.f32 %v5710_v1, %v5304_v2 }
 0x282   : > { %v4644_v59 = vpop.f32.mrf.mxu2  ;;  %v5894_v38 = vmul.f32 0.1, %v5766_v27  ;;  %vm5862_vm3 = vcmp.ge.f32.partialorder %v5766_v27, 0.0 }
 0x283   : > { %v4699_v10 = vadd.f32 %v4644_v59, %v4349_v51  ;;  %v4297_v39 = vpop.f32.mrf.mxu1 }
 0x284   : > { %v4350_v15 = vadd.f32 %v4297_v39, %v8445_v24  ;;  %v5926_v4 = vsel %vm5862_vm3, %v5766_v27, %v5894_v38 }
 0x285   : > { %v5250_v34 = vpop.f32.mrf.mxu3  ;;  %v5715_v19 = vpop.f32.mrf.mxu0 }
 0x286   : > { %v5305_v49 = vadd.f32 %v5250_v34, %v4699_v10 }
 0x288   : > { %v5767_v16 = vadd.f32 %v5712_v20, %v5305_v49 }
 0x28a   : > { %vm5863_vm5 = vcmp.ge.f32.partialorder %v5767_v16, 0.0  ;;  %v5895_v13 = vmul.f32 0.1, %v5767_v16  ;;  %v4647_v30 = vpop.f32.mrf.mxu2 }
 0x28b   : > { %v4700_v22 = vadd.f32 %v4647_v30, %v4350_v15  ;;  %v4299_v5 = vpop.f32.mrf.mxu1 }
 0x28c   : > { %v5927_v7 = vsel %vm5863_vm5, %v5767_v16, %v5895_v13  ;;  %v4351_v36 = vadd.f32 %v4299_v5, %v8458_v50 }
 0x28d   : > { %v7476_v42 = vpack.c.bf16 %v5927_v7, %v5926_v4  ;;  %v5253_v17 = vpop.f32.mrf.mxu3  ;;  %v5717_v40 = vpop.f32.mrf.mxu0 }
 0x28e   : > { %v5306_v45 = vadd.f32 %v5253_v17, %v4700_v22 }
 0x28f   : > { %7520 = vst [vmem:[%s8620_s30 + $0x40] sm:$0xff] %v7476_v42  }
 0x290   : > { %v5768_v47 = vadd.f32 %v5715_v19, %v5306_v45 }
 0x292   : > { %v4649_v26 = vpop.f32.mrf.mxu2  ;;  %v5896_v9 = vmul.f32 0.1, %v5768_v47  ;;  %vm5864_vm6 = vcmp.ge.f32.partialorder %v5768_v47, 0.0 }
 0x293   : > { %v4701_v53 = vadd.f32 %v4649_v26, %v4351_v36  ;;  %v4302_v14 = vpop.f32.mrf.mxu1 }
 0x294   : > { %v4352_v12 = vadd.f32 %v4302_v14, %v8467_v62  ;;  %v5928_v63 = vsel %vm5864_vm6, %v5768_v47, %v5896_v9 }
 0x295   : > { %v5255_v6 = vpop.f32.mrf.mxu3  ;;  %v5720_v24 = vpop.f32.mrf.mxu0 }
 0x296   : > { %v5307_v21 = vadd.f32 %v5255_v6, %v4701_v53 }
 0x298   : > { %v5769_v35 = vadd.f32 %v5717_v40, %v5307_v21 }
 0x29a   : > { %vm5865_vm7 = vcmp.ge.f32.partialorder %v5769_v35, 0.0  ;;  %v5897_v3 = vmul.f32 0.1, %v5769_v35  ;;  %v4652_v32 = vpop.f32.mrf.mxu2 }
 0x29b   : > { %v4702_v48 = vadd.f32 %v4652_v32, %v4352_v12  ;;  %v4304_v43 = vpop.f32.mrf.mxu1 }
 0x29c   : > { %v5929_v52 = vsel %vm5865_vm7, %v5769_v35, %v5897_v3  ;;  %v4353_v41 = vadd.f32 %v4304_v43, %v8480_v31 }
 0x29d   : > { %v7481_v50 = vpack.c.bf16 %v5929_v52, %v5928_v63  ;;  %v5258_v1 = vpop.f32.mrf.mxu3  ;;  %v5722_v55 = vpop.f32.mrf.mxu0 }
 0x29e   : > { %v5308_v23 = vadd.f32 %v5258_v1, %v4702_v48 }
 0x29f   : > { %7521 = vst [vmem:[%s8620_s30 + $0x48] sm:$0xff] %v7481_v50  }
 0x2a0   : > { %v5770_v60 = vadd.f32 %v5720_v24, %v5308_v23 }
 0x2a2   : > { %v4654_v0 = vpop.f32.mrf.mxu2  ;;  %v5898_v37 = vmul.f32 0.1, %v5770_v60  ;;  %vm5866_vm8 = vcmp.ge.f32.partialorder %v5770_v60, 0.0 }
 0x2a3   : > { %v4703_v46 = vadd.f32 %v4654_v0, %v4353_v41  ;;  %v4307_v29 = vpop.f32.mrf.mxu1 }
 0x2a4   : > { %v4354_v51 = vadd.f32 %v4307_v29, %v8489_v57  ;;  %v5930_v27 = vsel %vm5866_vm8, %v5770_v60, %v5898_v37 }
 0x2a5   : > { %v5260_v28 = vpop.f32.mrf.mxu3  ;;  %v5725_v62 = vpop.f32.mrf.mxu0 }
 0x2a6   : > { %v5309_v54 = vadd.f32 %v5260_v28, %v4703_v46 }
 0x2a8   : > { %v5771_v20 = vadd.f32 %v5722_v55, %v5309_v54 }
 0x2aa   : > { %vm5867_vm9 = vcmp.ge.f32.partialorder %v5771_v20, 0.0  ;;  %v5899_v2 = vmul.f32 0.1, %v5771_v20  ;;  %v4657_v59 = vpop.f32.mrf.mxu2 }
 0x2ab   : > { %v4704_v34 = vadd.f32 %v4657_v59, %v4354_v51  ;;  %v4309_v49 = vpop.f32.mrf.mxu1 }
 0x2ac   : > { %v5931_v10 = vsel %vm5867_vm9, %v5771_v20, %v5899_v2  ;;  %v4355_v16 = vadd.f32 %v4309_v49, %v8502_v56 }
 0x2ad   : > { %v7486_v31 = vpack.c.bf16 %v5931_v10, %v5930_v27  ;;  %v5263_v39 = vpop.f32.mrf.mxu3  ;;  %v5727_v19 = vpop.f32.mrf.mxu0 }
 0x2ae   : > { %v5310_v38 = vadd.f32 %v5263_v39, %v4704_v34 }
 0x2af   : > { %7522 = vst [vmem:[%s8620_s30 + $0x50] sm:$0xff] %v7486_v31  }
 0x2b0   : > { %v5772_v15 = vadd.f32 %v5725_v62, %v5310_v38 }
 0x2b2   : > { %v4659_v13 = vpop.f32.mrf.mxu2  ;;  %v5900_v42 = vmul.f32 0.1, %v5772_v15  ;;  %vm5868_vm10 = vcmp.ge.f32.partialorder %v5772_v15, 0.0 }
 0x2b3   : > { %v4705_v30 = vadd.f32 %v4659_v13, %v4355_v16  ;;  %v4312_v7 = vpop.f32.mrf.mxu1 }
 0x2b4   : > { %v4356_v40 = vadd.f32 %v4312_v7, %v8511_v11  ;;  %v5932_v36 = vsel %vm5868_vm10, %v5772_v15, %v5900_v42 }
 0x2b5   : > { %v5265_v4 = vpop.f32.mrf.mxu3  ;;  %v5730_v57 = vpop.f32.mrf.mxu0 }
 0x2b6   : > { %v5311_v22 = vadd.f32 %v5265_v4, %v4705_v30 }
 0x2b8   : > { %v5773_v17 = vadd.f32 %v5727_v19, %v5311_v22 }
 0x2ba   : > { %vm5869_vm11 = vcmp.ge.f32.partialorder %v5773_v17, 0.0  ;;  %v5901_v5 = vmul.f32 0.1, %v5773_v17  ;;  %v4662_v45 = vpop.f32.mrf.mxu2 }
 0x2bb   : > { %v4706_v47 = vadd.f32 %v4662_v45, %v4356_v40  ;;  %v4314_v6 = vpop.f32.mrf.mxu1 }
 0x2bc   : > { %v5933_v26 = vsel %vm5869_vm11, %v5773_v17, %v5901_v5  ;;  %v4357_v24 = vadd.f32 %v4314_v6, %v8524_v8 }
 0x2bd   : > { %v7491_v56 = vpack.c.bf16 %v5933_v26, %v5932_v36  ;;  %v5268_v53 = vpop.f32.mrf.mxu3  ;;  %v5732_v14 = vpop.f32.mrf.mxu0 }
 0x2be   : > { %v5312_v21 = vadd.f32 %v5268_v53, %v4706_v47 }
 0x2bf   : > { %7523 = vst [vmem:[%s8620_s30 + $0x58] sm:$0xff] %v7491_v56  }
 0x2c0   : > { %v5774_v35 = vadd.f32 %v5730_v57, %v5312_v21 }
 0x2c2   : > { %v4664_v9 = vpop.f32.mrf.mxu2  ;;  %v5902_v52 = vmul.f32 0.1, %v5774_v35  ;;  %vm5870_vm12 = vcmp.ge.f32.partialorder %v5774_v35, 0.0 }
 0x2c3   : > { %v4707_v3 = vadd.f32 %v4664_v9, %v4357_v24  ;;  %v4317_v32 = vpop.f32.mrf.mxu1 }
 0x2c4   : > { %v4358_v1 = vadd.f32 %v4317_v32, %v8533_v18  ;;  %v5934_v55 = vsel %vm5870_vm12, %v5774_v35, %v5902_v52 }
 0x2c5   : > { %v5270_v12 = vpop.f32.mrf.mxu3  ;;  %v5735_v11 = vpop.f32.mrf.mxu0 }
 0x2c6   : > { %v5313_v63 = vadd.f32 %v5270_v12, %v4707_v3 }
 0x2c8   : > { %v5775_v48 = vadd.f32 %v5732_v14, %v5313_v63 }
 0x2ca   : > { %vm5871_vm13 = vcmp.ge.f32.partialorder %v5775_v48, 0.0  ;;  %v5903_v50 = vmul.f32 0.1, %v5775_v48  ;;  %v4667_v43 = vpop.f32.mrf.mxu2 }
 0x2cb   : > { %v4708_v41 = vadd.f32 %v4667_v43, %v4358_v1  ;;  %v4319_v60 = vpop.f32.mrf.mxu1 }
 0x2cc   : > { %v5935_v23 = vsel %vm5871_vm13, %v5775_v48, %v5903_v50  ;;  %v4359_v29 = vadd.f32 %v4319_v60, %v8546_v25 }
 0x2cd   : > { %v7496_v8 = vpack.c.bf16 %v5935_v23, %v5934_v55  ;;  %v5273_v0 = vpop.f32.mrf.mxu3  ;;  %v5737_v46 = vpop.f32.mrf.mxu0 }
 0x2ce   : > { %v5314_v28 = vadd.f32 %v5273_v0, %v4708_v41 }
 0x2cf   : > { %7524 = vst [vmem:[%s8620_s30 + $0x60] sm:$0xff] %v7496_v8  }
 0x2d0   : > { %v5776_v62 = vadd.f32 %v5735_v11, %v5314_v28 }
 0x2d2   : > { %v4669_v54 = vpop.f32.mrf.mxu2  ;;  %v5904_v18 = vmul.f32 0.1, %v5776_v62  ;;  %vm5872_vm14 = vcmp.ge.f32.partialorder %v5776_v62, 0.0 }
 0x2d3   : > { %v4709_v37 = vadd.f32 %v4669_v54, %v4359_v29  ;;  %v4322_v2 = vpop.f32.mrf.mxu1 }
 0x2d4   : > { %v4360_v34 = vadd.f32 %v4322_v2, %v8555_v44  ;;  %v5936_v39 = vsel %vm5872_vm14, %v5776_v62, %v5904_v18 }
 0x2d5   : > { %v5275_v20 = vpop.f32.mrf.mxu3  ;;  %v5740_v27 = vpop.f32.mrf.mxu0 }
 0x2d6   : > { %v5315_v51 = vadd.f32 %v5275_v20, %v4709_v37 }
 0x2d8   : > { %v5777_v59 = vadd.f32 %v5737_v46, %v5315_v51 }
 0x2da   : > { %vm5873_vm15 = vcmp.ge.f32.partialorder %v5777_v59, 0.0  ;;  %v5905_v10 = vmul.f32 0.1, %v5777_v59  ;;  %v4672_v31 = vpop.f32.mrf.mxu2 }
 0x2db   : > { %v4710_v19 = vadd.f32 %v4672_v31, %v4360_v34  ;;  %v4324_v16 = vpop.f32.mrf.mxu1 }
 0x2dc   : > { %v5937_v49 = vsel %vm5873_vm15, %v5777_v59, %v5905_v10  ;;  %v4361_v15 = vadd.f32 %v4324_v16, %v8568_v58 }
 0x2dd   : > { %v7501_v25 = vpack.c.bf16 %v5937_v49, %v5936_v39  ;;  %v5278_v38 = vpop.f32.mrf.mxu3  ;;  %v5742_v30 = vpop.f32.mrf.mxu0 }
 0x2de   : > { %v5316_v13 = vadd.f32 %v5278_v38, %v4710_v19 }
 0x2df   : > { %7525 = vst [vmem:[%s8620_s30 + $0x68] sm:$0xff] %v7501_v25  }
 0x2e0   : > { %v5778_v7 = vadd.f32 %v5740_v27, %v5316_v13 }
 0x2e2   : > { %v4674_v4 = vpop.f32.mrf.mxu2  ;;  %v5906_v44 = vmul.f32 0.1, %v5778_v7  ;;  %vm5874_vm0 = vcmp.ge.f32.partialorder %v5778_v7, 0.0 }
 0x2e3   : > { %v4711_v22 = vadd.f32 %v4674_v4, %v4361_v15  ;;  %v4327_v42 = vpop.f32.mrf.mxu1 }
 0x2e4   : > { %v4362_v45 = vadd.f32 %v4327_v42, %v8577_v33  ;;  %v5938_v26 = vsel %vm5874_vm0, %v5778_v7, %v5906_v44 }
 0x2e5   : > { %v5280_v57 = vpop.f32.mrf.mxu3  ;;  %v5745_v53 = vpop.f32.mrf.mxu0 }
 0x2e6   : > { %v5317_v17 = vadd.f32 %v5280_v57, %v4711_v22 }
 0x2e8   : > { %v5779_v5 = vadd.f32 %v5742_v30, %v5317_v17 }
 0x2ea   : > { %vm5875_vm4 = vcmp.ge.f32.partialorder %v5779_v5, 0.0  ;;  %v5907_v40 = vmul.f32 0.1, %v5779_v5  ;;  %v4677_v36 = vpop.f32.mrf.mxu2 }
 0x2eb   : > { %v4712_v58 = vadd.f32 %v4677_v36, %v4362_v45  ;;  %v4329_v14 = vpop.f32.mrf.mxu1 }
 0x2ec   : > { %v5939_v47 = vsel %vm5875_vm4, %v5779_v5, %v5907_v40  ;;  %v4363_v24 = vadd.f32 %v4329_v14, %v8589_v61 }
 0x2ed   : > { %v7506_v56 = vpack.c.bf16 %v5939_v47, %v5938_v26  ;;  %v5283_v6 = vpop.f32.mrf.mxu3  ;;  %v5747_v32 = vpop.f32.mrf.mxu0 }
 0x2ee   : > { %v5318_v21 = vadd.f32 %v5283_v6, %v4712_v58 }
 0x2ef   : > { %7526 = vst [vmem:[%s8620_s30 + $0x70] sm:$0xff] %v7506_v56  }
 0x2f0   : > { %v5780_v35 = vadd.f32 %v5745_v53, %v5318_v21 }
 0x2f2   : > { %v4679_v9 = vpop.f32.mrf.mxu2  ;;  %v5908_v63 = vmul.f32 0.1, %v5780_v35  ;;  %vm5876_vm1 = vcmp.ge.f32.partialorder %v5780_v35, 0.0 }
 0x2f3   : > { %v4713_v3 = vadd.f32 %v4679_v9, %v4363_v24 }
 0x2f4   : > { %v5940_v52 = vsel %vm5876_vm1, %v5780_v35, %v5908_v63 }
 0x2f5   : > { %v5285_v12 = vpop.f32.mrf.mxu3 }
 0x2f6   : > { %v5319_v33 = vadd.f32 %v5285_v12, %v4713_v3 }
 0x2f8   : > { %v5781_v11 = vadd.f32 %v5747_v32, %v5319_v33 }
 0x2fa   : > { %vm5877_vm2 = vcmp.ge.f32.partialorder %v5781_v11, 0.0  ;;  %v5909_v61 = vmul.f32 0.1, %v5781_v11 }
 0x2fc   : > { %v5941_v48 = vsel %vm5877_vm2, %v5781_v11, %v5909_v61 }
 0x2fd   : > { %v7511_v50 = vpack.c.bf16 %v5941_v48, %v5940_v52 }
 0x2ff   : > { %7527 = vst [vmem:[%s8620_s30 + $0x78] sm:$0xff] %v7511_v50  }
 0x300   : > { %7619 = shalt.err (!%p7616_p5)
}
 0x301   : > { %s7672_s6 = smov 64   ;;  %s7673_s9 = smov 4  }
 0x302   : > { %7533 = dma.vmem_to_hbm [thread:$0]  (%p7819_p4), %s6023_s10, 2048, %s6025_s14, %s6007_s0, %s7672_s6, %s7672_s6, %s7673_s9  }
 0x303 PF: > { %s8893_s22 = sld [smem:[#allocation11_spill]] }
 0x304   : > { %s8894_s30 = sld [smem:[#allocation6_spill]] }
 0x309   : > { %p7540_p6 = scmp.ge.s32.totalorder %s8893_s22, 2 }
 0x30a   : > { %s6039_s26 = sand.u32 1, %s8894_s30  }
 0x30b   : > { %p7536_p7 = pnand %p7540_p6, %p7826_p8  ;;  %s6040_s29 = scalar_lea.sflag [#allocation4], %s6039_s26 }
 0x30d   : > { %p7537_p9 = pneg %p7536_p7 }
 0x30f   : > { %7645 = dma.done.wait (%p7537_p9), %s6040_s29, 2048  }
 0x310   : > { %7647 = vsyncadd (%p7537_p9), %s6040_s29, 4294965248  ;;  %s33_s25 = sadd.s32 1, %s8893_s22   ;;  %s8896_s1 = sld [smem:[#allocation7_spill]] }
 0x311   : > { %p30_p10 = scmp.ge.s32.totalorder %s33_s25, 4   ;;  %s8897_s22 = sld [smem:[#allocation8_spill]] }
 0x312   : > { %s8898_s23 = sld [smem:[#allocation15_spill]] }
 0x313   : > { %s8899_s24 = sld [smem:[#allocation10_spill]]  ;;  %32 = sbr.rel (!%p30_p10) target bundleno = 21 (0x15), region = 200 }
 0x314   : > { %s8900_s2 = sld [smem:[#allocation12_spill]] }
 0x318   :  { %6046 = vsyncpa [#allocation4], 1 }
 0x319   :  { %6048 = vsyncpa [#allocation4 + $0x1], 1 }

</bundles_post_ra>
